<compile_context>
chip_gen: v7x
topology: tpu7x:2x2x1
jax: 0.10.0
libtpu: 0.0.40
codegen_flags: <defaults>
</compile_context>

<pallas_src>
import jax
import jax.numpy as jnp
from jax.experimental import pallas as pl
from jax.experimental.pallas import tpu as pltpu

NEG_SLOPE = 0.01   # torch.nn.LeakyReLU default negative_slope
KS = 3             # 3x3 convolutions throughout
T = KS * KS
LPAD = 8           # left halo pad so the interior activation store is sublane-aligned


# ---------------------------------------------------------------------------
# Fused Pallas kernel (one grid step = one image, all layers)
# ---------------------------------------------------------------------------
def _make_block_kernel(H, W, hidden, n_conv):
    HW = H * W

    def kernel(*refs):
        # in_refs:  x_im2col, (w, b) * n_conv, wz, bz, sz
        # out_refs: shift, scale
        # scratch:  pad_ref (resident padded activation), col_ref (im2col slab)
        x_ref = refs[0]
        conv_wb = [(refs[1 + 2 * i], refs[2 + 2 * i]) for i in range(n_conv)]
        wz_ref, bz_ref, sz_ref = refs[1 + 2 * n_conv:4 + 2 * n_conv]
        shift_ref, scale_ref, pad_ref, col_ref = refs[4 + 2 * n_conv:]

        half = shift_ref.shape[1]
        PW = pad_ref.shape[1]
        act_dt = pad_ref.dtype

        def leaky(z):                      # LeakyReLU without compare+select
            return jnp.maximum(z, NEG_SLOPE * z)

        def write_act(y):                  # aligned interior store (col offset LPAD=8)
            pad_ref[1:H + 1, LPAD:LPAD + W, :] = y.reshape(H, W, hidden).astype(act_dt)

        def gather_patches():
            # Build the (H, W, 9*hidden) im2col slab: each misaligned tap is read
            # once and written to an aligned destination; one reshape feeds the dot.
            for ky in range(KS):
                for kx in range(KS):
                    t = ky * KS + kx
                    col_ref[:, :, t * hidden:(t + 1) * hidden] = \
                        pad_ref[ky:ky + H, LPAD - 1 + kx:LPAD - 1 + kx + W, :]
            return col_ref[...].reshape(HW, T * hidden)

        # Zero only the thin halo ring (the interior is fully overwritten each layer).
        # Done every grid step: ring-only is cheap and stays correct under megacore
        # sharding of the "parallel" batch axis (per-core scratch, see header note).
        pad_ref[0:1, LPAD - 1:PW, :] = jnp.zeros((1, W + 2, hidden), act_dt)
        pad_ref[H + 1:H + 2, LPAD - 1:PW, :] = jnp.zeros((1, W + 2, hidden), act_dt)
        pad_ref[1:H + 1, LPAD - 1:LPAD, :] = jnp.zeros((H, 1, hidden), act_dt)
        pad_ref[1:H + 1, LPAD + W:PW, :] = jnp.zeros((H, 1, hidden), act_dt)

        # layer 0: wrapper pre-im2col'd input -> single deep-K dot, LeakyReLU
        w0_ref, b0_ref = conv_wb[0]
        z = jnp.dot(x_ref[0], w0_ref[...], preferred_element_type=jnp.float32) + b0_ref[...]
        write_act(leaky(z))

        # hidden layers: hidden -> hidden, LeakyReLU (one dot each, K = 9*hidden)
        for li in range(1, n_conv):
            w_ref, b_ref = conv_wb[li]
            patches = gather_patches()
            z = jnp.dot(patches, w_ref[...], preferred_element_type=jnp.float32) + b_ref[...]
            write_act(leaky(z))

        # BasicConv2dZeros: (conv + b) * exp(logs*3); channels pre-permuted so the
        # 'cross' split is a contiguous [shift | scale] split.
        patches = gather_patches()
        yz = (jnp.dot(patches, wz_ref[...], preferred_element_type=jnp.float32)
              + bz_ref[...]) * sz_ref[...]
        yzt = yz.T                                       # (Cout, H*W): lane-dense
        shift_ref[0] = yzt[:half].astype(shift_ref.dtype)
        scale_ref[0] = (jax.nn.sigmoid(yzt[half:]) + 0.5).astype(scale_ref.dtype)

    return kernel


# ---------------------------------------------------------------------------
# JAX wrapper: parameter layout + pallas_call
# ---------------------------------------------------------------------------
def conv2d_block_forward(x_nchw, params, compute_dtype=jnp.bfloat16,
                         out_dtype=jnp.float32):
    """Forward pass of Conv2dBlock. Returns (scale, shift) in NCHW."""
    N, Cin, H, W = x_nchw.shape
    convs = params["convs"]
    n_conv = len(convs)
    hidden = convs[0][0].shape[0]
    zw, zb, zlogs = params["zero_w"], params["zero_b"], params["zero_logs"]
    Cout = zw.shape[0]
    assert Cout % 2 == 0, "split_feature('cross') requires an even out_channels"
    half = Cout // 2
    HW = H * W
    PH, PW = H + 2, W + LPAD + 1

    # Layer-0 input: pre-im2col once in the wrapper -> (N, HW, 9*Cin).  Negligible
    # HBM blow-up at small Cin and removes all layer-0 tap shuffles from the kernel.
    x = jnp.transpose(x_nchw, (0, 2, 3, 1))                       # NHWC
    xp = jnp.pad(x, ((0, 0), (1, 1), (1, 1), (0, 0)))
    taps = [xp[:, ky:ky + H, kx:kx + W, :] for ky in range(KS) for kx in range(KS)]
    x_col = jnp.concatenate(taps, axis=-1).reshape(N, HW, T * Cin).astype(compute_dtype)

    inputs = [x_col]
    in_specs = [pl.BlockSpec((1, HW, T * Cin), lambda n: (n, 0, 0))]

    # layer 0 weight: OIHW -> (9*Cin, hidden), tap-major / channel-minor rows
    w0, b0 = convs[0]
    w0t = jnp.transpose(w0, (2, 3, 1, 0)).reshape(T * Cin, hidden)
    inputs += [w0t.astype(compute_dtype), b0.reshape(1, hidden).astype(jnp.float32)]
    in_specs += [pl.BlockSpec((T * Cin, hidden), lambda n: (0, 0)),
                 pl.BlockSpec((1, hidden), lambda n: (0, 0))]

    # hidden layers: OIHW -> (9*hidden, hidden)
    for w, b in convs[1:]:
        wt = jnp.transpose(w, (2, 3, 1, 0)).reshape(T * hidden, hidden)
        inputs += [wt.astype(compute_dtype), b.reshape(1, hidden).astype(jnp.float32)]
        in_specs += [pl.BlockSpec((T * hidden, hidden), lambda n: (0, 0)),
                     pl.BlockSpec((1, hidden), lambda n: (0, 0))]

    # Final zeros-conv params: permute output channels so the even/odd 'cross' split
    # becomes contiguous, and hoist exp(logs*3) out of the kernel.
    perm = jnp.concatenate([jnp.arange(0, Cout, 2), jnp.arange(1, Cout, 2)])
    wz = jnp.transpose(zw, (2, 3, 1, 0))[..., perm].reshape(T * hidden, Cout)
    bz = zb[perm].reshape(1, Cout)
    sz = jnp.exp(zlogs * 3.0)[perm].reshape(1, Cout)
    inputs += [wz.astype(compute_dtype), bz.astype(jnp.float32), sz.astype(jnp.float32)]
    in_specs += [pl.BlockSpec((T * hidden, Cout), lambda n: (0, 0)),
                 pl.BlockSpec((1, Cout), lambda n: (0, 0)),
                 pl.BlockSpec((1, Cout), lambda n: (0, 0))]

    # Explicit VMEM budget: scratch + double-buffered input/output blocks, with headroom.
    item = jnp.dtype(compute_dtype).itemsize
    scratch_bytes = (PH * PW * hidden + H * W * T * hidden) * item
    io_bytes = 2 * sum(int(a.size) * jnp.dtype(a.dtype).itemsize for a in inputs)
    io_bytes += 2 * 2 * half * HW * jnp.dtype(out_dtype).itemsize
    vmem_limit = int(min(64 * 2**20, max(32 * 2**20, 4 * (scratch_bytes + io_bytes))))

    shift, scale = pl.pallas_call(
        _make_block_kernel(H, W, hidden, n_conv),
        out_shape=(jax.ShapeDtypeStruct((N, half, HW), out_dtype),
                   jax.ShapeDtypeStruct((N, half, HW), out_dtype)),
        grid=(N,),
        in_specs=in_specs,
        out_specs=(pl.BlockSpec((1, half, HW), lambda n: (n, 0, 0)),
                   pl.BlockSpec((1, half, HW), lambda n: (n, 0, 0))),
        scratch_shapes=[pltpu.VMEM((PH, PW, hidden), compute_dtype),      # resident act
                        pltpu.VMEM((H, W, T * hidden), compute_dtype)],   # im2col slab
        compiler_params=pltpu.CompilerParams(
            dimension_semantics=("parallel",),
            vmem_limit_bytes=vmem_limit),
    )(*inputs)

    # (N, C/2, H*W) is already channel-major: a reshape gives NCHW directly.
    return scale.reshape(N, half, H, W), shift.reshape(N, half, H, W)


# ---------------------------------------------------------------------------
# Pure-JAX reference (for correctness check)
# ---------------------------------------------------------------------------
def ref_forward(x, params):
    def conv(x, w, b):
        y = jax.lax.conv_general_dilated(
            x, w, (1, 1), "SAME", dimension_numbers=("NCHW", "OIHW", "NCHW"))
        return y + b[None, :, None, None]

    for w, b in params["convs"]:
        x = conv(x, w, b)
        x = jnp.where(x >= 0, x, NEG_SLOPE * x)
    y = conv(x, params["zero_w"], params["zero_b"])
    y = y * jnp.exp(params["zero_logs"] * 3.0)[None, :, None, None]
    shift = y[:, 0::2]
    scale = jax.nn.sigmoid(y[:, 1::2]) + 0.5
    return scale, shift


# ---------------------------------------------------------------------------
if __name__ == "__main__":
    key = jax.random.PRNGKey(0)
    N, Cin, H, W = 2, 4, 16, 16
    hidden, Cout, n_hidden = 32, 8, 1
    keys = jax.random.split(key, 8)

    x = jax.random.normal(keys[0], (N, Cin, H, W), jnp.float32)

    convs = []
    k_idx = 1
    for ci, co in [(Cin, hidden)] + [(hidden, hidden)] * n_hidden:
        w = 0.05 * jax.random.normal(keys[k_idx], (co, ci, 3, 3), jnp.float32); k_idx += 1
        b = 0.05 * jax.random.normal(keys[k_idx], (co,), jnp.float32); k_idx += 1
        convs.append((w, b))
    # TODO(synk): BasicConv2dZeros is zero-initialized in the original module; use small
    # deterministic random values here so the kernel computes something non-trivial.
    zw = 0.05 * jax.random.normal(keys[k_idx], (Cout, hidden, 3, 3), jnp.float32); k_idx += 1
    zb = 0.05 * jax.random.normal(keys[k_idx], (Cout,), jnp.float32); k_idx += 1
    zl = 0.05 * jax.random.normal(keys[k_idx], (Cout,), jnp.float32)

    params = {"convs": convs, "zero_w": zw, "zero_b": zb, "zero_logs": zl}

    scale_want, shift_want = ref_forward(x, params)

    # Exact path (f32 matmul operands, f32 resident activation).
    scale32, shift32 = conv2d_block_forward(x, params, compute_dtype=jnp.float32)
    scale32 = jax.block_until_ready(scale32)
    shift32 = jax.block_until_ready(shift32)
    assert scale32.shape == (N, Cout // 2, H, W) and shift32.shape == (N, Cout // 2, H, W)
    assert jnp.allclose(scale32, scale_want, atol=1e-4, rtol=1e-4), "f32 scale mismatch"
    assert jnp.allclose(shift32, shift_want, atol=1e-4, rtol=1e-4), "f32 shift mismatch"

    # Fast path (bf16 MXU operands + bf16 resident activation, f32 accumulation).
    scale_bf, shift_bf = conv2d_block_forward(x, params, compute_dtype=jnp.bfloat16)
    scale_bf = jax.block_until_ready(scale_bf)
    shift_bf = jax.block_until_ready(shift_bf)
    assert jnp.allclose(scale_bf, scale_want, atol=5e-2, rtol=5e-2), "bf16 scale mismatch"
    assert jnp.allclose(shift_bf, shift_want, atol=5e-2, rtol=5e-2), "bf16 shift mismatch"

    print("KERNEL_OK")
</pallas_src>

<mosaic_0001>
module attributes {stable_mosaic.version = 11 : i64} {
  func.func @kernel(%arg0: i32, %arg1: memref<1x256x36xf32, #tpu.memory_space<vmem>>, %arg2: memref<36x32xf32, #tpu.memory_space<vmem>>, %arg3: memref<1x32xf32, #tpu.memory_space<vmem>>, %arg4: memref<288x32xf32, #tpu.memory_space<vmem>>, %arg5: memref<1x32xf32, #tpu.memory_space<vmem>>, %arg6: memref<288x8xf32, #tpu.memory_space<vmem>>, %arg7: memref<1x8xf32, #tpu.memory_space<vmem>>, %arg8: memref<1x8xf32, #tpu.memory_space<vmem>>, %arg9: memref<1x4x256xf32, #tpu.memory_space<vmem>>, %arg10: memref<1x4x256xf32, #tpu.memory_space<vmem>>, %arg11: memref<18x25x32xf32, #tpu.memory_space<vmem>>, %arg12: memref<16x16x288xf32, #tpu.memory_space<vmem>>) attributes {dimension_semantics = [#tpu.dimension_semantics<parallel>], iteration_bounds = array<i64: 2>, scalar_prefetch = 0 : i64, scratch_operands = 2 : i64, tpu.core_type = #tpu.core_type<tc>, window_params = [{transform_indices = @transform_0, window_bounds = array<i64: 1, 256, 36>}, {pipeline_mode = #tpu.pipeline_mode<synchronous>, transform_indices = @transform_1, window_bounds = array<i64: 36, 32>}, {pipeline_mode = #tpu.pipeline_mode<synchronous>, transform_indices = @transform_2, window_bounds = array<i64: 1, 32>}, {pipeline_mode = #tpu.pipeline_mode<synchronous>, transform_indices = @transform_3, window_bounds = array<i64: 288, 32>}, {pipeline_mode = #tpu.pipeline_mode<synchronous>, transform_indices = @transform_4, window_bounds = array<i64: 1, 32>}, {pipeline_mode = #tpu.pipeline_mode<synchronous>, transform_indices = @transform_5, window_bounds = array<i64: 288, 8>}, {pipeline_mode = #tpu.pipeline_mode<synchronous>, transform_indices = @transform_6, window_bounds = array<i64: 1, 8>}, {pipeline_mode = #tpu.pipeline_mode<synchronous>, transform_indices = @transform_7, window_bounds = array<i64: 1, 8>}, {transform_indices = @transform_8, window_bounds = array<i64: 1, 4, 256>}, {transform_indices = @transform_9, window_bounds = array<i64: 1, 4, 256>}]} {
    %cst = arith.constant 0.000000e+00 : f32
    %0 = vector.broadcast %cst : f32 to vector<1x18x32xf32>
    %c0 = arith.constant 0 : index
    %c7 = arith.constant 7 : index
    %c0_0 = arith.constant 0 : index
    %1 = vector.load %arg11[%c0, %c7, %c0_0] : memref<18x25x32xf32, #tpu.memory_space<vmem>>, vector<1x18x32xf32>
    tpu.vector_store %arg11[%c0, %c7, %c0_0], %0 {strides = array<i32>} : memref<18x25x32xf32, #tpu.memory_space<vmem>>, vector<1x18x32xf32>,
    %cst_1 = arith.constant 0.000000e+00 : f32
    %2 = vector.broadcast %cst_1 : f32 to vector<1x18x32xf32>
    %c17 = arith.constant 17 : index
    %c7_2 = arith.constant 7 : index
    %c0_3 = arith.constant 0 : index
    %3 = vector.load %arg11[%c17, %c7_2, %c0_3] : memref<18x25x32xf32, #tpu.memory_space<vmem>>, vector<1x18x32xf32>
    tpu.vector_store %arg11[%c17, %c7_2, %c0_3], %2 {strides = array<i32>} : memref<18x25x32xf32, #tpu.memory_space<vmem>>, vector<1x18x32xf32>,
    %cst_4 = arith.constant 0.000000e+00 : f32
    %4 = vector.broadcast %cst_4 : f32 to vector<16x1x32xf32>
    %c1 = arith.constant 1 : index
    %c7_5 = arith.constant 7 : index
    %c0_6 = arith.constant 0 : index
    %5 = vector.load %arg11[%c1, %c7_5, %c0_6] : memref<18x25x32xf32, #tpu.memory_space<vmem>>, vector<16x1x32xf32>
    tpu.vector_store %arg11[%c1, %c7_5, %c0_6], %4 {strides = array<i32>} : memref<18x25x32xf32, #tpu.memory_space<vmem>>, vector<16x1x32xf32>,
    %cst_7 = arith.constant 0.000000e+00 : f32
    %6 = vector.broadcast %cst_7 : f32 to vector<16x1x32xf32>
    %c1_8 = arith.constant 1 : index
    %c24 = arith.constant 24 : index
    %c0_9 = arith.constant 0 : index
    %7 = vector.load %arg11[%c1_8, %c24, %c0_9] : memref<18x25x32xf32, #tpu.memory_space<vmem>>, vector<16x1x32xf32>
    tpu.vector_store %arg11[%c1_8, %c24, %c0_9], %6 {strides = array<i32>} : memref<18x25x32xf32, #tpu.memory_space<vmem>>, vector<16x1x32xf32>,
    %c0_10 = arith.constant 0 : index
    %c0_11 = arith.constant 0 : index
    %c0_12 = arith.constant 0 : index
    %8 = vector.load %arg1[%c0_10, %c0_11, %c0_12] : memref<1x256x36xf32, #tpu.memory_space<vmem>>, vector<1x256x36xf32>
    %9 = vector.shape_cast %8 : vector<1x256x36xf32> to vector<256x36xf32>
    %c0_13 = arith.constant 0 : index
    %c0_14 = arith.constant 0 : index
    %10 = vector.load %arg2[%c0_13, %c0_14] : memref<36x32xf32, #tpu.memory_space<vmem>>, vector<36x32xf32>
    %cst_15 = arith.constant dense<0.000000e+00> : vector<256x32xf32>
    %11 = tpu.matmul %9, %10, %cst_15 {dimension_numbers = #tpu.dot_dimension_numbers<[1], [0], [0], [1], [0, 0, 1, 1], [], []>} : vector<256x36xf32>, vector<36x32xf32>, vector<256x32xf32> -> vector<256x32xf32>
    %c0_16 = arith.constant 0 : index
    %c0_17 = arith.constant 0 : index
    %12 = vector.load %arg3[%c0_16, %c0_17] : memref<1x32xf32, #tpu.memory_space<vmem>>, vector<1x32xf32>
    %13 = vector.broadcast %12 : vector<1x32xf32> to vector<256x32xf32>
    %14 = arith.addf %11, %13 : vector<256x32xf32>
    %cst_18 = arith.constant 0.00999999977 : f32
    %15 = vector.broadcast %cst_18 : f32 to vector<256x32xf32>
    %16 = arith.mulf %15, %14 : vector<256x32xf32>
    %17 = arith.maximumf %14, %16 : vector<256x32xf32>
    %18 = vector.shape_cast %17 : vector<256x32xf32> to vector<16x16x32xf32>
    %c1_19 = arith.constant 1 : index
    %c8 = arith.constant 8 : index
    %c0_20 = arith.constant 0 : index
    %19 = vector.load %arg11[%c1_19, %c8, %c0_20] : memref<18x25x32xf32, #tpu.memory_space<vmem>>, vector<16x16x32xf32>
    tpu.vector_store %arg11[%c1_19, %c8, %c0_20], %18 {strides = array<i32>} : memref<18x25x32xf32, #tpu.memory_space<vmem>>, vector<16x16x32xf32>,
    %c0_21 = arith.constant 0 : index
    %c7_22 = arith.constant 7 : index
    %c0_23 = arith.constant 0 : index
    %20 = vector.load %arg11[%c0_21, %c7_22, %c0_23] : memref<18x25x32xf32, #tpu.memory_space<vmem>>, vector<16x16x32xf32>
    %c0_24 = arith.constant 0 : index
    %c0_25 = arith.constant 0 : index
    %c0_26 = arith.constant 0 : index
    %21 = vector.load %arg12[%c0_24, %c0_25, %c0_26] : memref<16x16x288xf32, #tpu.memory_space<vmem>>, vector<16x16x32xf32>
    tpu.vector_store %arg12[%c0_24, %c0_25, %c0_26], %20 {strides = array<i32>} : memref<16x16x288xf32, #tpu.memory_space<vmem>>, vector<16x16x32xf32>,
    %c0_27 = arith.constant 0 : index
    %c8_28 = arith.constant 8 : index
    %c0_29 = arith.constant 0 : index
    %22 = vector.load %arg11[%c0_27, %c8_28, %c0_29] : memref<18x25x32xf32, #tpu.memory_space<vmem>>, vector<16x16x32xf32>
    %c0_30 = arith.constant 0 : index
    %c0_31 = arith.constant 0 : index
    %c32 = arith.constant 32 : index
    %23 = vector.load %arg12[%c0_30, %c0_31, %c32] : memref<16x16x288xf32, #tpu.memory_space<vmem>>, vector<16x16x32xf32>
    tpu.vector_store %arg12[%c0_30, %c0_31, %c32], %22 {strides = array<i32>} : memref<16x16x288xf32, #tpu.memory_space<vmem>>, vector<16x16x32xf32>,
    %c0_32 = arith.constant 0 : index
    %c9 = arith.constant 9 : index
    %c0_33 = arith.constant 0 : index
    %24 = vector.load %arg11[%c0_32, %c9, %c0_33] : memref<18x25x32xf32, #tpu.memory_space<vmem>>, vector<16x16x32xf32>
    %c0_34 = arith.constant 0 : index
    %c0_35 = arith.constant 0 : index
    %c64 = arith.constant 64 : index
    %25 = vector.load %arg12[%c0_34, %c0_35, %c64] : memref<16x16x288xf32, #tpu.memory_space<vmem>>, vector<16x16x32xf32>
    tpu.vector_store %arg12[%c0_34, %c0_35, %c64], %24 {strides = array<i32>} : memref<16x16x288xf32, #tpu.memory_space<vmem>>, vector<16x16x32xf32>,
    %c1_36 = arith.constant 1 : index
    %c7_37 = arith.constant 7 : index
    %c0_38 = arith.constant 0 : index
    %26 = vector.load %arg11[%c1_36, %c7_37, %c0_38] : memref<18x25x32xf32, #tpu.memory_space<vmem>>, vector<16x16x32xf32>
    %c0_39 = arith.constant 0 : index
    %c0_40 = arith.constant 0 : index
    %c96 = arith.constant 96 : index
    %27 = vector.load %arg12[%c0_39, %c0_40, %c96] : memref<16x16x288xf32, #tpu.memory_space<vmem>>, vector<16x16x32xf32>
    tpu.vector_store %arg12[%c0_39, %c0_40, %c96], %26 {strides = array<i32>} : memref<16x16x288xf32, #tpu.memory_space<vmem>>, vector<16x16x32xf32>,
    %c1_41 = arith.constant 1 : index
    %c8_42 = arith.constant 8 : index
    %c0_43 = arith.constant 0 : index
    %28 = vector.load %arg11[%c1_41, %c8_42, %c0_43] : memref<18x25x32xf32, #tpu.memory_space<vmem>>, vector<16x16x32xf32>
    %c0_44 = arith.constant 0 : index
    %c0_45 = arith.constant 0 : index
    %c128 = arith.constant 128 : index
    %29 = vector.load %arg12[%c0_44, %c0_45, %c128] : memref<16x16x288xf32, #tpu.memory_space<vmem>>, vector<16x16x32xf32>
    tpu.vector_store %arg12[%c0_44, %c0_45, %c128], %28 {strides = array<i32>} : memref<16x16x288xf32, #tpu.memory_space<vmem>>, vector<16x16x32xf32>,
    %c1_46 = arith.constant 1 : index
    %c9_47 = arith.constant 9 : index
    %c0_48 = arith.constant 0 : index
    %30 = vector.load %arg11[%c1_46, %c9_47, %c0_48] : memref<18x25x32xf32, #tpu.memory_space<vmem>>, vector<16x16x32xf32>
    %c0_49 = arith.constant 0 : index
    %c0_50 = arith.constant 0 : index
    %c160 = arith.constant 160 : index
    %31 = vector.load %arg12[%c0_49, %c0_50, %c160] : memref<16x16x288xf32, #tpu.memory_space<vmem>>, vector<16x16x32xf32>
    tpu.vector_store %arg12[%c0_49, %c0_50, %c160], %30 {strides = array<i32>} : memref<16x16x288xf32, #tpu.memory_space<vmem>>, vector<16x16x32xf32>,
    %c2 = arith.constant 2 : index
    %c7_51 = arith.constant 7 : index
    %c0_52 = arith.constant 0 : index
    %32 = vector.load %arg11[%c2, %c7_51, %c0_52] : memref<18x25x32xf32, #tpu.memory_space<vmem>>, vector<16x16x32xf32>
    %c0_53 = arith.constant 0 : index
    %c0_54 = arith.constant 0 : index
    %c192 = arith.constant 192 : index
    %33 = vector.load %arg12[%c0_53, %c0_54, %c192] : memref<16x16x288xf32, #tpu.memory_space<vmem>>, vector<16x16x32xf32>
    tpu.vector_store %arg12[%c0_53, %c0_54, %c192], %32 {strides = array<i32>} : memref<16x16x288xf32, #tpu.memory_space<vmem>>, vector<16x16x32xf32>,
    %c2_55 = arith.constant 2 : index
    %c8_56 = arith.constant 8 : index
    %c0_57 = arith.constant 0 : index
    %34 = vector.load %arg11[%c2_55, %c8_56, %c0_57] : memref<18x25x32xf32, #tpu.memory_space<vmem>>, vector<16x16x32xf32>
    %c0_58 = arith.constant 0 : index
    %c0_59 = arith.constant 0 : index
    %c224 = arith.constant 224 : index
    %35 = vector.load %arg12[%c0_58, %c0_59, %c224] : memref<16x16x288xf32, #tpu.memory_space<vmem>>, vector<16x16x32xf32>
    tpu.vector_store %arg12[%c0_58, %c0_59, %c224], %34 {strides = array<i32>} : memref<16x16x288xf32, #tpu.memory_space<vmem>>, vector<16x16x32xf32>,
    %c2_60 = arith.constant 2 : index
    %c9_61 = arith.constant 9 : index
    %c0_62 = arith.constant 0 : index
    %36 = vector.load %arg11[%c2_60, %c9_61, %c0_62] : memref<18x25x32xf32, #tpu.memory_space<vmem>>, vector<16x16x32xf32>
    %c0_63 = arith.constant 0 : index
    %c0_64 = arith.constant 0 : index
    %c256 = arith.constant 256 : index
    %37 = vector.load %arg12[%c0_63, %c0_64, %c256] : memref<16x16x288xf32, #tpu.memory_space<vmem>>, vector<16x16x32xf32>
    tpu.vector_store %arg12[%c0_63, %c0_64, %c256], %36 {strides = array<i32>} : memref<16x16x288xf32, #tpu.memory_space<vmem>>, vector<16x16x32xf32>,
    %c0_65 = arith.constant 0 : index
    %c0_66 = arith.constant 0 : index
    %c0_67 = arith.constant 0 : index
    %38 = vector.load %arg12[%c0_65, %c0_66, %c0_67] : memref<16x16x288xf32, #tpu.memory_space<vmem>>, vector<16x16x288xf32>
    %39 = vector.shape_cast %38 : vector<16x16x288xf32> to vector<256x288xf32>
    %c0_68 = arith.constant 0 : index
    %c0_69 = arith.constant 0 : index
    %40 = vector.load %arg4[%c0_68, %c0_69] : memref<288x32xf32, #tpu.memory_space<vmem>>, vector<288x32xf32>
    %cst_70 = arith.constant dense<0.000000e+00> : vector<256x32xf32>
    %41 = tpu.matmul %39, %40, %cst_70 {dimension_numbers = #tpu.dot_dimension_numbers<[1], [0], [0], [1], [0, 0, 1, 1], [], []>} : vector<256x288xf32>, vector<288x32xf32>, vector<256x32xf32> -> vector<256x32xf32>
    %c0_71 = arith.constant 0 : index
    %c0_72 = arith.constant 0 : index
    %42 = vector.load %arg5[%c0_71, %c0_72] : memref<1x32xf32, #tpu.memory_space<vmem>>, vector<1x32xf32>
    %43 = vector.broadcast %42 : vector<1x32xf32> to vector<256x32xf32>
    %44 = arith.addf %41, %43 : vector<256x32xf32>
    %cst_73 = arith.constant 0.00999999977 : f32
    %45 = vector.broadcast %cst_73 : f32 to vector<256x32xf32>
    %46 = arith.mulf %45, %44 : vector<256x32xf32>
    %47 = arith.maximumf %44, %46 : vector<256x32xf32>
    %48 = vector.shape_cast %47 : vector<256x32xf32> to vector<16x16x32xf32>
    %c1_74 = arith.constant 1 : index
    %c8_75 = arith.constant 8 : index
    %c0_76 = arith.constant 0 : index
    %49 = vector.load %arg11[%c1_74, %c8_75, %c0_76] : memref<18x25x32xf32, #tpu.memory_space<vmem>>, vector<16x16x32xf32>
    tpu.vector_store %arg11[%c1_74, %c8_75, %c0_76], %48 {strides = array<i32>} : memref<18x25x32xf32, #tpu.memory_space<vmem>>, vector<16x16x32xf32>,
    %c0_77 = arith.constant 0 : index
    %c7_78 = arith.constant 7 : index
    %c0_79 = arith.constant 0 : index
    %50 = vector.load %arg11[%c0_77, %c7_78, %c0_79] : memref<18x25x32xf32, #tpu.memory_space<vmem>>, vector<16x16x32xf32>
    %c0_80 = arith.constant 0 : index
    %c0_81 = arith.constant 0 : index
    %c0_82 = arith.constant 0 : index
    %51 = vector.load %arg12[%c0_80, %c0_81, %c0_82] : memref<16x16x288xf32, #tpu.memory_space<vmem>>, vector<16x16x32xf32>
    tpu.vector_store %arg12[%c0_80, %c0_81, %c0_82], %50 {strides = array<i32>} : memref<16x16x288xf32, #tpu.memory_space<vmem>>, vector<16x16x32xf32>,
    %c0_83 = arith.constant 0 : index
    %c8_84 = arith.constant 8 : index
    %c0_85 = arith.constant 0 : index
    %52 = vector.load %arg11[%c0_83, %c8_84, %c0_85] : memref<18x25x32xf32, #tpu.memory_space<vmem>>, vector<16x16x32xf32>
    %c0_86 = arith.constant 0 : index
    %c0_87 = arith.constant 0 : index
    %c32_88 = arith.constant 32 : index
    %53 = vector.load %arg12[%c0_86, %c0_87, %c32_88] : memref<16x16x288xf32, #tpu.memory_space<vmem>>, vector<16x16x32xf32>
    tpu.vector_store %arg12[%c0_86, %c0_87, %c32_88], %52 {strides = array<i32>} : memref<16x16x288xf32, #tpu.memory_space<vmem>>, vector<16x16x32xf32>,
    %c0_89 = arith.constant 0 : index
    %c9_90 = arith.constant 9 : index
    %c0_91 = arith.constant 0 : index
    %54 = vector.load %arg11[%c0_89, %c9_90, %c0_91] : memref<18x25x32xf32, #tpu.memory_space<vmem>>, vector<16x16x32xf32>
    %c0_92 = arith.constant 0 : index
    %c0_93 = arith.constant 0 : index
    %c64_94 = arith.constant 64 : index
    %55 = vector.load %arg12[%c0_92, %c0_93, %c64_94] : memref<16x16x288xf32, #tpu.memory_space<vmem>>, vector<16x16x32xf32>
    tpu.vector_store %arg12[%c0_92, %c0_93, %c64_94], %54 {strides = array<i32>} : memref<16x16x288xf32, #tpu.memory_space<vmem>>, vector<16x16x32xf32>,
    %c1_95 = arith.constant 1 : index
    %c7_96 = arith.constant 7 : index
    %c0_97 = arith.constant 0 : index
    %56 = vector.load %arg11[%c1_95, %c7_96, %c0_97] : memref<18x25x32xf32, #tpu.memory_space<vmem>>, vector<16x16x32xf32>
    %c0_98 = arith.constant 0 : index
    %c0_99 = arith.constant 0 : index
    %c96_100 = arith.constant 96 : index
    %57 = vector.load %arg12[%c0_98, %c0_99, %c96_100] : memref<16x16x288xf32, #tpu.memory_space<vmem>>, vector<16x16x32xf32>
    tpu.vector_store %arg12[%c0_98, %c0_99, %c96_100], %56 {strides = array<i32>} : memref<16x16x288xf32, #tpu.memory_space<vmem>>, vector<16x16x32xf32>,
    %c1_101 = arith.constant 1 : index
    %c8_102 = arith.constant 8 : index
    %c0_103 = arith.constant 0 : index
    %58 = vector.load %arg11[%c1_101, %c8_102, %c0_103] : memref<18x25x32xf32, #tpu.memory_space<vmem>>, vector<16x16x32xf32>
    %c0_104 = arith.constant 0 : index
    %c0_105 = arith.constant 0 : index
    %c128_106 = arith.constant 128 : index
    %59 = vector.load %arg12[%c0_104, %c0_105, %c128_106] : memref<16x16x288xf32, #tpu.memory_space<vmem>>, vector<16x16x32xf32>
    tpu.vector_store %arg12[%c0_104, %c0_105, %c128_106], %58 {strides = array<i32>} : memref<16x16x288xf32, #tpu.memory_space<vmem>>, vector<16x16x32xf32>,
    %c1_107 = arith.constant 1 : index
    %c9_108 = arith.constant 9 : index
    %c0_109 = arith.constant 0 : index
    %60 = vector.load %arg11[%c1_107, %c9_108, %c0_109] : memref<18x25x32xf32, #tpu.memory_space<vmem>>, vector<16x16x32xf32>
    %c0_110 = arith.constant 0 : index
    %c0_111 = arith.constant 0 : index
    %c160_112 = arith.constant 160 : index
    %61 = vector.load %arg12[%c0_110, %c0_111, %c160_112] : memref<16x16x288xf32, #tpu.memory_space<vmem>>, vector<16x16x32xf32>
    tpu.vector_store %arg12[%c0_110, %c0_111, %c160_112], %60 {strides = array<i32>} : memref<16x16x288xf32, #tpu.memory_space<vmem>>, vector<16x16x32xf32>,
    %c2_113 = arith.constant 2 : index
    %c7_114 = arith.constant 7 : index
    %c0_115 = arith.constant 0 : index
    %62 = vector.load %arg11[%c2_113, %c7_114, %c0_115] : memref<18x25x32xf32, #tpu.memory_space<vmem>>, vector<16x16x32xf32>
    %c0_116 = arith.constant 0 : index
    %c0_117 = arith.constant 0 : index
    %c192_118 = arith.constant 192 : index
    %63 = vector.load %arg12[%c0_116, %c0_117, %c192_118] : memref<16x16x288xf32, #tpu.memory_space<vmem>>, vector<16x16x32xf32>
    tpu.vector_store %arg12[%c0_116, %c0_117, %c192_118], %62 {strides = array<i32>} : memref<16x16x288xf32, #tpu.memory_space<vmem>>, vector<16x16x32xf32>,
    %c2_119 = arith.constant 2 : index
    %c8_120 = arith.constant 8 : index
    %c0_121 = arith.constant 0 : index
    %64 = vector.load %arg11[%c2_119, %c8_120, %c0_121] : memref<18x25x32xf32, #tpu.memory_space<vmem>>, vector<16x16x32xf32>
    %c0_122 = arith.constant 0 : index
    %c0_123 = arith.constant 0 : index
    %c224_124 = arith.constant 224 : index
    %65 = vector.load %arg12[%c0_122, %c0_123, %c224_124] : memref<16x16x288xf32, #tpu.memory_space<vmem>>, vector<16x16x32xf32>
    tpu.vector_store %arg12[%c0_122, %c0_123, %c224_124], %64 {strides = array<i32>} : memref<16x16x288xf32, #tpu.memory_space<vmem>>, vector<16x16x32xf32>,
    %c2_125 = arith.constant 2 : index
    %c9_126 = arith.constant 9 : index
    %c0_127 = arith.constant 0 : index
    %66 = vector.load %arg11[%c2_125, %c9_126, %c0_127] : memref<18x25x32xf32, #tpu.memory_space<vmem>>, vector<16x16x32xf32>
    %c0_128 = arith.constant 0 : index
    %c0_129 = arith.constant 0 : index
    %c256_130 = arith.constant 256 : index
    %67 = vector.load %arg12[%c0_128, %c0_129, %c256_130] : memref<16x16x288xf32, #tpu.memory_space<vmem>>, vector<16x16x32xf32>
    tpu.vector_store %arg12[%c0_128, %c0_129, %c256_130], %66 {strides = array<i32>} : memref<16x16x288xf32, #tpu.memory_space<vmem>>, vector<16x16x32xf32>,
    %c0_131 = arith.constant 0 : index
    %c0_132 = arith.constant 0 : index
    %c0_133 = arith.constant 0 : index
    %68 = vector.load %arg12[%c0_131, %c0_132, %c0_133] : memref<16x16x288xf32, #tpu.memory_space<vmem>>, vector<16x16x288xf32>
    %69 = vector.shape_cast %68 : vector<16x16x288xf32> to vector<256x288xf32>
    %c0_134 = arith.constant 0 : index
    %c0_135 = arith.constant 0 : index
    %70 = vector.load %arg6[%c0_134, %c0_135] : memref<288x8xf32, #tpu.memory_space<vmem>>, vector<288x8xf32>
    %cst_136 = arith.constant dense<0.000000e+00> : vector<256x8xf32>
    %71 = tpu.matmul %69, %70, %cst_136 {dimension_numbers = #tpu.dot_dimension_numbers<[1], [0], [0], [1], [0, 0, 1, 1], [], []>} : vector<256x288xf32>, vector<288x8xf32>, vector<256x8xf32> -> vector<256x8xf32>
    %c0_137 = arith.constant 0 : index
    %c0_138 = arith.constant 0 : index
    %72 = vector.load %arg7[%c0_137, %c0_138] : memref<1x8xf32, #tpu.memory_space<vmem>>, vector<1x8xf32>
    %73 = vector.broadcast %72 : vector<1x8xf32> to vector<256x8xf32>
    %74 = arith.addf %71, %73 : vector<256x8xf32>
    %c0_139 = arith.constant 0 : index
    %c0_140 = arith.constant 0 : index
    %75 = vector.load %arg8[%c0_139, %c0_140] : memref<1x8xf32, #tpu.memory_space<vmem>>, vector<1x8xf32>
    %76 = vector.broadcast %75 : vector<1x8xf32> to vector<256x8xf32>
    %77 = arith.mulf %74, %76 : vector<256x8xf32>
    %78 = tpu.transpose %77, [1, 0] : vector<256x8xf32> -> vector<8x256xf32>
    %79 = vector.extract_strided_slice %78 {offsets = [0, 0], sizes = [4, 256], strides = [1, 1]} : vector<8x256xf32> to vector<4x256xf32>
    %c0_141 = arith.constant 0 : index
    %c0_142 = arith.constant 0 : index
    %c0_143 = arith.constant 0 : index
    %80 = vector.load %arg9[%c0_141, %c0_142, %c0_143] : memref<1x4x256xf32, #tpu.memory_space<vmem>>, vector<1x4x256xf32>
    %81 = vector.shape_cast %80 : vector<1x4x256xf32> to vector<4x256xf32>
    %82 = vector.shape_cast %79 : vector<4x256xf32> to vector<1x4x256xf32>
    tpu.vector_store %arg9[%c0_141, %c0_142, %c0_143], %82 {strides = array<i32>} : memref<1x4x256xf32, #tpu.memory_space<vmem>>, vector<1x4x256xf32>,
    %83 = vector.extract_strided_slice %78 {offsets = [4, 0], sizes = [4, 256], strides = [1, 1]} : vector<8x256xf32> to vector<4x256xf32>
    %84 = arith.negf %83 : vector<4x256xf32>
    %85 = math.exp %84 : vector<4x256xf32>
    %cst_144 = arith.constant 1.000000e+00 : f32
    %86 = vector.broadcast %cst_144 : f32 to vector<4x256xf32>
    %87 = arith.addf %86, %85 : vector<4x256xf32>
    %88 = arith.divf %86, %87 : vector<4x256xf32>
    %cst_145 = arith.constant 5.000000e-01 : f32
    %89 = vector.broadcast %cst_145 : f32 to vector<4x256xf32>
    %90 = arith.addf %88, %89 : vector<4x256xf32>
    %c0_146 = arith.constant 0 : index
    %c0_147 = arith.constant 0 : index
    %c0_148 = arith.constant 0 : index
    %91 = vector.load %arg10[%c0_146, %c0_147, %c0_148] : memref<1x4x256xf32, #tpu.memory_space<vmem>>, vector<1x4x256xf32>
    %92 = vector.shape_cast %91 : vector<1x4x256xf32> to vector<4x256xf32>
    %93 = vector.shape_cast %90 : vector<4x256xf32> to vector<1x4x256xf32>
    tpu.vector_store %arg10[%c0_146, %c0_147, %c0_148], %93 {strides = array<i32>} : memref<1x4x256xf32, #tpu.memory_space<vmem>>, vector<1x4x256xf32>,
    return
  }
  func.func @transform_0(%arg0: i32) -> (i32, i32, i32) {
    %c0_i32 = arith.constant 0 : i32
    %c0_i32_0 = arith.constant 0 : i32
    %c0_i32_1 = arith.constant 0 : i32
    return %arg0, %c0_i32, %c0_i32_0 : i32, i32, i32
  }
  func.func @transform_1(%arg0: i32) -> (i32, i32) {
    %c0_i32 = arith.constant 0 : i32
    %c0_i32_0 = arith.constant 0 : i32
    %c0_i32_1 = arith.constant 0 : i32
    return %c0_i32, %c0_i32_0 : i32, i32
  }
  func.func @transform_2(%arg0: i32) -> (i32, i32) {
    %c0_i32 = arith.constant 0 : i32
    %c0_i32_0 = arith.constant 0 : i32
    %c0_i32_1 = arith.constant 0 : i32
    return %c0_i32, %c0_i32_0 : i32, i32
  }
  func.func @transform_3(%arg0: i32) -> (i32, i32) {
    %c0_i32 = arith.constant 0 : i32
    %c0_i32_0 = arith.constant 0 : i32
    %c0_i32_1 = arith.constant 0 : i32
    return %c0_i32, %c0_i32_0 : i32, i32
  }
  func.func @transform_4(%arg0: i32) -> (i32, i32) {
    %c0_i32 = arith.constant 0 : i32
    %c0_i32_0 = arith.constant 0 : i32
    %c0_i32_1 = arith.constant 0 : i32
    return %c0_i32, %c0_i32_0 : i32, i32
  }
  func.func @transform_5(%arg0: i32) -> (i32, i32) {
    %c0_i32 = arith.constant 0 : i32
    %c0_i32_0 = arith.constant 0 : i32
    %c0_i32_1 = arith.constant 0 : i32
    return %c0_i32, %c0_i32_0 : i32, i32
  }
  func.func @transform_6(%arg0: i32) -> (i32, i32) {
    %c0_i32 = arith.constant 0 : i32
    %c0_i32_0 = arith.constant 0 : i32
    %c0_i32_1 = arith.constant 0 : i32
    return %c0_i32, %c0_i32_0 : i32, i32
  }
  func.func @transform_7(%arg0: i32) -> (i32, i32) {
    %c0_i32 = arith.constant 0 : i32
    %c0_i32_0 = arith.constant 0 : i32
    %c0_i32_1 = arith.constant 0 : i32
    return %c0_i32, %c0_i32_0 : i32, i32
  }
  func.func @transform_8(%arg0: i32) -> (i32, i32, i32) {
    %c0_i32 = arith.constant 0 : i32
    %c0_i32_0 = arith.constant 0 : i32
    %c0_i32_1 = arith.constant 0 : i32
    return %arg0, %c0_i32, %c0_i32_0 : i32, i32, i32
  }
  func.func @transform_9(%arg0: i32) -> (i32, i32, i32) {
    %c0_i32 = arith.constant 0 : i32
    %c0_i32_0 = arith.constant 0 : i32
    %c0_i32_1 = arith.constant 0 : i32
    return %arg0, %c0_i32, %c0_i32_0 : i32, i32, i32
  }
}

</mosaic_0001>

<bundles_post_ra>
// kernel: tpu_custom_call.1
= control target key start
LH: loop header
LB: loop body
LE: loop exit
PB: predicated region body
PF: predicated region fallthrough
CT: control target
= control target key end

     0   :  { %15 = vsyncpa [#allocation5], 0  ;;  %s8646_s0 = inlined_call_operand.vmem [shape: f32[2,256,36], index: 0, kind: input, shape index: {}]   ;;  %s8647_s1 = inlined_call_operand.vmem [shape: f32[36,32], index: 1, kind: input, shape index: {}]   ;;  %s8648_s2 = inlined_call_operand.vmem [shape: f32[1,32], index: 2, kind: input, shape index: {}]   ;;  %s8649_s3 = inlined_call_operand.vmem [shape: f32[288,32], index: 3, kind: input, shape index: {}]   ;;  %s8650_s4 = inlined_call_operand.vmem [shape: f32[1,32], index: 4, kind: input, shape index: {}]   ;;  %s8651_s5 = inlined_call_operand.vmem [shape: f32[288,8], index: 5, kind: input, shape index: {}]   ;;  %s8652_s6 = inlined_call_operand.vmem [shape: f32[1,8], index: 6, kind: input, shape index: {}]   ;;  %s8653_s7 = inlined_call_operand.vmem [shape: f32[1,8], index: 7, kind: input, shape index: {}]   ;;  %s8654_s8 = inlined_call_operand.hbm [shape: f32[2,4,256], index: 8, kind: output, shape index: {0}]   ;;  %s8655_s9 = inlined_call_operand.hbm [shape: f32[2,4,256], index: 9, kind: output, shape index: {1}]  }
   0x1   :  { %17 = vsyncpa [#allocation5 + $0x1], 0 }
   0x2   :  { %18 = vsyncpa [#allocation7], 0 }
   0x3   :  { %20 = vsyncpa [#allocation7 + $0x1], 0  ;;  %s5994_s30 = smov 0   ;;  %s5996_s10 = smov 0  }
   0x4   :  { %s5998_s11 = smov 0   ;;  %s6000_s12 = smov 0  }
   0x5 LB: > { %s6015_s13 = sadd.s32 4294967295, %s5935_s12   ;;  %s5261_s14 = sadd.s32 4294967294, %s5935_s12   ;;  %s5935_s12 = sphi %s6000_s12, %s8665_s12   ;;  %s5931_s11 = sphi %s5998_s11, %s8664_s11   ;;  %s5927_s10 = sphi %s5996_s10, %s8663_s10   ;;  %s5923_s30 = sphi %s5994_s30, %s8662_s30  }
   0x6   : > { %s6019_s15 = sadd.s32 1, %s5935_s12   ;;  %s206_s16 = sadd.s32 1, %s5931_s11 }
   0x7   : > { %s203_s17 = ssub.s32 %s5935_s12, %s6019_s15  ;;  %p216_p0 = scmp.ne.s32.totalorder %s5931_s11, %s5927_s10 }
   0x8   : > { %p204_p1 = scmp.eq.s32.totalorder %s203_s17, 0  ;;  %p217_p2 = scmp.eq.s32.totalorder %s6015_s13, 1 }
   0x9   : > { %p222_p3 = scmp.ne.s32.totalorder %s5927_s10, %s5923_s30  ;;  %p223_p4 = scmp.eq.s32.totalorder %s5261_s14, 1 }
   0xa   : > { %s6030_s18 = scalar_select %p204_p1, %s5931_s11, %s206_s16  }
   0xb   : > { %p6032_p5 = por %p217_p2, %p216_p0  ;;  %p6036_p6 = por %p223_p4, %p222_p3 }
   0xc   : > { %p5264_p7 = scmp.ge.s32.totalorder %s5935_s12, 1  ;;  %p296_p8 = scmp.lt.s32.totalorder %s5935_s12, 3 }
   0xe   : > { %p297_p9 = pnand %p5264_p7, %p296_p8 }
   0xf   : > { %v417_v0 = vld [vmem:[%s8647_s1] sm:$0xff] (!%p297_p9)  ;;  %v418_v1 = vld [vmem:[%s8647_s1 + $0x8] sm:$0xff] (!%p297_p9)  ;;  %v419_v2 = vld [vmem:[%s8647_s1 + $0x10] sm:$0xff] (!%p297_p9)  ;;  %p337_p10 = scmp.lt.s32.totalorder (!%p297_p9), %s6015_s13, 1  ;;  %vm429_vm0 = vcmask (!%p297_p9), 293888   ;;  %vm526_vm1 = vcmask (!%p297_p9), 1043456  }
  0x10   : > { %300 = sbr.rel (%p297_p9) target bundleno = 1500 (0x5dc), region = 52  ;;  %v5662_v3 = vpack.c.bf16 (!%p297_p9), %v418_v1, %v417_v0  ;;  %v420_v4 = vld [vmem:[%s8647_s1 + $0x18] sm:$0xff] (!%p297_p9)  ;;  %v421_v6 = vld [vmem:[%s8647_s1 + $0x20] sm:$0xf] (!%p297_p9)  ;;  %vm342_vm2 = vcmask (!%p297_p9), 261120   ;;  %v5937_v27 = vmov (!%p297_p9), 0.0  }
  0x11   : > { %v5666_v5 = vpack.c.bf16 (!%p297_p9), %v420_v4, %v419_v2  ;;  %343 = vst.msk [vmem:[#allocation2 + $0x7] sm:$0xff] (!%p297_p9), %vm342_vm2, %v5937_v27  ;;  %344 = vst.msk [vmem:[#allocation2 + $0xf] sm:$0xff] (!%p297_p9), %vm342_vm2, %v5937_v27  ;;  %vm345_vm3 = vcmask (!%p297_p9), 254976   ;;  %s5938_s24 = smov (!%p297_p9), 32   ;;  %vm352_vm4 = vcmask (!%p297_p9), 253952   ;;  %s5939_s25 = smov (!%p297_p9), 64  }
  0x12   : > { %5663 = vmatprep.subr.bf16.mxu0 (!%p297_p9), %v5662_v3  ;;  %348 = vst.msk [vmem:[#allocation2 + $0x227] sm:$0xff] (!%p297_p9), %vm342_vm2, %v5937_v27  ;;  %349 = vst.msk [vmem:[#allocation2 + $0x22f] sm:$0xff] (!%p297_p9), %vm342_vm2, %v5937_v27  ;;  %v2327_v41 = vld [vmem:[%s8649_s3 + $0x100] sm:$0xff] (!%p297_p9)  ;;  %v2328_v42 = vld [vmem:[%s8649_s3 + $0x108] sm:$0xff] (!%p297_p9)  ;;  %v5940_v50 = vmov (!%p297_p9), 0.0|0.0   ;;  %vm1075_vm5 = vcmask (!%p297_p9), 523520  }
  0x13   : > { %5665 = vmatpush3.bf16.msra.mxu0 (!%p297_p9), %v5662_v3  ;;  %346 = vst.msk [vmem:[#allocation2 + $0x17] sm:$0x3] (!%p297_p9), %vm345_vm3, %v5937_v27  ;;  %350 = vst.msk [vmem:[#allocation2 + $0x237] sm:$0x3] (!%p297_p9), %vm345_vm3, %v5937_v27  ;;  %v5718_v44 = vpack.c.bf16 (!%p297_p9), %v2328_v42, %v2327_v41  ;;  %v2329_v46 = vld [vmem:[%s8649_s3 + $0x110] sm:$0xff] (!%p297_p9)  ;;  %v2330_v47 = vld [vmem:[%s8649_s3 + $0x118] sm:$0xff] (!%p297_p9)  ;;  %5670 = vmatprep.subr.bf16.mxu1 (!%p297_p9), %v5940_v50 }
  0x14   : > { %5667 = vmatprep.subr.bf16.mxu0 (!%p297_p9), %v5666_v5  ;;  %369 = vst.msk [vmem:[#allocation2 + $0x38] sm:$0x1] (!%p297_p9), %vm352_vm4, %v5937_v27  ;;  %353 = vst.msk [vmem:[#allocation2 + $0x27] sm:$0x1] (!%p297_p9), %vm352_vm4, %v5937_v27  ;;  %v5722_v49 = vpack.c.bf16 (!%p297_p9), %v2330_v47, %v2329_v46  ;;  %v2295_v51 = vld [vmem:[%s8649_s3] sm:$0xff] (!%p297_p9)  ;;  %v2296_v52 = vld [vmem:[%s8649_s3 + $0x8] sm:$0xff] (!%p297_p9) }
  0x15   : > { %354 = vst.msk [vmem:[#allocation2 + $0x47] sm:$0x1] (!%p297_p9), %vm352_vm4, %v5937_v27  ;;  %355 = vst.msk [vmem:[#allocation2 + $0x67] sm:$0x1] (!%p297_p9), %vm352_vm4, %v5937_v27  ;;  %v5671_v53 = vpack.c.bf16 (!%p297_p9), %v2296_v52, %v2295_v51  ;;  %v2297_v54 = vld [vmem:[%s8649_s3 + $0x10] sm:$0xff] (!%p297_p9)  ;;  %v2298_v55 = vld [vmem:[%s8649_s3 + $0x18] sm:$0xff] (!%p297_p9) }
  0x16   : > { %356 = vst.msk [vmem:[#allocation2 + $0x87] sm:$0x1] (!%p297_p9), %vm352_vm4, %v5937_v27  ;;  %357 = vst.msk [vmem:[#allocation2 + $0xa7] sm:$0x1] (!%p297_p9), %vm352_vm4, %v5937_v27  ;;  %v5674_v56 = vpack.c.bf16 (!%p297_p9), %v2298_v55, %v2297_v54  ;;  %v2299_v59 = vld [vmem:[%s8649_s3 + $0x20] sm:$0xff] (!%p297_p9)  ;;  %v2300_v60 = vld [vmem:[%s8649_s3 + $0x28] sm:$0xff] (!%p297_p9) }
  0x17   : > { %s338_s29 = scalar_select %p337_p10, %s6015_s13, 1  ;;  %5669 = vmatpush3.bf16.msra.mxu0 %v5666_v5  ;;  %358 = vst.msk [vmem:[#allocation2 + $0xc7] sm:$0x1] %vm352_vm4, %v5937_v27  ;;  %359 = vst.msk [vmem:[#allocation2 + $0xe7] sm:$0x1] %vm352_vm4, %v5937_v27  ;;  %5672 = vmatpush1.bf16.msra.mxu1 %v5671_v53  ;;  %v5677_v61 = vpack.c.bf16 %v2300_v60, %v2299_v59  ;;  %v2301_v0 = vld [vmem:[%s8649_s3 + $0x30] sm:$0xff] }
  0x18   : > { %5500 = vmatprep.subr.msk.mxu0 %vm526_vm1, %v421_v6  ;;  %v915_v28 = vld [vmem:[#allocation2 + $0x8] sm:$0xff]  ;;  %360 = vst.msk [vmem:[#allocation2 + $0x107] sm:$0x1] %vm352_vm4, %v5937_v27  ;;  %361 = vst.msk [vmem:[#allocation2 + $0x127] sm:$0x1] %vm352_vm4, %v5937_v27  ;;  %5673 = vmatprep.subr.bf16.mxu1 %v5940_v50  ;;  %v2302_v1 = vld [vmem:[%s8649_s3 + $0x38] sm:$0xff] }
  0x19   : > { %s5380_s14 = sshll.u32 %s338_s29, 8  ;;  %979 = vrot.lane.b32.xlu0 %v915_v28, %s5938_s24  ;;  %362 = vst.msk [vmem:[#allocation2 + $0x147] sm:$0x1] %vm352_vm4, %v5937_v27  ;;  %363 = vst.msk [vmem:[#allocation2 + $0x167] sm:$0x1] %vm352_vm4, %v5937_v27  ;;  %v1108_v31 = vld [vmem:[#allocation2 + $0x9] sm:$0xff]  ;;  %v5680_v2 = vpack.c.bf16 %v2302_v1, %v2301_v0 }
  0x1a   : > { %s6059_s21 = scalar_lea.vmem %s8646_s0, %s5380_s14  ;;  %v916_v29 = vld [vmem:[#allocation2 + $0x10] sm:$0xff]  ;;  %364 = vst.msk [vmem:[#allocation2 + $0x187] sm:$0x1] %vm352_vm4, %v5937_v27  ;;  %365 = vst.msk [vmem:[#allocation2 + $0x1a7] sm:$0x1] %vm352_vm4, %v5937_v27  ;;  %v851_v57 = vld [vmem:[#allocation2 + $0x7] sm:$0xff] }
  0x1b   : > { %v385_v7 = vld [vmem:[%s6059_s21] sm:$0xff]  ;;  %v386_v8 = vld [vmem:[%s6059_s21 + $0x8] sm:$0xff]  ;;  %v387_v9 = vld [vmem:[%s6059_s21 + $0x10] sm:$0xff]  ;;  %5501 = vmatpush3.msk.msra.mxu0 %vm526_vm1, %v421_v6  ;;  %366 = vst.msk [vmem:[#allocation2 + $0x1c7] sm:$0x1] %vm352_vm4, %v5937_v27  ;;  %5675 = vmatpush1.bf16.msra.mxu1 %v5674_v56  ;;  %vm1268_vm6 = vcmask 785920  }
  0x1c   : > { %5502 = vmatprep.mubr.msk.f32.mxu0 %vm429_vm0, %v385_v7  ;;  %v388_v10 = vld [vmem:[%s6059_s21 + $0x18] sm:$0xff]  ;;  %v389_v11 = vld [vmem:[%s6059_s21 + $0x20] sm:$0xff]  ;;  %v390_v12 = vld [vmem:[%s6059_s21 + $0x28] sm:$0xff]  ;;  %367 = vst.msk [vmem:[#allocation2 + $0x1e7] sm:$0x1] %vm352_vm4, %v5937_v27  ;;  %5719 = vmatprep.subr.bf16.mxu0 %v5718_v44  ;;  %s5941_s23 = smov 96  }
  0x1d   : > { %5503 = vmatmul.mubr.msk.f32.vlgmr.msra.gmra.mrb[0].mxu0 %vm429_vm0, %v386_v8  ;;  %v391_v13 = vld [vmem:[%s6059_s21 + $0x30] sm:$0xff]  ;;  %v392_v14 = vld [vmem:[%s6059_s21 + $0x38] sm:$0xff]  ;;  %v393_v15 = vld [vmem:[%s6059_s21 + $0x40] sm:$0xff]  ;;  %368 = vst.msk [vmem:[#allocation2 + $0x207] sm:$0x1] %vm352_vm4, %v5937_v27  ;;  %981 = vrot.lane.b32.xlu0 %v916_v29, %s5938_s24  ;;  %vm1461_vm7 = vcmask 1048320  }
  0x1e   : > { %5505 = vmatprep.mubr.msk.f32.mxu0 %vm429_vm0, %v387_v9  ;;  %v394_v16 = vld [vmem:[%s6059_s21 + $0x48] sm:$0xff]  ;;  %v395_v17 = vld [vmem:[%s6059_s21 + $0x50] sm:$0xff]  ;;  %v396_v18 = vld [vmem:[%s6059_s21 + $0x58] sm:$0xff]  ;;  %370 = vst.msk [vmem:[#allocation2 + $0x58] sm:$0x1] %vm352_vm4, %v5937_v27  ;;  %5721 = vmatpush3.bf16.msra.mxu0 %v5718_v44  ;;  %s8657_s22 = sshll.u32 %s6015_s13, 7 }
  0x1f   : > { %v397_v19 = vld [vmem:[%s6059_s21 + $0x60] sm:$0xff]  ;;  %v398_v20 = vld [vmem:[%s6059_s21 + $0x68] sm:$0xff]  ;;  %v399_v21 = vld [vmem:[%s6059_s21 + $0x70] sm:$0xff]  ;;  %371 = vst.msk [vmem:[#allocation2 + $0x78] sm:$0x1] %vm352_vm4, %v5937_v27  ;;  %5723 = vmatprep.subr.bf16.mxu0 %v5722_v49  ;;  %5676 = vmatprep.subr.bf16.mxu1 %v5940_v50  ;;  %s8570_s29 = scalar_lea.hbm %s8654_s8, %s8657_s22 }
  0x20   : > { %v400_v22 = vld [vmem:[%s6059_s21 + $0x78] sm:$0xff]  ;;  %v401_v23 = vld [vmem:[%s6059_s21 + $0x80] sm:$0xff]  ;;  %v402_v24 = vld [vmem:[%s6059_s21 + $0x88] sm:$0xff]  ;;  %372 = vst.msk [vmem:[#allocation2 + $0x98] sm:$0x1] %vm352_vm4, %v5937_v27  ;;  %5678 = vmatpush1.bf16.msra.mxu1 %v5677_v61 }
  0x21   : > { %5506 = vmatmul.mubr.msk.f32.gmra.mrb[2].mxu0 %vm429_vm0, %v388_v10  ;;  %v403_v25 = vld [vmem:[%s6059_s21 + $0x90] sm:$0xff]  ;;  %v404_v26 = vld [vmem:[%s6059_s21 + $0x98] sm:$0xff]  ;;  %373 = vst.msk [vmem:[#allocation2 + $0xb8] sm:$0x1] %vm352_vm4, %v5937_v27  ;;  %374 = vst.msk [vmem:[#allocation2 + $0xd8] sm:$0x1] %vm352_vm4, %v5937_v27  ;;  %1172 = vrot.lane.b32.xlu0 %v1108_v31, %s5939_s25 }
  0x22   : > { %5508 = vmatprep.mubr.msk.f32.mxu0 %vm429_vm0, %v389_v11  ;;  %375 = vst.msk [vmem:[#allocation2 + $0xf8] sm:$0x1] %vm352_vm4, %v5937_v27  ;;  %376 = vst.msk [vmem:[#allocation2 + $0x118] sm:$0x1] %vm352_vm4, %v5937_v27  ;;  %v1109_v30 = vld [vmem:[#allocation2 + $0x11] sm:$0xff]  ;;  %v405_v32 = vld [vmem:[%s6059_s21 + $0xa0] sm:$0xff]  ;;  %5725 = vmatpush3.bf16.msra.mxu0 %v5722_v49 }
  0x23   : > { %377 = vst.msk [vmem:[#allocation2 + $0x138] sm:$0x1] %vm352_vm4, %v5937_v27  ;;  %378 = vst.msk [vmem:[#allocation2 + $0x158] sm:$0x1] %vm352_vm4, %v5937_v27  ;;  %1174 = vrot.lane.b32.xlu1 %v1109_v30, %s5939_s25  ;;  %v406_v33 = vld [vmem:[%s6059_s21 + $0xa8] sm:$0xff]  ;;  %v407_v34 = vld [vmem:[%s6059_s21 + $0xb0] sm:$0xff]  ;;  %5726 = vmatprep.subr.bf16.mxu0 %v5940_v50 }
  0x24   : > { %379 = vst.msk [vmem:[#allocation2 + $0x178] sm:$0x1] %vm352_vm4, %v5937_v27  ;;  %380 = vst.msk [vmem:[#allocation2 + $0x198] sm:$0x1] %vm352_vm4, %v5937_v27  ;;  %v408_v35 = vld [vmem:[%s6059_s21 + $0xb8] sm:$0xff]  ;;  %v409_v36 = vld [vmem:[%s6059_s21 + $0xc0] sm:$0xff]  ;;  %5679 = vmatprep.subr.bf16.mxu1 %v5940_v50 }
  0x25   : > { %5509 = vmatmul.mubr.msk.f32.gmra.mrb[4].mxu0 %vm429_vm0, %v390_v12  ;;  %381 = vst.msk [vmem:[#allocation2 + $0x1b8] sm:$0x1] %vm352_vm4, %v5937_v27  ;;  %382 = vst.msk [vmem:[#allocation2 + $0x1d8] sm:$0x1] %vm352_vm4, %v5937_v27  ;;  %v410_v37 = vld [vmem:[%s6059_s21 + $0xc8] sm:$0xff]  ;;  %v411_v38 = vld [vmem:[%s6059_s21 + $0xd0] sm:$0xff]  ;;  %5681 = vmatpush1.bf16.msra.mxu1 %v5680_v2 }
  0x26   : > { %5511 = vmatprep.mubr.msk.f32.mxu0 %vm429_vm0, %v391_v13  ;;  %383 = vst.msk [vmem:[#allocation2 + $0x1f8] sm:$0x1] %vm352_vm4, %v5937_v27  ;;  %384 = vst.msk [vmem:[#allocation2 + $0x218] sm:$0x1] %vm352_vm4, %v5937_v27  ;;  %v412_v39 = vld [vmem:[%s6059_s21 + $0xd8] sm:$0xff]  ;;  %v413_v40 = vld [vmem:[%s6059_s21 + $0xe0] sm:$0xff]  ;;  %5682 = vmatprep.subr.bf16.mxu1 %v5940_v50 }
  0x27   : > { %v414_v43 = vld [vmem:[%s6059_s21 + $0xe8] sm:$0xff]  ;;  %v415_v45 = vld [vmem:[%s6059_s21 + $0xf0] sm:$0xff]  ;;  %v416_v48 = vld [vmem:[%s6059_s21 + $0xf8] sm:$0xff]  ;;  %883 = vst.msk [vmem:[#allocation3] sm:$0xff] %vm342_vm2, %v851_v57 }
  0x28   : > { %v852_v62 = vld [vmem:[#allocation2 + $0xf] sm:$0xff]  ;;  %v6217_v4 = vld [vmem:[%s8648_s2] ss:$0 sm:$0xff] }
  0x29   : > { %5512 = vmatmul.mubr.msk.f32.gmra.mrb[6].mxu0 %vm429_vm0, %v392_v14  ;;  %884 = vst.msk [vmem:[#allocation3 + $0x18] sm:$0xff] %vm342_vm2, %v852_v62  ;;  %v2303_v6 = vld [vmem:[%s8649_s3 + $0x40] sm:$0xff]  ;;  %v2304_v7 = vld [vmem:[%s8649_s3 + $0x48] sm:$0xff]  ;;  %v2305_v13 = vld [vmem:[%s8649_s3 + $0x50] sm:$0xff] }
  0x2a   : > { %5514 = vmatprep.mubr.msk.f32.mxu0 %vm429_vm0, %v393_v15  ;;  %v5683_v8 = vpack.c.bf16 %v2304_v7, %v2303_v6  ;;  %v2306_v14 = vld [vmem:[%s8649_s3 + $0x58] sm:$0xff]  ;;  %v2311_v47 = vld [vmem:[%s8649_s3 + $0x80] sm:$0xff]  ;;  %v2312_v56 = vld [vmem:[%s8649_s3 + $0x88] sm:$0xff] }
  0x2b   : > { %v5695_v61 = vpack.c.bf16 %v2312_v56, %v2311_v47  ;;  %v2313_v2 = vld [vmem:[%s8649_s3 + $0x90] sm:$0xff] }
  0x2c   : > { %5684 = vmatpush1.bf16.msra.mxu1 %v5683_v8 }
  0x2d   : > { %5515 = vmatmul.mubr.msk.f32.gmra.mrb[8].mxu0 %vm429_vm0, %v394_v16  ;;  %5685 = vmatprep.subr.bf16.mxu1 %v5940_v50  ;;  %v5686_v16 = vpack.c.bf16 %v2306_v14, %v2305_v13 }
  0x2e   : > { %5517 = vmatprep.mubr.msk.f32.mxu0 %vm429_vm0, %v395_v17 }
  0x30   : > { %5687 = vmatpush1.bf16.msra.mxu1 %v5686_v16 }
  0x31   : > { %5518 = vmatmul.mubr.msk.f32.gmra.mrb[10].mxu0 %vm429_vm0, %v396_v18  ;;  %5688 = vmatprep.subr.bf16.mxu1 %v5940_v50 }
  0x32   : > { %5520 = vmatprep.mubr.msk.f32.mxu0 %vm429_vm0, %v397_v19 }
  0x35   : > { %5521 = vmatmul.mubr.msk.f32.gmra.mrb[12].mxu0 %vm429_vm0, %v398_v20 }
  0x36   : > { %5523 = vmatprep.mubr.msk.f32.mxu0 %vm429_vm0, %v399_v21 }
  0x39   : > { %5524 = vmatmul.mubr.msk.f32.gmra.mrb[14].mxu0 %vm429_vm0, %v400_v22 }
  0x3a   : > { %5526 = vmatprep.mubr.msk.f32.mxu0 %vm429_vm0, %v401_v23 }
  0x3d   : > { %5527 = vmatmul.mubr.msk.f32.gmra.mrb[16].mxu0 %vm429_vm0, %v402_v24  ;;  %v2307_v24 = vld [vmem:[%s8649_s3 + $0x60] sm:$0xff] }
  0x3e   : > { %5529 = vmatprep.mubr.msk.f32.mxu0 %vm429_vm0, %v403_v25  ;;  %v2308_v25 = vld [vmem:[%s8649_s3 + $0x68] sm:$0xff] }
  0x3f   : > { %v5689_v27 = vpack.c.bf16 %v2308_v25, %v2307_v24 }
  0x41   : > { %5530 = vmatmul.mubr.msk.f32.gmra.mrb[18].mxu0 %vm429_vm0, %v404_v26  ;;  %5690 = vmatpush1.bf16.msra.mxu1 %v5689_v27 }
  0x42   : > { %5532 = vmatprep.mubr.msk.f32.mxu0 %vm429_vm0, %v405_v32  ;;  %5691 = vmatprep.subr.bf16.mxu1 %v5940_v50 }
  0x45   : > { %5533 = vmatmul.mubr.msk.f32.gmra.mrb[20].mxu0 %vm429_vm0, %v406_v33 }
  0x46   : > { %5535 = vmatprep.mubr.msk.f32.mxu0 %vm429_vm0, %v407_v34 }
  0x49   : > { %5536 = vmatmul.mubr.msk.f32.gmra.mrb[22].mxu0 %vm429_vm0, %v408_v35  ;;  %v2309_v35 = vld [vmem:[%s8649_s3 + $0x70] sm:$0xff] }
  0x4a   : > { %5538 = vmatprep.mubr.msk.f32.mxu0 %vm429_vm0, %v409_v36  ;;  %v2310_v36 = vld [vmem:[%s8649_s3 + $0x78] sm:$0xff] }
  0x4d   : > { %5539 = vmatmul.mubr.msk.f32.gmra.mrb[24].mxu0 %vm429_vm0, %v410_v37 }
  0x4e   : > { %5541 = vmatprep.mubr.msk.f32.mxu0 %vm429_vm0, %v411_v38  ;;  %v5692_v38 = vpack.c.bf16 %v2310_v36, %v2309_v35 }
  0x50   : > { %5693 = vmatpush1.bf16.msra.mxu1 %v5692_v38 }
  0x51   : > { %5542 = vmatmul.mubr.msk.f32.gmra.mrb[26].mxu0 %vm429_vm0, %v412_v39  ;;  %5694 = vmatprep.subr.bf16.mxu1 %v5940_v50 }
  0x52   : > { %5544 = vmatprep.mubr.msk.f32.mxu0 %vm429_vm0, %v413_v40 }
  0x54   : > { %5696 = vmatpush1.bf16.msra.mxu1 %v5695_v61 }
  0x55   : > { %5545 = vmatmul.mubr.msk.f32.gmra.mrb[28].mxu0 %vm429_vm0, %v414_v43  ;;  %5697 = vmatprep.subr.bf16.mxu1 %v5940_v50 }
  0x56   : > { %5547 = vmatprep.mubr.msk.f32.mxu0 %vm429_vm0, %v415_v45 }
  0x59   : > { %5548 = vmatmul.mubr.msk.f32.gmra.mrb[30].mxu0 %vm429_vm0, %v416_v48 }
  0x8b   : > { %v980_v58 = vpop.permute.xlu0 %979 }
  0x8c   : > { %1076 = vst.msk [vmem:[#allocation3] sm:$0xff] %vm1075_vm5, %v980_v58 }
  0x8f   : > { %v982_v63 = vpop.permute.xlu0 %981 }
  0x90   : > { %1077 = vst.msk [vmem:[#allocation3 + $0x18] sm:$0xff] %vm1075_vm5, %v982_v63 }
  0x93   : > { %v1173_v5 = vpop.permute.xlu0 %1172 }
  0x94   : > { %1269 = vst.msk [vmem:[#allocation3] sm:$0xff] %vm1268_vm6, %v1173_v5 }
  0x95   : > { %v1175_v3 = vpop.permute.xlu1 %1174 }
  0x96   : > { %1270 = vst.msk [vmem:[#allocation3 + $0x18] sm:$0xff] %vm1268_vm6, %v1175_v3 }
  0xf0   : > { %v5504_v9 = vpop.f32.mrb[0].mxu0 }
  0xf1   : > { %v602_v10 = vadd.f32 %v5504_v9, %v6217_v4  ;;  %v596_v11 = vpop.f32.mrb[1].mxu0 }
  0xf2   : > { %v597_v12 = vadd.f32 %v6217_v4, %v596_v11  ;;  %v2314_v11 = vld [vmem:[%s8649_s3 + $0x98] sm:$0xff] }
  0xf3   : > { %v756_v15 = vmul.f32 0.01, %v602_v10 }
  0xf4   : > { %v755_v17 = vmul.f32 0.01, %v597_v12  ;;  %v5507_v18 = vpop.f32.mrb[2].mxu0 }
  0xf5   : > { %v788_v19 = vmax.f32 %v602_v10, %v756_v15  ;;  %v612_v20 = vadd.f32 %v5507_v18, %v6217_v4  ;;  %v606_v21 = vpop.f32.mrb[3].mxu0  ;;  %v5698_v15 = vpack.c.bf16 %v2314_v11, %v2313_v2  ;;  %v2319_v2 = vld [vmem:[%s8649_s3 + $0xc0] sm:$0xff] }
  0xf6   : > { %v787_v22 = vmax.f32 %v597_v12, %v755_v17  ;;  %v607_v23 = vadd.f32 %v6217_v4, %v606_v21 }
  0xf7   : > { %820 = vst.msk [vmem:[#allocation2 + $0x30] sm:$0xff] %vm342_vm2, %v788_v19  ;;  %v758_v26 = vmul.f32 0.01, %v612_v20  ;;  %5699 = vmatpush1.bf16.msra.mxu1 %v5698_v15 }
  0xf8   : > { %819 = vst.msk [vmem:[#allocation2 + $0x28] sm:$0xff] %vm342_vm2, %v787_v22  ;;  %v757_v28 = vmul.f32 0.01, %v607_v23  ;;  %v5510_v29 = vpop.f32.mrb[4].mxu0  ;;  %5700 = vmatprep.subr.bf16.mxu1 %v5940_v50 }
  0xf9   : > { %v790_v30 = vmax.f32 %v612_v20, %v758_v26  ;;  %v622_v31 = vadd.f32 %v5510_v29, %v6217_v4  ;;  %v616_v32 = vpop.f32.mrb[5].mxu0  ;;  %v2315_v20 = vld [vmem:[%s8649_s3 + $0xa0] sm:$0xff] }
  0xfa   : > { %v789_v33 = vmax.f32 %v607_v23, %v757_v28  ;;  %v617_v34 = vadd.f32 %v6217_v4, %v616_v32  ;;  %v2316_v28 = vld [vmem:[%s8649_s3 + $0xa8] sm:$0xff] }
  0xfb   : > { %822 = vst.msk [vmem:[#allocation2 + $0x50] sm:$0xff] %vm342_vm2, %v790_v30  ;;  %v760_v37 = vmul.f32 0.01, %v622_v31  ;;  %v5701_v32 = vpack.c.bf16 %v2316_v28, %v2315_v20  ;;  %v2321_v20 = vld [vmem:[%s8649_s3 + $0xd0] sm:$0xff] }
  0xfc   : > { %821 = vst.msk [vmem:[#allocation2 + $0x48] sm:$0xff] %vm342_vm2, %v789_v33  ;;  %v759_v39 = vmul.f32 0.01, %v617_v34  ;;  %v5513_v40 = vpop.f32.mrb[6].mxu0 }
  0xfd   : > { %v792_v41 = vmax.f32 %v622_v31, %v760_v37  ;;  %v632_v42 = vadd.f32 %v5513_v40, %v6217_v4  ;;  %v626_v43 = vpop.f32.mrb[7].mxu0  ;;  %5702 = vmatpush1.bf16.msra.mxu1 %v5701_v32 }
  0xfe   : > { %v918_v44 = vld [vmem:[#allocation2 + $0x30] sm:$0xff]  ;;  %v791_v45 = vmax.f32 %v617_v34, %v759_v39  ;;  %v627_v46 = vadd.f32 %v6217_v4, %v626_v43  ;;  %5703 = vmatprep.subr.bf16.mxu1 %v5940_v50 }
  0xff   : > { %985 = vrot.lane.b32.xlu1 %v918_v44, %s5938_s24  ;;  %v6265_v48 = vld [vmem:[#allocation2 + $0x29] sm:$0xff]  ;;  %824 = vst.msk [vmem:[#allocation2 + $0x70] sm:$0xff] %vm342_vm2, %v792_v41  ;;  %v762_v52 = vmul.f32 0.01, %v632_v42  ;;  %1527 = vst.msk [vmem:[#allocation3 + $0x20] sm:$0xff] %vm342_vm2, %v918_v44  ;;  %v1559_v57 = vld [vmem:[#allocation2 + $0x31] sm:$0xff] }
 0x100   : > { %v1301_v49 = vld [vmem:[#allocation2 + $0x27] sm:$0xff]  ;;  %1622 = vrot.lane.b32.xlu0 %v6265_v48, %s5938_s24  ;;  %v6273_v53 = vld [vmem:[#allocation2 + $0x2f] sm:$0xff]  ;;  %823 = vst.msk [vmem:[#allocation2 + $0x68] sm:$0xff] %vm342_vm2, %v791_v45  ;;  %v761_v54 = vmul.f32 0.01, %v627_v46  ;;  %v5516_v55 = vpop.f32.mrb[8].mxu0 }
 0x101   : > { %v6267_v51 = vld [vmem:[#allocation2 + $0x28] sm:$0xff]  ;;  %885 = vst.msk [vmem:[#allocation3 + $0x30] sm:$0xff] %vm342_vm2, %v1301_v49  ;;  %v794_v58 = vmax.f32 %v632_v42, %v762_v52  ;;  %v642_v59 = vadd.f32 %v5516_v55, %v6217_v4  ;;  %v636_v60 = vpop.f32.mrb[9].mxu0  ;;  %886 = vst.msk [vmem:[#allocation3 + $0x48] sm:$0xff] %vm342_vm2, %v6273_v53  ;;  %v2317_v45 = vld [vmem:[%s8649_s3 + $0xb0] sm:$0xff] }
 0x102   : > { %1526 = vst.msk [vmem:[#allocation3 + $0x8] sm:$0xff] %vm342_vm2, %v6267_v51  ;;  %v6285_v62 = vld [vmem:[#allocation2 + $0x50] sm:$0xff]  ;;  %v793_v0 = vmax.f32 %v627_v46, %v761_v54  ;;  %v637_v1 = vadd.f32 %v6217_v4, %v636_v60 }
 0x103   : > { %v6287_v63 = vld [vmem:[#allocation2 + $0x51] sm:$0xff]  ;;  %v6293_v3 = vld [vmem:[#allocation2 + $0x49] sm:$0xff]  ;;  %1624 = vrot.lane.b32.xlu1 %v1559_v57, %s5938_s24  ;;  %826 = vst.msk [vmem:[#allocation2 + $0x90] sm:$0xff] %vm342_vm2, %v794_v58  ;;  %v764_v7 = vmul.f32 0.01, %v642_v59  ;;  %1529 = vst.msk [vmem:[#allocation3 + $0x50] sm:$0xff] %vm342_vm2, %v6285_v62 }
 0x104   : > { %v6296_v5 = vld [vmem:[#allocation2 + $0x48] sm:$0xff]  ;;  %2168 = vst.msk [vmem:[#allocation3 + $0x28] sm:$0xff] %vm342_vm2, %v6287_v63  ;;  %2167 = vst.msk [vmem:[#allocation3 + $0x10] sm:$0xff] %vm342_vm2, %v6293_v3  ;;  %1365 = vrot.lane.b32.xlu0 %v1301_v49, %s5941_s23  ;;  %v763_v9 = vmul.f32 0.01, %v637_v1  ;;  %v5519_v10 = vpop.f32.mrb[10].mxu0 }
 0x105   : > { %v6298_v6 = vld [vmem:[#allocation2 + $0x4f] sm:$0xff]  ;;  %v6308_v8 = vld [vmem:[#allocation2 + $0x47] sm:$0xff]  ;;  %825 = vst.msk [vmem:[#allocation2 + $0x88] sm:$0xff] %vm342_vm2, %v793_v0  ;;  %1528 = vst.msk [vmem:[#allocation3 + $0x38] sm:$0xff] %vm342_vm2, %v6296_v5  ;;  %v796_v12 = vmax.f32 %v642_v59, %v764_v7  ;;  %v652_v13 = vadd.f32 %v5519_v10, %v6217_v4  ;;  %v646_v14 = vpop.f32.mrb[11].mxu0 }
 0x106   : > { %888 = vst.msk [vmem:[#allocation3 + $0x78] sm:$0xff] %vm342_vm2, %v6298_v6  ;;  %887 = vst.msk [vmem:[#allocation3 + $0x60] sm:$0xff] %vm342_vm2, %v6308_v8  ;;  %v6322_v16 = vld [vmem:[#allocation2 + $0x70] sm:$0xff]  ;;  %v795_v18 = vmax.f32 %v637_v1, %v763_v9  ;;  %v647_v19 = vadd.f32 %v6217_v4, %v646_v14  ;;  %v2320_v9 = vld [vmem:[%s8649_s3 + $0xc8] sm:$0xff] }
 0x107   : > { %v6324_v17 = vld [vmem:[#allocation2 + $0x71] sm:$0xff]  ;;  %1178 = vrot.lane.b32.xlu1 %v1559_v57, %s5939_s25  ;;  %v6331_v21 = vld [vmem:[#allocation2 + $0x69] sm:$0xff]  ;;  %828 = vst.msk [vmem:[#allocation2 + $0xb0] sm:$0xff] %vm342_vm2, %v796_v12  ;;  %v766_v24 = vmul.f32 0.01, %v652_v13  ;;  %1531 = vst.msk [vmem:[#allocation3 + $0x80] sm:$0xff] %vm342_vm2, %v6322_v16 }
 0x108   : > { %v6333_v22 = vld [vmem:[#allocation2 + $0x68] sm:$0xff]  ;;  %2170 = vst.msk [vmem:[#allocation3 + $0x58] sm:$0xff] %vm342_vm2, %v6324_v17  ;;  %1176 = vrot.lane.b32.xlu0 %v6265_v48, %s5939_s25  ;;  %2169 = vst.msk [vmem:[#allocation3 + $0x40] sm:$0xff] %vm342_vm2, %v6331_v21  ;;  %v765_v26 = vmul.f32 0.01, %v647_v19  ;;  %v5522_v27 = vpop.f32.mrb[12].mxu0 }
 0x109   : > { %v6335_v23 = vld [vmem:[#allocation2 + $0x6f] sm:$0xff]  ;;  %v6346_v25 = vld [vmem:[#allocation2 + $0x67] sm:$0xff]  ;;  %827 = vst.msk [vmem:[#allocation2 + $0xa8] sm:$0xff] %vm342_vm2, %v795_v18  ;;  %1530 = vst.msk [vmem:[#allocation3 + $0x68] sm:$0xff] %vm342_vm2, %v6333_v22  ;;  %v798_v29 = vmax.f32 %v652_v13, %v766_v24  ;;  %v662_v30 = vadd.f32 %v5522_v27, %v6217_v4  ;;  %v656_v31 = vpop.f32.mrb[13].mxu0  ;;  %v5707_v13 = vpack.c.bf16 %v2320_v9, %v2319_v2 }
 0x10a   : > { %890 = vst.msk [vmem:[#allocation3 + $0xa8] sm:$0xff] %vm342_vm2, %v6335_v23  ;;  %889 = vst.msk [vmem:[#allocation3 + $0x90] sm:$0xff] %vm342_vm2, %v6346_v25  ;;  %v6360_v34 = vld [vmem:[#allocation2 + $0x90] sm:$0xff]  ;;  %v797_v36 = vmax.f32 %v647_v19, %v765_v26  ;;  %v657_v37 = vadd.f32 %v6217_v4, %v656_v31  ;;  %v2318_v48 = vld [vmem:[%s8649_s3 + $0xb8] sm:$0xff] }
 0x10b   : > { %v2204_v33 = vld [vmem:[#allocation3 + $0x28] sm:$0xff]  ;;  %v6362_v35 = vld [vmem:[#allocation2 + $0x91] sm:$0xff]  ;;  %983 = vrot.lane.b32.xlu1 %v6267_v51, %s5938_s24  ;;  %830 = vst.msk [vmem:[#allocation2 + $0xd0] sm:$0xff] %vm342_vm2, %v798_v29  ;;  %v768_v41 = vmul.f32 0.01, %v662_v30  ;;  %1533 = vst.msk [vmem:[#allocation3 + $0xb0] sm:$0xff] %vm342_vm2, %v6360_v34  ;;  %v5704_v56 = vpack.c.bf16 %v2318_v48, %v2317_v45 }
 0x10c   : > { %v2201_v38 = vld [vmem:[#allocation3 + $0x10] sm:$0xff]  ;;  %v6369_v40 = vld [vmem:[#allocation2 + $0x88] sm:$0xff]  ;;  %2172 = vst.msk [vmem:[#allocation3 + $0x88] sm:$0xff] %vm342_vm2, %v6362_v35  ;;  %2009 = vrot.lane.b32.xlu0 %v6285_v62, %s5941_s23  ;;  %829 = vst.msk [vmem:[#allocation2 + $0xc8] sm:$0xff] %vm342_vm2, %v797_v36  ;;  %v767_v44 = vmul.f32 0.01, %v657_v37 }
 0x10d   : > { %v6367_v39 = vld [vmem:[#allocation2 + $0x89] sm:$0xff]  ;;  %5558 = vmatprep.mubr.msk.f32.mxu0 %vm342_vm2, %v2201_v38  ;;  %v5525_v46 = vpop.f32.mrb[14].mxu0  ;;  %1532 = vst.msk [vmem:[#allocation3 + $0x98] sm:$0xff] %vm342_vm2, %v6369_v40  ;;  %v800_v47 = vmax.f32 %v662_v30, %v768_v41  ;;  %5705 = vmatpush1.bf16.msra.mxu1 %v5704_v56  ;;  %v2322_v24 = vld [vmem:[%s8649_s3 + $0xd8] sm:$0xff]  ;;  %v2323_v41 = vld [vmem:[%s8649_s3 + $0xe0] sm:$0xff] }
 0x10e   : > { %2171 = vst.msk [vmem:[#allocation3 + $0x70] sm:$0xff] %vm342_vm2, %v6367_v39  ;;  %v6381_v42 = vld [vmem:[#allocation2 + $0x8f] sm:$0xff]  ;;  %v6383_v43 = vld [vmem:[#allocation2 + $0x87] sm:$0xff]  ;;  %5559 = vmatmul.mubr.msk.f32.vlgmr.msra.gmra.mrb[32].mxu0 %vm342_vm2, %v2204_v33  ;;  %v672_v49 = vadd.f32 %v5525_v46, %v6217_v4  ;;  %v799_v55 = vmax.f32 %v657_v37, %v767_v44  ;;  %v666_v61 = vpop.f32.mrb[15].mxu0  ;;  %5706 = vmatprep.subr.bf16.mxu1 %v5940_v50  ;;  %v2326_v48 = vld [vmem:[%s8649_s3 + $0xf8] sm:$0xff] }
 0x10f   : > { %891 = vst.msk [vmem:[#allocation3 + $0xc0] sm:$0xff] %vm342_vm2, %v6383_v43  ;;  %892 = vst.msk [vmem:[#allocation3 + $0xd8] sm:$0xff] %vm342_vm2, %v6381_v42  ;;  %v2210_v51 = vld [vmem:[#allocation3 + $0x58] sm:$0xff]  ;;  %v6401_v52 = vld [vmem:[#allocation2 + $0xb0] sm:$0xff]  ;;  %1367 = vrot.lane.b32.xlu1 %v6273_v53, %s5941_s23  ;;  %v667_v1 = vadd.f32 %v6217_v4, %v666_v61  ;;  %v5710_v31 = vpack.c.bf16 %v2322_v24, %v2321_v20 }
 0x110   : > { %v6403_v54 = vld [vmem:[#allocation2 + $0xb1] sm:$0xff]  ;;  %v2207_v57 = vld [vmem:[#allocation3 + $0x40] sm:$0xff]  ;;  %v6407_v58 = vld [vmem:[#allocation2 + $0xa9] sm:$0xff]  ;;  %832 = vst.msk [vmem:[#allocation2 + $0xf0] sm:$0xff] %vm342_vm2, %v800_v47  ;;  %v770_v60 = vmul.f32 0.01, %v672_v49  ;;  %987 = vrot.lane.b32.xlu0 %v6296_v5, %s5938_s24 }
 0x111   : > { %v6409_v59 = vld [vmem:[#allocation2 + $0xa8] sm:$0xff]  ;;  %2174 = vst.msk [vmem:[#allocation3 + $0xb8] sm:$0xff] %vm342_vm2, %v6403_v54  ;;  %1535 = vst.msk [vmem:[#allocation3 + $0xe0] sm:$0xff] %vm342_vm2, %v6401_v52  ;;  %5561 = vmatprep.mubr.msk.f32.mxu0 %vm342_vm2, %v2207_v57  ;;  %v769_v12 = vmul.f32 0.01, %v667_v1  ;;  %5708 = vmatpush1.bf16.msra.mxu1 %v5707_v13  ;;  %v2325_v47 = vld [vmem:[%s8649_s3 + $0xf0] sm:$0xff] }
 0x112   : > { %2173 = vst.msk [vmem:[#allocation3 + $0xa0] sm:$0xff] %vm342_vm2, %v6407_v58  ;;  %v6421_v53 = vld [vmem:[#allocation2 + $0xaf] sm:$0xff]  ;;  %v6423_v0 = vld [vmem:[#allocation2 + $0xa7] sm:$0xff]  ;;  %831 = vst.msk [vmem:[#allocation2 + $0xe8] sm:$0xff] %vm342_vm2, %v799_v55  ;;  %5562 = vmatmul.mubr.msk.f32.gmra.mrb[34].mxu0 %vm342_vm2, %v2210_v51  ;;  %v802_v7 = vmax.f32 %v672_v49, %v770_v60  ;;  %5709 = vmatprep.subr.bf16.mxu1 %v5940_v50  ;;  %v5716_v56 = vpack.c.bf16 %v2326_v48, %v2325_v47 }
 0x113   : > { %1534 = vst.msk [vmem:[#allocation3 + $0xc8] sm:$0xff] %vm342_vm2, %v6409_v59  ;;  %893 = vst.msk [vmem:[#allocation3 + $0xf0] sm:$0xff] %vm342_vm2, %v6423_v0  ;;  %v2216_v10 = vld [vmem:[#allocation3 + $0x88] sm:$0xff]  ;;  %v6440_v11 = vld [vmem:[#allocation2 + $0xd1] sm:$0xff]  ;;  %989 = vrot.lane.b32.xlu1 %v6285_v62, %s5938_s24  ;;  %v801_v62 = vmax.f32 %v667_v1, %v769_v12 }
 0x114   : > { %894 = vst.msk [vmem:[#allocation3 + $0x108] sm:$0xff] %vm342_vm2, %v6421_v53  ;;  %v6445_v15 = vld [vmem:[#allocation2 + $0xc9] sm:$0xff]  ;;  %2176 = vst.msk [vmem:[#allocation3 + $0xe8] sm:$0xff] %vm342_vm2, %v6440_v11  ;;  %1817 = vrot.lane.b32.xlu0 %v6298_v6, %s5939_s25 }
 0x115   : > { %v2213_v14 = vld [vmem:[#allocation3 + $0x70] sm:$0xff]  ;;  %834 = vst.msk [vmem:[#allocation2 + $0x110] sm:$0xff] %vm342_vm2, %v802_v7  ;;  %2175 = vst.msk [vmem:[#allocation3 + $0xd0] sm:$0xff] %vm342_vm2, %v6445_v15  ;;  %v6457_v19 = vld [vmem:[#allocation2 + $0xc7] sm:$0xff]  ;;  %5711 = vmatpush1.bf16.msra.mxu1 %v5710_v31 }
 0x116   : > { %5564 = vmatprep.mubr.msk.f32.mxu0 %vm342_vm2, %v2213_v14  ;;  %v6455_v18 = vld [vmem:[#allocation2 + $0xcf] sm:$0xff]  ;;  %895 = vst.msk [vmem:[#allocation3 + $0x120] sm:$0xff] %vm342_vm2, %v6457_v19  ;;  %833 = vst.msk [vmem:[#allocation2 + $0x108] sm:$0xff] %vm342_vm2, %v801_v62  ;;  %5712 = vmatprep.subr.bf16.mxu1 %v5940_v50 }
 0x117   : > { %5565 = vmatmul.mubr.msk.f32.gmra.mrb[36].mxu0 %vm342_vm2, %v2216_v10  ;;  %896 = vst.msk [vmem:[#allocation3 + $0x138] sm:$0xff] %vm342_vm2, %v6455_v18  ;;  %v1505_v26 = vld [vmem:[#allocation2 + $0xd0] sm:$0xff]  ;;  %v1504_v27 = vld [vmem:[#allocation2 + $0xc8] sm:$0xff]  ;;  %1628 = vrot.lane.b32.xlu1 %v6287_v63, %s5938_s24 }
 0x118   : > { %v2222_v28 = vld [vmem:[#allocation3 + $0xb8] sm:$0xff]  ;;  %v6470_v29 = vld [vmem:[#allocation2 + $0xf0] sm:$0xff]  ;;  %1537 = vst.msk [vmem:[#allocation3 + $0x110] sm:$0xff] %vm342_vm2, %v1505_v26  ;;  %1536 = vst.msk [vmem:[#allocation3 + $0xf8] sm:$0xff] %vm342_vm2, %v1504_v27  ;;  %1626 = vrot.lane.b32.xlu0 %v6293_v3, %s5938_s24 }
 0x119   : > { %v6472_v30 = vld [vmem:[#allocation2 + $0xf1] sm:$0xff]  ;;  %v2219_v32 = vld [vmem:[#allocation3 + $0xa0] sm:$0xff]  ;;  %v6480_v33 = vld [vmem:[#allocation2 + $0xe9] sm:$0xff]  ;;  %1539 = vst.msk [vmem:[#allocation3 + $0x140] sm:$0xff] %vm342_vm2, %v6470_v29 }
 0x11a   : > { %v6482_v36 = vld [vmem:[#allocation2 + $0xe8] sm:$0xff]  ;;  %2178 = vst.msk [vmem:[#allocation3 + $0x118] sm:$0xff] %vm342_vm2, %v6472_v30  ;;  %5567 = vmatprep.mubr.msk.f32.mxu0 %vm342_vm2, %v2219_v32  ;;  %2177 = vst.msk [vmem:[#allocation3 + $0x100] sm:$0xff] %vm342_vm2, %v6480_v33 }
 0x11b   : > { %v6493_v37 = vld [vmem:[#allocation2 + $0xef] sm:$0xff]  ;;  %v6495_v38 = vld [vmem:[#allocation2 + $0xe7] sm:$0xff]  ;;  %1538 = vst.msk [vmem:[#allocation3 + $0x128] sm:$0xff] %vm342_vm2, %v6482_v36  ;;  %5568 = vmatmul.mubr.msk.f32.gmra.mrb[38].mxu0 %vm342_vm2, %v2222_v28  ;;  %1182 = vrot.lane.b32.xlu1 %v6287_v63, %s5939_s25 }
 0x11c   : > { %v2324_v44 = vld [vmem:[%s8649_s3 + $0xe8] sm:$0xff]  ;;  %897 = vst.msk [vmem:[#allocation3 + $0x150] sm:$0xff] %vm342_vm2, %v6495_v38  ;;  %898 = vst.msk [vmem:[#allocation3 + $0x168] sm:$0xff] %vm342_vm2, %v6493_v37  ;;  %v2225_v49 = vld [vmem:[#allocation3 + $0xd0] sm:$0xff]  ;;  %1369 = vrot.lane.b32.xlu0 %v6308_v8, %s5941_s23 }
 0x11d   : > { %v2228_v45 = vld [vmem:[#allocation3 + $0xe8] sm:$0xff]  ;;  %v5713_v46 = vpack.c.bf16 %v2324_v44, %v2323_v41  ;;  %v6519_v51 = vld [vmem:[#allocation2 + $0x110] sm:$0xff]  ;;  %5570 = vmatprep.mubr.msk.f32.mxu0 %vm342_vm2, %v2225_v49 }
 0x11e   : > { %1541 = vst.msk [vmem:[#allocation3 + $0x170] sm:$0xff] %vm342_vm2, %v6519_v51  ;;  %v6527_v55 = vld [vmem:[#allocation2 + $0x109] sm:$0xff]  ;;  %v6539_v61 = vld [vmem:[#allocation2 + $0x111] sm:$0xff] }
 0x11f   : > { %5571 = vmatmul.mubr.msk.f32.gmra.mrb[40].mxu0 %vm342_vm2, %v2228_v45  ;;  %5714 = vmatpush1.bf16.msra.mxu1 %v5713_v46  ;;  %2179 = vst.msk [vmem:[#allocation3 + $0x130] sm:$0xff] %vm342_vm2, %v6527_v55  ;;  %v6537_v60 = vld [vmem:[#allocation2 + $0x108] sm:$0xff]  ;;  %2180 = vst.msk [vmem:[#allocation3 + $0x148] sm:$0xff] %vm342_vm2, %v6539_v61 }
 0x120   : > { %5715 = vmatprep.subr.bf16.mxu1 %v5940_v50  ;;  %1815 = vrot.lane.b32.xlu1 %v6308_v8, %s5939_s25  ;;  %v6542_v1 = vld [vmem:[#allocation2 + $0x10f] sm:$0xff]  ;;  %v6546_v2 = vld [vmem:[#allocation2 + $0x107] sm:$0xff]  ;;  %1540 = vst.msk [vmem:[#allocation3 + $0x158] sm:$0xff] %vm342_vm2, %v6537_v60 }
 0x121   : > { %v2234_v63 = vld [vmem:[#allocation3 + $0x118] sm:$0xff]  ;;  %v2231_v57 = vld [vmem:[#allocation3 + $0x100] sm:$0xff]  ;;  %1180 = vrot.lane.b32.xlu0 %v6293_v3, %s5939_s25  ;;  %899 = vst.msk [vmem:[#allocation3 + $0x180] sm:$0xff] %vm342_vm2, %v6546_v2  ;;  %900 = vst.msk [vmem:[#allocation3 + $0x198] sm:$0xff] %vm342_vm2, %v6542_v1  ;;  %v5528_v3 = vpop.f32.mrb[16].mxu0 }
 0x122   : > { %5573 = vmatprep.mubr.msk.f32.mxu0 %vm342_vm2, %v2231_v57  ;;  %v682_v8 = vadd.f32 %v5528_v3, %v6217_v4  ;;  %v676_v10 = vpop.f32.mrb[17].mxu0 }
 0x123   : > { %5574 = vmatmul.mubr.msk.f32.gmra.mrb[42].mxu0 %vm342_vm2, %v2234_v63  ;;  %5717 = vmatpush1.bf16.msra.mxu1 %v5716_v56  ;;  %v677_v12 = vadd.f32 %v6217_v4, %v676_v10 }
 0x124   : > { %2007 = vrot.lane.b32.xlu1 %v6296_v5, %s5941_s23  ;;  %v772_v7 = vmul.f32 0.01, %v682_v8 }
 0x125   : > { %2013 = vrot.lane.b32.xlu0 %v6322_v16, %s5941_s23  ;;  %v771_v14 = vmul.f32 0.01, %v677_v12 }
 0x126   : > { %v2237_v9 = vld [vmem:[#allocation3 + $0x130] sm:$0xff]  ;;  %v2240_v5 = vld [vmem:[#allocation3 + $0x148] sm:$0xff]  ;;  %v804_v13 = vmax.f32 %v682_v8, %v772_v7 }
 0x127   : > { %5576 = vmatprep.mubr.msk.f32.mxu0 %vm342_vm2, %v2237_v9 }
 0x128   : > { %1371 = vrot.lane.b32.xlu1 %v6298_v6, %s5941_s23  ;;  %5577 = vmatmul.mubr.msk.f32.gmra.mrb[44].mxu0 %vm342_vm2, %v2240_v5  ;;  %836 = vst.msk [vmem:[#allocation2 + $0x130] sm:$0xff] %vm342_vm2, %v804_v13  ;;  %v803_v6 = vmax.f32 %v677_v12, %v771_v14 }
 0x129   : > { %991 = vrot.lane.b32.xlu0 %v6333_v22, %s5938_s24 }
 0x12a   : > { %835 = vst.msk [vmem:[#allocation2 + $0x128] sm:$0xff] %vm342_vm2, %v803_v6 }
 0x12c   : > { %993 = vrot.lane.b32.xlu1 %v6322_v16, %s5938_s24 }
 0x12d   : > { %1821 = vrot.lane.b32.xlu0 %v6335_v23, %s5939_s25 }
 0x12f   : > { %v6578_v62 = vld [vmem:[#allocation2 + $0x130] sm:$0xff] }
 0x130   : > { %1632 = vrot.lane.b32.xlu1 %v6324_v17, %s5938_s24  ;;  %1543 = vst.msk [vmem:[#allocation3 + $0x1a0] sm:$0xff] %vm342_vm2, %v6578_v62  ;;  %v6594_v20 = vld [vmem:[#allocation2 + $0x131] sm:$0xff] }
 0x131   : > { %1630 = vrot.lane.b32.xlu0 %v6331_v21, %s5938_s24  ;;  %v6584_v16 = vld [vmem:[#allocation2 + $0x129] sm:$0xff]  ;;  %2182 = vst.msk [vmem:[#allocation3 + $0x178] sm:$0xff] %vm342_vm2, %v6594_v20 }
 0x132   : > { %2181 = vst.msk [vmem:[#allocation3 + $0x160] sm:$0xff] %vm342_vm2, %v6584_v16  ;;  %v6596_v24 = vld [vmem:[#allocation2 + $0x12f] sm:$0xff]  ;;  %v6600_v26 = vld [vmem:[#allocation2 + $0x127] sm:$0xff] }
 0x133   : > { %901 = vst.msk [vmem:[#allocation3 + $0x1b0] sm:$0xff] %vm342_vm2, %v6600_v26  ;;  %902 = vst.msk [vmem:[#allocation3 + $0x1c8] sm:$0xff] %vm342_vm2, %v6596_v24 }
 0x134   : > { %1186 = vrot.lane.b32.xlu1 %v6324_v17, %s5939_s25  ;;  %v6592_v17 = vld [vmem:[#allocation2 + $0x128] sm:$0xff] }
 0x135   : > { %1373 = vrot.lane.b32.xlu0 %v6346_v25, %s5941_s23  ;;  %1542 = vst.msk [vmem:[#allocation3 + $0x188] sm:$0xff] %vm342_vm2, %v6592_v17 }
 0x138   : > { %1819 = vrot.lane.b32.xlu1 %v6346_v25, %s5939_s25 }
 0x139   : > { %1184 = vrot.lane.b32.xlu0 %v6331_v21, %s5939_s25  ;;  %v5531_v21 = vpop.f32.mrb[18].mxu0  ;;  %v2243_v28 = vld [vmem:[#allocation3 + $0x160] sm:$0xff] }
 0x13a   : > { %v692_v25 = vadd.f32 %v5531_v21, %v6217_v4  ;;  %v686_v31 = vpop.f32.mrb[19].mxu0  ;;  %5579 = vmatprep.mubr.msk.f32.mxu0 %vm342_vm2, %v2243_v28 }
 0x13b   : > { %v687_v32 = vadd.f32 %v6217_v4, %v686_v31 }
 0x13c   : > { %2011 = vrot.lane.b32.xlu1 %v6333_v22, %s5941_s23  ;;  %v774_v27 = vmul.f32 0.01, %v692_v25  ;;  %v2246_v22 = vld [vmem:[#allocation3 + $0x178] sm:$0xff] }
 0x13d   : > { %2017 = vrot.lane.b32.xlu0 %v6360_v34, %s5941_s23  ;;  %5580 = vmatmul.mubr.msk.f32.gmra.mrb[46].mxu0 %vm342_vm2, %v2246_v22  ;;  %v773_v44 = vmul.f32 0.01, %v687_v32 }
 0x13e   : > { %v806_v41 = vmax.f32 %v692_v25, %v774_v27 }
 0x140   : > { %1375 = vrot.lane.b32.xlu1 %v6335_v23, %s5941_s23  ;;  %838 = vst.msk [vmem:[#allocation2 + $0x150] sm:$0xff] %vm342_vm2, %v806_v41  ;;  %v805_v23 = vmax.f32 %v687_v32, %v773_v44 }
 0x141   : > { %995 = vrot.lane.b32.xlu0 %v6369_v40, %s5938_s24 }
 0x142   : > { %837 = vst.msk [vmem:[#allocation2 + $0x148] sm:$0xff] %vm342_vm2, %v805_v23 }
 0x144   : > { %997 = vrot.lane.b32.xlu1 %v6360_v34, %s5938_s24 }
 0x145   : > { %1825 = vrot.lane.b32.xlu0 %v6381_v42, %s5939_s25 }
 0x147   : > { %v6632_v45 = vld [vmem:[#allocation2 + $0x150] sm:$0xff] }
 0x148   : > { %1636 = vrot.lane.b32.xlu1 %v6362_v35, %s5938_s24  ;;  %1545 = vst.msk [vmem:[#allocation3 + $0x1d0] sm:$0xff] %vm342_vm2, %v6632_v45  ;;  %v6648_v46 = vld [vmem:[#allocation2 + $0x151] sm:$0xff] }
 0x149   : > { %1634 = vrot.lane.b32.xlu0 %v6367_v39, %s5938_s24  ;;  %v6638_v34 = vld [vmem:[#allocation2 + $0x149] sm:$0xff]  ;;  %2184 = vst.msk [vmem:[#allocation3 + $0x1a8] sm:$0xff] %vm342_vm2, %v6648_v46 }
 0x14a   : > { %2183 = vst.msk [vmem:[#allocation3 + $0x190] sm:$0xff] %vm342_vm2, %v6638_v34  ;;  %v6650_v47 = vld [vmem:[#allocation2 + $0x14f] sm:$0xff]  ;;  %v6654_v48 = vld [vmem:[#allocation2 + $0x147] sm:$0xff] }
 0x14b   : > { %903 = vst.msk [vmem:[#allocation3 + $0x1e0] sm:$0xff] %vm342_vm2, %v6654_v48  ;;  %904 = vst.msk [vmem:[#allocation3 + $0x1f8] sm:$0xff] %vm342_vm2, %v6650_v47 }
 0x14c   : > { %1190 = vrot.lane.b32.xlu1 %v6362_v35, %s5939_s25  ;;  %v6646_v35 = vld [vmem:[#allocation2 + $0x148] sm:$0xff] }
 0x14d   : > { %1377 = vrot.lane.b32.xlu0 %v6383_v43, %s5941_s23  ;;  %1544 = vst.msk [vmem:[#allocation3 + $0x1b8] sm:$0xff] %vm342_vm2, %v6646_v35 }
 0x150   : > { %1823 = vrot.lane.b32.xlu1 %v6383_v43, %s5939_s25  ;;  %v2252_v63 = vld [vmem:[#allocation3 + $0x1a8] sm:$0xff] }
 0x151   : > { %1188 = vrot.lane.b32.xlu0 %v6367_v39, %s5939_s25  ;;  %v5534_v39 = vpop.f32.mrb[20].mxu0  ;;  %v2249_v56 = vld [vmem:[#allocation3 + $0x190] sm:$0xff] }
 0x152   : > { %v702_v43 = vadd.f32 %v5534_v39, %v6217_v4  ;;  %5582 = vmatprep.mubr.msk.f32.mxu0 %vm342_vm2, %v2249_v56  ;;  %v696_v57 = vpop.f32.mrb[21].mxu0 }
 0x153   : > { %5583 = vmatmul.mubr.msk.f32.gmra.mrb[48].mxu0 %vm342_vm2, %v2252_v63  ;;  %v5537_v7 = vpop.f32.mrb[22].mxu0  ;;  %v1952_v63 = vld [vmem:[#allocation2 + $0xd0] sm:$0xff] }
 0x154   : > { %2015 = vrot.lane.b32.xlu1 %v6369_v40, %s5941_s23  ;;  %v776_v49 = vmul.f32 0.01, %v702_v43  ;;  %v697_v40 = vadd.f32 %v6217_v4, %v696_v57  ;;  %v712_v9 = vadd.f32 %v5537_v7, %v6217_v4  ;;  %v706_v10 = vpop.f32.mrb[23].mxu0 }
 0x155   : > { %2021 = vrot.lane.b32.xlu0 %v6401_v52, %s5941_s23  ;;  %v707_v12 = vadd.f32 %v6217_v4, %v706_v10  ;;  %v5540_v5 = vpop.f32.mrb[24].mxu0 }
 0x156   : > { %v808_v3 = vmax.f32 %v702_v43, %v776_v49  ;;  %v722_v14 = vadd.f32 %v5540_v5, %v6217_v4  ;;  %v716_v6 = vpop.f32.mrb[25].mxu0 }
 0x157   : > { %v777_v25 = vmul.f32 0.01, %v707_v12  ;;  %v717_v27 = vadd.f32 %v6217_v4, %v716_v6 }
 0x158   : > { %1379 = vrot.lane.b32.xlu1 %v6381_v42, %s5941_s23  ;;  %840 = vst.msk [vmem:[#allocation2 + $0x170] sm:$0xff] %vm342_vm2, %v808_v3  ;;  %v775_v42 = vmul.f32 0.01, %v697_v40  ;;  %v780_v31 = vmul.f32 0.01, %v722_v14 }
 0x159   : > { %999 = vrot.lane.b32.xlu0 %v6409_v59, %s5938_s24  ;;  %v809_v41 = vmax.f32 %v707_v12, %v777_v25  ;;  %v779_v44 = vmul.f32 0.01, %v717_v27 }
 0x15a   : > { %v807_v8 = vmax.f32 %v697_v40, %v775_v42  ;;  %v812_v39 = vmax.f32 %v722_v14, %v780_v31 }
 0x15b   : > { %841 = vst.msk [vmem:[#allocation2 + $0x188] sm:$0xff] %vm342_vm2, %v809_v41 }
 0x15c   : > { %1001 = vrot.lane.b32.xlu1 %v6401_v52, %s5938_s24  ;;  %839 = vst.msk [vmem:[#allocation2 + $0x168] sm:$0xff] %vm342_vm2, %v807_v8  ;;  %v778_v52 = vmul.f32 0.01, %v712_v9  ;;  %844 = vst.msk [vmem:[#allocation2 + $0x1b0] sm:$0xff] %vm342_vm2, %v812_v39 }
 0x15d   : > { %1829 = vrot.lane.b32.xlu0 %v6421_v53, %s5939_s25 }
 0x15e   : > { %v810_v21 = vmax.f32 %v712_v9, %v778_v52 }
 0x15f   : > { %v6688_v13 = vld [vmem:[#allocation2 + $0x170] sm:$0xff] }
 0x160   : > { %1640 = vrot.lane.b32.xlu1 %v6403_v54, %s5938_s24  ;;  %1547 = vst.msk [vmem:[#allocation3 + $0x200] sm:$0xff] %vm342_vm2, %v6688_v13  ;;  %842 = vst.msk [vmem:[#allocation2 + $0x190] sm:$0xff] %vm342_vm2, %v810_v21  ;;  %v6724_v6 = vld [vmem:[#allocation2 + $0x171] sm:$0xff] }
 0x161   : > { %1638 = vrot.lane.b32.xlu0 %v6407_v58, %s5938_s24  ;;  %2186 = vst.msk [vmem:[#allocation3 + $0x1d8] sm:$0xff] %vm342_vm2, %v6724_v6 }
 0x163   : > { %v6696_v28 = vld [vmem:[#allocation2 + $0x169] sm:$0xff] }
 0x164   : > { %1194 = vrot.lane.b32.xlu1 %v6403_v54, %s5939_s25  ;;  %v5543_v54 = vpop.f32.mrb[26].mxu0  ;;  %2185 = vst.msk [vmem:[#allocation3 + $0x1c0] sm:$0xff] %vm342_vm2, %v6696_v28  ;;  %v6707_v56 = vld [vmem:[#allocation2 + $0x168] sm:$0xff] }
 0x165   : > { %1381 = vrot.lane.b32.xlu0 %v6423_v0, %s5941_s23  ;;  %v732_v32 = vadd.f32 %v5543_v54, %v6217_v4  ;;  %v726_v22 = vpop.f32.mrb[27].mxu0  ;;  %1546 = vst.msk [vmem:[#allocation3 + $0x1e8] sm:$0xff] %vm342_vm2, %v6707_v56  ;;  %v6719_v12 = vld [vmem:[#allocation2 + $0x16f] sm:$0xff] }
 0x166   : > { %v727_v23 = vadd.f32 %v6217_v4, %v726_v22  ;;  %v5546_v49 = vpop.f32.mrb[28].mxu0  ;;  %906 = vst.msk [vmem:[#allocation3 + $0x228] sm:$0xff] %vm342_vm2, %v6719_v12 }
 0x167   : > { %v782_v43 = vmul.f32 0.01, %v732_v32  ;;  %v742_v3 = vadd.f32 %v5546_v49, %v6217_v4  ;;  %v736_v40 = vpop.f32.mrb[29].mxu0 }
 0x168   : > { %1827 = vrot.lane.b32.xlu1 %v6423_v0, %s5939_s25  ;;  %v811_v0 = vmax.f32 %v717_v27, %v779_v44  ;;  %v781_v57 = vmul.f32 0.01, %v727_v23  ;;  %v5549_v8 = vpop.f32.mrb[30].mxu0  ;;  %v6731_v27 = vld [vmem:[#allocation2 + $0x167] sm:$0xff] }
 0x169   : > { %1192 = vrot.lane.b32.xlu0 %v6407_v58, %s5939_s25  ;;  %v814_v42 = vmax.f32 %v732_v32, %v782_v43  ;;  %v737_v58 = vadd.f32 %v6217_v4, %v736_v40  ;;  %v784_v9 = vmul.f32 0.01, %v742_v3  ;;  %v752_v10 = vadd.f32 %v5549_v8, %v6217_v4  ;;  %v746_v52 = vpop.f32.mrb[31].mxu0  ;;  %905 = vst.msk [vmem:[#allocation3 + $0x210] sm:$0xff] %vm342_vm2, %v6731_v27  ;;  %v6742_v32 = vld [vmem:[#allocation2 + $0x189] sm:$0xff]  ;;  %v2258_v43 = vld [vmem:[#allocation3 + $0x1d8] sm:$0xff] }
 0x16a   : > { %843 = vst.msk [vmem:[#allocation2 + $0x1a8] sm:$0xff] %vm342_vm2, %v811_v0  ;;  %v813_v7 = vmax.f32 %v727_v23, %v781_v57  ;;  %v747_v14 = vadd.f32 %v6217_v4, %v746_v52  ;;  %2187 = vst.msk [vmem:[#allocation3 + $0x1f0] sm:$0xff] %vm342_vm2, %v6742_v32  ;;  %v6811_v52 = vld [vmem:[#allocation2 + $0x187] sm:$0xff] }
 0x16b   : > { %846 = vst.msk [vmem:[#allocation2 + $0x1d0] sm:$0xff] %vm342_vm2, %v814_v42  ;;  %v783_v5 = vmul.f32 0.01, %v737_v58  ;;  %v816_v21 = vmax.f32 %v742_v3, %v784_v9  ;;  %v786_v25 = vmul.f32 0.01, %v752_v10  ;;  %v2255_v23 = vld [vmem:[#allocation3 + $0x1c0] sm:$0xff] }
 0x16c   : > { %2019 = vrot.lane.b32.xlu1 %v6409_v59, %s5941_s23  ;;  %v6728_v59 = vld [vmem:[#allocation2 + $0xc8] sm:$0xff]  ;;  %845 = vst.msk [vmem:[#allocation2 + $0x1c8] sm:$0xff] %vm342_vm2, %v813_v7  ;;  %v785_v31 = vmul.f32 0.01, %v747_v14  ;;  %5585 = vmatprep.mubr.msk.f32.mxu0 %vm342_vm2, %v2255_v23  ;;  %v6781_v42 = vld [vmem:[#allocation2 + $0x190] sm:$0xff]  ;;  %907 = vst.msk [vmem:[#allocation3 + $0x240] sm:$0xff] %vm342_vm2, %v6811_v52 }
 0x16d   : > { %2025 = vrot.lane.b32.xlu0 %v1952_v63, %s5941_s23  ;;  %v815_v54 = vmax.f32 %v737_v58, %v783_v5  ;;  %848 = vst.msk [vmem:[#allocation2 + $0x1f0] sm:$0xff] %vm342_vm2, %v816_v21  ;;  %v818_v4 = vmax.f32 %v752_v10, %v786_v25  ;;  %5586 = vmatmul.mubr.msk.f32.gmra.mrb[50].mxu0 %vm342_vm2, %v2258_v43  ;;  %1549 = vst.msk [vmem:[#allocation3 + $0x230] sm:$0xff] %vm342_vm2, %v6781_v42  ;;  %v6801_v10 = vld [vmem:[#allocation2 + $0x191] sm:$0xff] }
 0x16e   : > { %v817_v22 = vmax.f32 %v747_v14, %v785_v31  ;;  %2188 = vst.msk [vmem:[#allocation3 + $0x208] sm:$0xff] %vm342_vm2, %v6801_v10  ;;  %v6831_v31 = vld [vmem:[#allocation2 + $0x1b0] sm:$0xff] }
 0x16f   : > { %847 = vst.msk [vmem:[#allocation2 + $0x1e8] sm:$0xff] %vm342_vm2, %v815_v54  ;;  %850 = vst.msk [vmem:[#allocation2 + $0x210] sm:$0xff] %vm342_vm2, %v818_v4 }
 0x170   : > { %1383 = vrot.lane.b32.xlu1 %v6421_v53, %s5941_s23  ;;  %849 = vst.msk [vmem:[#allocation2 + $0x208] sm:$0xff] %vm342_vm2, %v817_v22  ;;  %1551 = vst.msk [vmem:[#allocation3 + $0x260] sm:$0xff] %vm342_vm2, %v6831_v31 }
 0x171   : > { %1003 = vrot.lane.b32.xlu0 %v6728_v59, %s5938_s24  ;;  %v986_v41 = vpop.permute.xlu1 %985  ;;  %v6749_v44 = vld [vmem:[#allocation2 + $0x1a9] sm:$0xff] }
 0x172   : > { %1079 = vst.msk [vmem:[#allocation3 + $0x48] sm:$0xff] %vm1075_vm5, %v986_v41  ;;  %v1623_v53 = vpop.permute.xlu0 %1622  ;;  %v2261_v21 = vld [vmem:[#allocation3 + $0x1f0] sm:$0xff]  ;;  %v6848_v41 = vld [vmem:[#allocation2 + $0x1a7] sm:$0xff] }
 0x173   : > { %1718 = vst.msk [vmem:[#allocation3 + $0x8] sm:$0xff] %vm1075_vm5, %v1623_v53  ;;  %v6758_v39 = vld [vmem:[#allocation2 + $0x1c9] sm:$0xff]  ;;  %5588 = vmatprep.mubr.msk.f32.mxu0 %vm342_vm2, %v2261_v21  ;;  %v6900_v21 = vld [vmem:[#allocation2 + $0x1d1] sm:$0xff] }
 0x174   : > { %1005 = vrot.lane.b32.xlu1 %v1952_v63, %s5938_s24  ;;  %2189 = vst.msk [vmem:[#allocation3 + $0x220] sm:$0xff] %vm342_vm2, %v6749_v44  ;;  %2191 = vst.msk [vmem:[#allocation3 + $0x250] sm:$0xff] %vm342_vm2, %v6758_v39  ;;  %v6850_v53 = vld [vmem:[#allocation2 + $0x1af] sm:$0xff] }
 0x175   : > { %1833 = vrot.lane.b32.xlu0 %v6455_v18, %s5939_s25  ;;  %v1625_v49 = vpop.permute.xlu1 %1624  ;;  %v2264_v25 = vld [vmem:[#allocation3 + $0x208] sm:$0xff]  ;;  %910 = vst.msk [vmem:[#allocation3 + $0x288] sm:$0xff] %vm342_vm2, %v6850_v53  ;;  %909 = vst.msk [vmem:[#allocation3 + $0x270] sm:$0xff] %vm342_vm2, %v6848_v41 }
 0x176   : > { %1719 = vst.msk [vmem:[#allocation3 + $0x20] sm:$0xff] %vm1075_vm5, %v1625_v49  ;;  %v1366_v63 = vpop.permute.xlu0 %1365  ;;  %v6768_v0 = vld [vmem:[#allocation2 + $0x1e9] sm:$0xff]  ;;  %5589 = vmatmul.mubr.msk.f32.gmra.mrb[52].mxu0 %vm342_vm2, %v2264_v25 }
 0x177   : > { %1462 = vst.msk [vmem:[#allocation3] sm:$0xff] %vm1461_vm7, %v1366_v63  ;;  %v6774_v3 = vld [vmem:[#allocation2 + $0x209] sm:$0xff]  ;;  %v6865_v63 = vld [vmem:[#allocation2 + $0x1b1] sm:$0xff] }
 0x178   : > { %1644 = vrot.lane.b32.xlu1 %v6440_v11, %s5938_s24  ;;  %2193 = vst.msk [vmem:[#allocation3 + $0x280] sm:$0xff] %vm342_vm2, %v6768_v0  ;;  %2195 = vst.msk [vmem:[#allocation3 + $0x2b0] sm:$0xff] %vm342_vm2, %v6774_v3 }
 0x179   : > { %1642 = vrot.lane.b32.xlu0 %v6445_v15, %s5938_s24  ;;  %v1179_v57 = vpop.permute.xlu1 %1178  ;;  %2190 = vst.msk [vmem:[#allocation3 + $0x238] sm:$0xff] %vm342_vm2, %v6865_v63  ;;  %2192 = vst.msk [vmem:[#allocation3 + $0x268] sm:$0xff] %vm342_vm2, %v6900_v21 }
 0x17a   : > { %1272 = vst.msk [vmem:[#allocation3 + $0x48] sm:$0xff] %vm1268_vm6, %v1179_v57  ;;  %v1177_v40 = vpop.permute.xlu0 %1176 }
 0x17c   : > { %1198 = vrot.lane.b32.xlu1 %v6440_v11, %s5939_s25  ;;  %v6793_v11 = vld [vmem:[#allocation2 + $0x188] sm:$0xff] }
 0x17d   : > { %1385 = vrot.lane.b32.xlu0 %v6457_v19, %s5941_s23  ;;  %v984_v58 = vpop.permute.xlu1 %983  ;;  %1548 = vst.msk [vmem:[#allocation3 + $0x218] sm:$0xff] %vm342_vm2, %v6793_v11 }
 0x17e   : > { %1078 = vst.msk [vmem:[#allocation3 + $0x30] sm:$0xff] %vm1075_vm5, %v984_v58  ;;  %v2010_v8 = vpop.permute.xlu0 %2009 }
 0x17f   : > { %1271 = vst.msk [vmem:[#allocation3 + $0x30] sm:$0xff] %vm1268_vm6, %v1177_v40 }
 0x180   : > { %1831 = vrot.lane.b32.xlu1 %v6457_v19, %s5939_s25  ;;  %v6803_v19 = vld [vmem:[#allocation2 + $0x18f] sm:$0xff] }
 0x181   : > { %1196 = vrot.lane.b32.xlu0 %v6445_v15, %s5939_s25  ;;  %v1368_v7 = vpop.permute.xlu1 %1367  ;;  %908 = vst.msk [vmem:[#allocation3 + $0x258] sm:$0xff] %vm342_vm2, %v6803_v19 }
 0x182   : > { %1463 = vst.msk [vmem:[#allocation3 + $0x18] sm:$0xff] %vm1461_vm7, %v1368_v7  ;;  %v988_v9 = vpop.permute.xlu0 %987 }
 0x183   : > { %1080 = vst.msk [vmem:[#allocation3 + $0x60] sm:$0xff] %vm1075_vm5, %v988_v9  ;;  %v2267_v9 = vld [vmem:[#allocation3 + $0x220] sm:$0xff] }
 0x184   : > { %2023 = vrot.lane.b32.xlu1 %v6728_v59, %s5941_s23  ;;  %5591 = vmatprep.mubr.msk.f32.mxu0 %vm342_vm2, %v2267_v9 }
 0x185   : > { %2029 = vrot.lane.b32.xlu0 %v6470_v29, %s5941_s23  ;;  %v990_v15 = vpop.permute.xlu1 %989 }
 0x186   : > { %1081 = vst.msk [vmem:[#allocation3 + $0x78] sm:$0xff] %vm1075_vm5, %v990_v15  ;;  %v1818_v5 = vpop.permute.xlu0 %1817 }
 0x187   : > { %1912 = vst.msk [vmem:[#allocation3 + $0x20] sm:$0xff] %vm1268_vm6, %v1818_v5  ;;  %v2270_v5 = vld [vmem:[#allocation3 + $0x238] sm:$0xff] }
 0x188   : > { %1387 = vrot.lane.b32.xlu1 %v6455_v18, %s5941_s23  ;;  %2104 = vst.msk [vmem:[#allocation3 + $0x20] sm:$0xff] %vm1461_vm7, %v2010_v8  ;;  %5592 = vmatmul.mubr.msk.f32.gmra.mrb[54].mxu0 %vm342_vm2, %v2270_v5 }
 0x189   : > { %1007 = vrot.lane.b32.xlu0 %v6482_v36, %s5938_s24  ;;  %v1629_v14 = vpop.permute.xlu1 %1628 }
 0x18a   : > { %1721 = vst.msk [vmem:[#allocation3 + $0x50] sm:$0xff] %vm1075_vm5, %v1629_v14  ;;  %v1627_v59 = vpop.permute.xlu0 %1626 }
 0x18b   : > { %1720 = vst.msk [vmem:[#allocation3 + $0x38] sm:$0xff] %vm1075_vm5, %v1627_v59  ;;  %v2202_v59 = vld [vmem:[#allocation3 + $0x18] sm:$0xff] }
 0x18c   : > { %1009 = vrot.lane.b32.xlu1 %v6470_v29, %s5938_s24  ;;  %v6836_v29 = vld [vmem:[#allocation2 + $0x1a8] sm:$0xff] }
 0x18d   : > { %1837 = vrot.lane.b32.xlu0 %v6493_v37, %s5939_s25  ;;  %v1183_v18 = vpop.permute.xlu1 %1182  ;;  %1550 = vst.msk [vmem:[#allocation3 + $0x248] sm:$0xff] %vm342_vm2, %v6836_v29 }
 0x18e   : > { %1274 = vst.msk [vmem:[#allocation3 + $0x78] sm:$0xff] %vm1268_vm6, %v1183_v18  ;;  %v1370_v54 = vpop.permute.xlu0 %1369  ;;  %v6903_v18 = vld [vmem:[#allocation2 + $0x1c7] sm:$0xff] }
 0x18f   : > { %1464 = vst.msk [vmem:[#allocation3 + $0x30] sm:$0xff] %vm1461_vm7, %v1370_v54  ;;  %v2203_v7 = vld [vmem:[#allocation3 + $0x20] sm:$0xff]  ;;  %v6907_v54 = vld [vmem:[#allocation2 + $0x1cf] sm:$0xff] }
 0x190   : > { %1648 = vrot.lane.b32.xlu1 %v6472_v30, %s5938_s24  ;;  %911 = vst.msk [vmem:[#allocation3 + $0x2a0] sm:$0xff] %vm342_vm2, %v6903_v18  ;;  %912 = vst.msk [vmem:[#allocation3 + $0x2b8] sm:$0xff] %vm342_vm2, %v6907_v54 }
 0x191   : > { %1646 = vrot.lane.b32.xlu0 %v6480_v33, %s5938_s24 }
 0x192   : > { %v1816_v4 = vpop.permute.xlu1 %1815 }
 0x193   : > { %1911 = vst.msk [vmem:[#allocation3 + $0x8] sm:$0xff] %vm1268_vm6, %v1816_v4  ;;  %v1181_v22 = vpop.permute.xlu0 %1180  ;;  %v6918_v4 = vld [vmem:[#allocation2 + $0x1f1] sm:$0xff] }
 0x194   : > { %1273 = vst.msk [vmem:[#allocation3 + $0x60] sm:$0xff] %vm1268_vm6, %v1181_v22  ;;  %1202 = vrot.lane.b32.xlu1 %v6472_v30, %s5939_s25  ;;  %v6863_v30 = vld [vmem:[#allocation2 + $0x1c8] sm:$0xff] }
 0x195   : > { %1389 = vrot.lane.b32.xlu0 %v6495_v38, %s5941_s23  ;;  %1552 = vst.msk [vmem:[#allocation3 + $0x278] sm:$0xff] %vm342_vm2, %v6863_v30  ;;  %2194 = vst.msk [vmem:[#allocation3 + $0x298] sm:$0xff] %vm342_vm2, %v6918_v4 }
 0x196   : > { %v2008_v23 = vpop.permute.xlu1 %2007  ;;  %v2205_v5 = vld [vmem:[#allocation3 + $0x30] sm:$0xff] }
 0x197   : > { %2103 = vst.msk [vmem:[#allocation3 + $0x8] sm:$0xff] %vm1461_vm7, %v2008_v23  ;;  %v2014_v43 = vpop.permute.xlu0 %2013  ;;  %v6923_v23 = vld [vmem:[#allocation2 + $0x1e7] sm:$0xff] }
 0x198   : > { %1835 = vrot.lane.b32.xlu1 %v6495_v38, %s5939_s25  ;;  %v6877_v38 = vld [vmem:[#allocation2 + $0x1e8] sm:$0xff]  ;;  %913 = vst.msk [vmem:[#allocation3 + $0x2d0] sm:$0xff] %vm342_vm2, %v6923_v23 }
 0x199   : > { %1200 = vrot.lane.b32.xlu0 %v6480_v33, %s5939_s25  ;;  %v6875_v33 = vld [vmem:[#allocation2 + $0x1d0] sm:$0xff]  ;;  %1554 = vst.msk [vmem:[#allocation3 + $0x2a8] sm:$0xff] %vm342_vm2, %v6877_v38 }
 0x19a   : > { %v1372_v49 = vpop.permute.xlu1 %1371  ;;  %1553 = vst.msk [vmem:[#allocation3 + $0x290] sm:$0xff] %vm342_vm2, %v6875_v33 }
 0x19b   : > { %1465 = vst.msk [vmem:[#allocation3 + $0x48] sm:$0xff] %vm1461_vm7, %v1372_v49  ;;  %v992_v57 = vpop.permute.xlu0 %991  ;;  %v1523_v49 = vld [vmem:[#allocation2 + $0x1f0] sm:$0xff] }
 0x19c   : > { %1082 = vst.msk [vmem:[#allocation3 + $0x90] sm:$0xff] %vm1075_vm5, %v992_v57  ;;  %2027 = vrot.lane.b32.xlu1 %v6482_v36, %s5941_s23  ;;  %v2199_v36 = vld [vmem:[#allocation3] sm:$0xff]  ;;  %v2273_v57 = vld [vmem:[#allocation3 + $0x250] sm:$0xff] }
 0x19d   : > { %2033 = vrot.lane.b32.xlu0 %v6519_v51, %s5941_s23  ;;  %1555 = vst.msk [vmem:[#allocation3 + $0x2c0] sm:$0xff] %vm342_vm2, %v1523_v49  ;;  %5594 = vmatprep.mubr.msk.f32.mxu0 %vm342_vm2, %v2273_v57 }
 0x19e   : > { %v994_v40 = vpop.permute.xlu1 %993  ;;  %v2200_v58 = vld [vmem:[#allocation3 + $0x8] sm:$0xff] }
 0x19f   : > { %1083 = vst.msk [vmem:[#allocation3 + $0xa8] sm:$0xff] %vm1075_vm5, %v994_v40  ;;  %v1822_v8 = vpop.permute.xlu0 %1821  ;;  %2498 = vmatprep.mubr.f32.mxu1 %v2200_v58  ;;  %v2276_v58 = vld [vmem:[#allocation3 + $0x268] sm:$0xff] }
 0x1a0   : > { %1914 = vst.msk [vmem:[#allocation3 + $0x50] sm:$0xff] %vm1268_vm6, %v1822_v8  ;;  %1391 = vrot.lane.b32.xlu1 %v6493_v37, %s5941_s23  ;;  %2499 = vmatmul.mubr.f32.vlgmr.msra.gmra.mrb[0].mxu1 %v2199_v36 }
 0x1a1   : > { %2106 = vst.msk [vmem:[#allocation3 + $0x50] sm:$0xff] %vm1461_vm7, %v2014_v43  ;;  %1011 = vrot.lane.b32.xlu0 %v6537_v60, %s5938_s24  ;;  %2503 = vmatprep.mubr.f32.mxu1 %v2203_v7  ;;  %v6925_v43 = vld [vmem:[#allocation2 + $0x1ef] sm:$0xff]  ;;  %v2282_v7 = vld [vmem:[#allocation3 + $0x298] sm:$0xff] }
 0x1a2   : > { %v1633_v15 = vpop.permute.xlu1 %1632  ;;  %914 = vst.msk [vmem:[#allocation3 + $0x2e8] sm:$0xff] %vm342_vm2, %v6925_v43  ;;  %5595 = vmatmul.mubr.msk.f32.gmra.mrb[56].mxu0 %vm342_vm2, %v2276_v58 }
 0x1a3   : > { %1723 = vst.msk [vmem:[#allocation3 + $0x80] sm:$0xff] %vm1075_vm5, %v1633_v15  ;;  %v1631_v14 = vpop.permute.xlu0 %1630 }
 0x1a4   : > { %1722 = vst.msk [vmem:[#allocation3 + $0x68] sm:$0xff] %vm1075_vm5, %v1631_v14  ;;  %1013 = vrot.lane.b32.xlu1 %v6519_v51, %s5938_s24  ;;  %2504 = vmatmul.mubr.f32.gmra.mrb[2].mxu1 %v2202_v59 }
 0x1a5   : > { %1841 = vrot.lane.b32.xlu0 %v6542_v1, %s5939_s25 }
 0x1a6   : > { %v1187_v37 = vpop.permute.xlu1 %1186 }
 0x1a7   : > { %1276 = vst.msk [vmem:[#allocation3 + $0xa8] sm:$0xff] %vm1268_vm6, %v1187_v37  ;;  %v1374_v25 = vpop.permute.xlu0 %1373  ;;  %v2208_v37 = vld [vmem:[#allocation3 + $0x48] sm:$0xff] }
 0x1a8   : > { %1466 = vst.msk [vmem:[#allocation3 + $0x60] sm:$0xff] %vm1461_vm7, %v1374_v25  ;;  %1652 = vrot.lane.b32.xlu1 %v6539_v61, %s5938_s24  ;;  %v2209_v14 = vld [vmem:[#allocation3 + $0x50] sm:$0xff] }
 0x1a9   : > { %1650 = vrot.lane.b32.xlu0 %v6527_v55, %s5938_s24 }
 0x1aa   : > { %v1820_v51 = vpop.permute.xlu1 %1819 }
 0x1ab   : > { %1913 = vst.msk [vmem:[#allocation3 + $0x38] sm:$0xff] %vm1268_vm6, %v1820_v51  ;;  %v1185_v22 = vpop.permute.xlu0 %1184 }
 0x1ac   : > { %1275 = vst.msk [vmem:[#allocation3 + $0x90] sm:$0xff] %vm1268_vm6, %v1185_v22  ;;  %1206 = vrot.lane.b32.xlu1 %v6539_v61, %s5939_s25  ;;  %v2279_v61 = vld [vmem:[#allocation3 + $0x280] sm:$0xff] }
 0x1ad   : > { %1393 = vrot.lane.b32.xlu0 %v6546_v2, %s5941_s23  ;;  %5597 = vmatprep.mubr.msk.f32.mxu0 %vm342_vm2, %v2279_v61 }
 0x1ae   : > { %v2012_v40 = vpop.permute.xlu1 %2011  ;;  %5598 = vmatmul.mubr.msk.f32.gmra.mrb[58].mxu0 %vm342_vm2, %v2282_v7 }
 0x1af   : > { %2105 = vst.msk [vmem:[#allocation3 + $0x38] sm:$0xff] %vm1461_vm7, %v2012_v40  ;;  %v2018_v8 = vpop.permute.xlu0 %2017 }
 0x1b0   : > { %1839 = vrot.lane.b32.xlu1 %v6546_v2, %s5939_s25 }
 0x1b1   : > { %1204 = vrot.lane.b32.xlu0 %v6527_v55, %s5939_s25 }
 0x1b2   : > { %v1376_v36 = vpop.permute.xlu1 %1375 }
 0x1b3   : > { %1467 = vst.msk [vmem:[#allocation3 + $0x78] sm:$0xff] %vm1461_vm7, %v1376_v36  ;;  %v996_v9 = vpop.permute.xlu0 %995 }
 0x1b4   : > { %1084 = vst.msk [vmem:[#allocation3 + $0xc0] sm:$0xff] %vm1075_vm5, %v996_v9  ;;  %2031 = vrot.lane.b32.xlu1 %v6537_v60, %s5941_s23  ;;  %v7002_v9 = vld [vmem:[#allocation2 + $0x208] sm:$0xff] }
 0x1b5   : > { %2037 = vrot.lane.b32.xlu0 %v6578_v62, %s5941_s23  ;;  %1556 = vst.msk [vmem:[#allocation3 + $0x2d8] sm:$0xff] %vm342_vm2, %v7002_v9 }
 0x1b6   : > { %v998_v2 = vpop.permute.xlu1 %997  ;;  %v2206_v55 = vld [vmem:[#allocation3 + $0x38] sm:$0xff] }
 0x1b7   : > { %1085 = vst.msk [vmem:[#allocation3 + $0xd8] sm:$0xff] %vm1075_vm5, %v998_v2  ;;  %v1826_v15 = vpop.permute.xlu0 %1825  ;;  %2508 = vmatprep.mubr.f32.mxu1 %v2206_v55  ;;  %v7015_v55 = vld [vmem:[#allocation2 + $0x210] sm:$0xff] }
 0x1b8   : > { %1916 = vst.msk [vmem:[#allocation3 + $0x80] sm:$0xff] %vm1268_vm6, %v1826_v15  ;;  %1395 = vrot.lane.b32.xlu1 %v6542_v1, %s5941_s23  ;;  %2509 = vmatmul.mubr.f32.gmra.mrb[4].mxu1 %v2205_v5 }
 0x1b9   : > { %2108 = vst.msk [vmem:[#allocation3 + $0x80] sm:$0xff] %vm1461_vm7, %v2018_v8  ;;  %1015 = vrot.lane.b32.xlu0 %v6592_v17, %s5938_s24  ;;  %2513 = vmatprep.mubr.f32.mxu1 %v2209_v14  ;;  %v2211_v8 = vld [vmem:[#allocation3 + $0x60] sm:$0xff] }
 0x1ba   : > { %v1637_v60 = vpop.permute.xlu1 %1636  ;;  %v2214_v36 = vld [vmem:[#allocation3 + $0x78] sm:$0xff]  ;;  %1557 = vst.msk [vmem:[#allocation3 + $0x2f0] sm:$0xff] %vm342_vm2, %v7015_v55 }
 0x1bb   : > { %1725 = vst.msk [vmem:[#allocation3 + $0xb0] sm:$0xff] %vm1075_vm5, %v1637_v60  ;;  %v1635_v59 = vpop.permute.xlu0 %1634 }
 0x1bc   : > { %1724 = vst.msk [vmem:[#allocation3 + $0x98] sm:$0xff] %vm1075_vm5, %v1635_v59  ;;  %1017 = vrot.lane.b32.xlu1 %v6578_v62, %s5938_s24  ;;  %2514 = vmatmul.mubr.f32.gmra.mrb[6].mxu1 %v2208_v37 }
 0x1bd   : > { %1845 = vrot.lane.b32.xlu0 %v6596_v24, %s5939_s25 }
 0x1be   : > { %v1191_v1 = vpop.permute.xlu1 %1190 }
 0x1bf   : > { %1278 = vst.msk [vmem:[#allocation3 + $0xd8] sm:$0xff] %vm1268_vm6, %v1191_v1  ;;  %v1378_v25 = vpop.permute.xlu0 %1377 }
 0x1c0   : > { %1468 = vst.msk [vmem:[#allocation3 + $0x90] sm:$0xff] %vm1461_vm7, %v1378_v25  ;;  %1656 = vrot.lane.b32.xlu1 %v6594_v20, %s5938_s24 }
 0x1c1   : > { %1654 = vrot.lane.b32.xlu0 %v6584_v16, %s5938_s24 }
 0x1c2   : > { %v1824_v51 = vpop.permute.xlu1 %1823 }
 0x1c3   : > { %1915 = vst.msk [vmem:[#allocation3 + $0x68] sm:$0xff] %vm1268_vm6, %v1824_v51  ;;  %v1189_v62 = vpop.permute.xlu0 %1188 }
 0x1c4   : > { %1277 = vst.msk [vmem:[#allocation3 + $0xc0] sm:$0xff] %vm1268_vm6, %v1189_v62  ;;  %1210 = vrot.lane.b32.xlu1 %v6594_v20, %s5939_s25 }
 0x1c5   : > { %1397 = vrot.lane.b32.xlu0 %v6600_v26, %s5941_s23 }
 0x1c6   : > { %v2016_v22 = vpop.permute.xlu1 %2015 }
 0x1c7   : > { %2107 = vst.msk [vmem:[#allocation3 + $0x68] sm:$0xff] %vm1461_vm7, %v2016_v22  ;;  %v2022_v49 = vpop.permute.xlu0 %2021  ;;  %v2217_v51 = vld [vmem:[#allocation3 + $0x90] sm:$0xff] }
 0x1c8   : > { %1843 = vrot.lane.b32.xlu1 %v6600_v26, %s5939_s25  ;;  %v7049_v22 = vld [vmem:[#allocation2 + $0x211] sm:$0xff] }
 0x1c9   : > { %1208 = vrot.lane.b32.xlu0 %v6584_v16, %s5939_s25  ;;  %v2215_v16 = vld [vmem:[#allocation3 + $0x80] sm:$0xff]  ;;  %2196 = vst.msk [vmem:[#allocation3 + $0x2c8] sm:$0xff] %vm342_vm2, %v7049_v22 }
 0x1ca   : > { %v1380_v57 = vpop.permute.xlu1 %1379 }
 0x1cb   : > { %1469 = vst.msk [vmem:[#allocation3 + $0xa8] sm:$0xff] %vm1461_vm7, %v1380_v57  ;;  %v1000_v40 = vpop.permute.xlu0 %999 }
 0x1cc   : > { %1086 = vst.msk [vmem:[#allocation3 + $0xf0] sm:$0xff] %vm1075_vm5, %v1000_v40  ;;  %2035 = vrot.lane.b32.xlu1 %v6592_v17, %s5941_s23 }
 0x1cd   : > { %2041 = vrot.lane.b32.xlu0 %v6632_v45, %s5941_s23 }
 0x1ce   : > { %v1002_v20 = vpop.permute.xlu1 %1001  ;;  %v2212_v58 = vld [vmem:[#allocation3 + $0x68] sm:$0xff] }
 0x1cf   : > { %1087 = vst.msk [vmem:[#allocation3 + $0x108] sm:$0xff] %vm1075_vm5, %v1002_v20  ;;  %v1830_v26 = vpop.permute.xlu0 %1829  ;;  %2518 = vmatprep.mubr.f32.mxu1 %v2212_v58 }
 0x1d0   : > { %1918 = vst.msk [vmem:[#allocation3 + $0xb0] sm:$0xff] %vm1268_vm6, %v1830_v26  ;;  %1399 = vrot.lane.b32.xlu1 %v6596_v24, %s5941_s23  ;;  %2519 = vmatmul.mubr.f32.gmra.mrb[8].mxu1 %v2211_v8 }
 0x1d1   : > { %2110 = vst.msk [vmem:[#allocation3 + $0xb0] sm:$0xff] %vm1461_vm7, %v2022_v49  ;;  %1019 = vrot.lane.b32.xlu0 %v6646_v35, %s5938_s24  ;;  %2523 = vmatprep.mubr.f32.mxu1 %v2215_v16  ;;  %v2285_v16 = vld [vmem:[#allocation3 + $0x2b0] sm:$0xff] }
 0x1d2   : > { %v1641_v17 = vpop.permute.xlu1 %1640  ;;  %v2220_v40 = vld [vmem:[#allocation3 + $0xa8] sm:$0xff]  ;;  %5600 = vmatprep.mubr.msk.f32.mxu0 %vm342_vm2, %v2285_v16 }
 0x1d3   : > { %1727 = vst.msk [vmem:[#allocation3 + $0xe0] sm:$0xff] %vm1075_vm5, %v1641_v17  ;;  %v1639_v61 = vpop.permute.xlu0 %1638  ;;  %v2288_v17 = vld [vmem:[#allocation3 + $0x2c8] sm:$0xff] }
 0x1d4   : > { %1726 = vst.msk [vmem:[#allocation3 + $0xc8] sm:$0xff] %vm1075_vm5, %v1639_v61  ;;  %1021 = vrot.lane.b32.xlu1 %v6632_v45, %s5938_s24  ;;  %2524 = vmatmul.mubr.f32.gmra.mrb[10].mxu1 %v2214_v36 }
 0x1d5   : > { %1849 = vrot.lane.b32.xlu0 %v6650_v47, %s5939_s25  ;;  %5601 = vmatmul.mubr.msk.f32.gmra.mrb[60].mxu0 %vm342_vm2, %v2288_v17 }
 0x1d6   : > { %v1195_v24 = vpop.permute.xlu1 %1194 }
 0x1d7   : > { %1280 = vst.msk [vmem:[#allocation3 + $0x108] sm:$0xff] %vm1268_vm6, %v1195_v24  ;;  %v1382_v7 = vpop.permute.xlu0 %1381 }
 0x1d8   : > { %1470 = vst.msk [vmem:[#allocation3 + $0xc0] sm:$0xff] %vm1461_vm7, %v1382_v7  ;;  %1660 = vrot.lane.b32.xlu1 %v6648_v46, %s5938_s24 }
 0x1d9   : > { %1658 = vrot.lane.b32.xlu0 %v6638_v34, %s5938_s24 }
 0x1da   : > { %v1828_v45 = vpop.permute.xlu1 %1827 }
 0x1db   : > { %1917 = vst.msk [vmem:[#allocation3 + $0x98] sm:$0xff] %vm1268_vm6, %v1828_v45  ;;  %v1193_v2 = vpop.permute.xlu0 %1192 }
 0x1dc   : > { %1279 = vst.msk [vmem:[#allocation3 + $0xf0] sm:$0xff] %vm1268_vm6, %v1193_v2  ;;  %1214 = vrot.lane.b32.xlu1 %v6648_v46, %s5939_s25 }
 0x1dd   : > { %1401 = vrot.lane.b32.xlu0 %v6654_v48, %s5941_s23 }
 0x1de   : > { %v2020_v15 = vpop.permute.xlu1 %2019 }
 0x1df   : > { %2109 = vst.msk [vmem:[#allocation3 + $0x98] sm:$0xff] %vm1461_vm7, %v2020_v15  ;;  %v2026_v5 = vpop.permute.xlu0 %2025 }
 0x1e0   : > { %1847 = vrot.lane.b32.xlu1 %v6654_v48, %s5939_s25 }
 0x1e1   : > { %1212 = vrot.lane.b32.xlu0 %v6638_v34, %s5939_s25  ;;  %v7026_v14 = vpop.f32.mrb[32].mxu0 }
 0x1e2   : > { %v1384_v46 = vpop.permute.xlu1 %1383  ;;  %v7028_v60 = vpop.f32.mrb[33].mxu0 }
 0x1e3   : > { %1471 = vst.msk [vmem:[#allocation3 + $0xd8] sm:$0xff] %vm1461_vm7, %v1384_v46  ;;  %v1004_v59 = vpop.permute.xlu0 %1003 }
 0x1e4   : > { %1088 = vst.msk [vmem:[#allocation3 + $0x120] sm:$0xff] %vm1075_vm5, %v1004_v59  ;;  %2039 = vrot.lane.b32.xlu1 %v6646_v35, %s5941_s23  ;;  %v2221_v35 = vld [vmem:[#allocation3 + $0xb0] sm:$0xff] }
 0x1e5   : > { %2045 = vrot.lane.b32.xlu0 %v6688_v13, %s5941_s23  ;;  %v7036_v48 = vpop.f32.mrb[34].mxu0 }
 0x1e6   : > { %v1006_v37 = vpop.permute.xlu1 %1005  ;;  %v2218_v34 = vld [vmem:[#allocation3 + $0x98] sm:$0xff]  ;;  %v7038_v1 = vpop.f32.mrb[35].mxu0 }
 0x1e7   : > { %1089 = vst.msk [vmem:[#allocation3 + $0x138] sm:$0xff] %vm1075_vm5, %v1006_v37  ;;  %v1834_v25 = vpop.permute.xlu0 %1833  ;;  %2528 = vmatprep.mubr.f32.mxu1 %v2218_v34  ;;  %v2223_v34 = vld [vmem:[#allocation3 + $0xc0] sm:$0xff] }
 0x1e8   : > { %1920 = vst.msk [vmem:[#allocation3 + $0xe0] sm:$0xff] %vm1268_vm6, %v1834_v25  ;;  %1403 = vrot.lane.b32.xlu1 %v6650_v47, %s5941_s23  ;;  %2529 = vmatmul.mubr.f32.gmra.mrb[12].mxu1 %v2217_v51 }
 0x1e9   : > { %2112 = vst.msk [vmem:[#allocation3 + $0xe0] sm:$0xff] %vm1461_vm7, %v2026_v5  ;;  %1023 = vrot.lane.b32.xlu0 %v6707_v56, %s5938_s24  ;;  %2533 = vmatprep.mubr.f32.mxu1 %v2221_v35 }
 0x1ea   : > { %v7047_v62 = vpop.f32.mrb[36].mxu0  ;;  %v1645_v49 = vpop.permute.xlu1 %1644  ;;  %v2226_v35 = vld [vmem:[#allocation3 + $0xd8] sm:$0xff] }
 0x1eb   : > { %v7051_v57 = vpop.f32.mrb[37].mxu0  ;;  %1729 = vst.msk [vmem:[#allocation3 + $0x110] sm:$0xff] %vm1075_vm5, %v1645_v49  ;;  %v1643_v47 = vpop.permute.xlu0 %1642 }
 0x1ec   : > { %1728 = vst.msk [vmem:[#allocation3 + $0xf8] sm:$0xff] %vm1075_vm5, %v1643_v47  ;;  %1025 = vrot.lane.b32.xlu1 %v6688_v13, %s5938_s24  ;;  %2534 = vmatmul.mubr.f32.gmra.mrb[14].mxu1 %v2220_v40 }
 0x1ed   : > { %1853 = vrot.lane.b32.xlu0 %v6719_v12, %s5939_s25 }
 0x1ee   : > { %v7061_v20 = vpop.f32.mrb[38].mxu0  ;;  %v1199_v58 = vpop.permute.xlu1 %1198 }
 0x1ef   : > { %v7063_v26 = vpop.f32.mrb[39].mxu0  ;;  %1282 = vst.msk [vmem:[#allocation3 + $0x138] sm:$0xff] %vm1268_vm6, %v1199_v58  ;;  %v1386_v8 = vpop.permute.xlu0 %1385 }
 0x1f0   : > { %1472 = vst.msk [vmem:[#allocation3 + $0xf0] sm:$0xff] %vm1461_vm7, %v1386_v8  ;;  %1664 = vrot.lane.b32.xlu1 %v6724_v6, %s5938_s24 }
 0x1f1   : > { %1662 = vrot.lane.b32.xlu0 %v6696_v28, %s5938_s24 }
 0x1f2   : > { %v7072_v13 = vpop.f32.mrb[40].mxu0  ;;  %v1832_v61 = vpop.permute.xlu1 %1831 }
 0x1f3   : > { %v7074_v36 = vpop.f32.mrb[41].mxu0  ;;  %1919 = vst.msk [vmem:[#allocation3 + $0xc8] sm:$0xff] %vm1268_vm6, %v1832_v61  ;;  %v1197_v24 = vpop.permute.xlu0 %1196 }
 0x1f4   : > { %1281 = vst.msk [vmem:[#allocation3 + $0x120] sm:$0xff] %vm1268_vm6, %v1197_v24  ;;  %1851 = vrot.lane.b32.xlu1 %v6731_v27, %s5939_s25 }
 0x1f5   : > { %1405 = vrot.lane.b32.xlu0 %v6731_v27, %s5941_s23 }
 0x1f6   : > { %v7083_v7 = vpop.f32.mrb[42].mxu0  ;;  %v2024_v45 = vpop.permute.xlu1 %2023 }
 0x1f7   : > { %v7085_v2 = vpop.f32.mrb[43].mxu0  ;;  %2111 = vst.msk [vmem:[#allocation3 + $0xc8] sm:$0xff] %vm1461_vm7, %v2024_v45  ;;  %v2030_v15 = vpop.permute.xlu0 %2029 }
 0x1f8   : > { %2043 = vrot.lane.b32.xlu1 %v6707_v56, %s5941_s23 }
 0x1f9   : > { %1216 = vrot.lane.b32.xlu0 %v6696_v28, %s5939_s25 }
 0x1fa   : > { %v1388_v5 = vpop.permute.xlu1 %1387 }
 0x1fb   : > { %1473 = vst.msk [vmem:[#allocation3 + $0x108] sm:$0xff] %vm1461_vm7, %v1388_v5  ;;  %v1008_v46 = vpop.permute.xlu0 %1007  ;;  %v7098_v27 = vpop.f32.mrb[44].mxu0 }
 0x1fc   : > { %1090 = vst.msk [vmem:[#allocation3 + $0x150] sm:$0xff] %vm1075_vm5, %v1008_v46  ;;  %1407 = vrot.lane.b32.xlu1 %v6719_v12, %s5941_s23  ;;  %v7100_v56 = vpop.f32.mrb[45].mxu0  ;;  %v2227_v12 = vld [vmem:[#allocation3 + $0xe0] sm:$0xff] }
 0x1fd   : > { %2049 = vrot.lane.b32.xlu0 %v6781_v42, %s5941_s23 }
 0x1fe   : > { %v1010_v59 = vpop.permute.xlu1 %1009  ;;  %v2224_v37 = vld [vmem:[#allocation3 + $0xc8] sm:$0xff] }
 0x1ff   : > { %1091 = vst.msk [vmem:[#allocation3 + $0x168] sm:$0xff] %vm1075_vm5, %v1010_v59  ;;  %v1838_v28 = vpop.permute.xlu0 %1837  ;;  %2538 = vmatprep.mubr.f32.mxu1 %v2224_v37 }
 0x200   : > { %1922 = vst.msk [vmem:[#allocation3 + $0x110] sm:$0xff] %vm1268_vm6, %v1838_v28  ;;  %1029 = vrot.lane.b32.xlu1 %v6781_v42, %s5938_s24  ;;  %2539 = vmatmul.mubr.f32.gmra.mrb[16].mxu1 %v2223_v34 }
 0x201   : > { %2114 = vst.msk [vmem:[#allocation3 + $0x110] sm:$0xff] %vm1461_vm7, %v2030_v15  ;;  %1027 = vrot.lane.b32.xlu0 %v6793_v11, %s5938_s24  ;;  %2543 = vmatprep.mubr.f32.mxu1 %v2227_v12  ;;  %v2229_v15 = vld [vmem:[#allocation3 + $0xf0] sm:$0xff] }
 0x202   : > { %v1649_v25 = vpop.permute.xlu1 %1648  ;;  %v2232_v37 = vld [vmem:[#allocation3 + $0x108] sm:$0xff] }
 0x203   : > { %1731 = vst.msk [vmem:[#allocation3 + $0x140] sm:$0xff] %vm1075_vm5, %v1649_v25  ;;  %v1647_v51 = vpop.permute.xlu0 %1646 }
 0x204   : > { %1730 = vst.msk [vmem:[#allocation3 + $0x128] sm:$0xff] %vm1075_vm5, %v1647_v51  ;;  %1668 = vrot.lane.b32.xlu1 %v6801_v10, %s5938_s24  ;;  %2544 = vmatmul.mubr.f32.gmra.mrb[18].mxu1 %v2226_v35 }
 0x205   : > { %1857 = vrot.lane.b32.xlu0 %v6803_v19, %s5939_s25 }
 0x206   : > { %v1203_v42 = vpop.permute.xlu1 %1202 }
 0x207   : > { %1284 = vst.msk [vmem:[#allocation3 + $0x168] sm:$0xff] %vm1268_vm6, %v1203_v42  ;;  %v1390_v49 = vpop.permute.xlu0 %1389 }
 0x208   : > { %1474 = vst.msk [vmem:[#allocation3 + $0x120] sm:$0xff] %vm1461_vm7, %v1390_v49  ;;  %1855 = vrot.lane.b32.xlu1 %v6811_v52, %s5939_s25  ;;  %v2233_v5 = vld [vmem:[#allocation3 + $0x110] sm:$0xff] }
 0x209   : > { %1666 = vrot.lane.b32.xlu0 %v6742_v32, %s5938_s24 }
 0x20a   : > { %v1836_v47 = vpop.permute.xlu1 %1835 }
 0x20b   : > { %1921 = vst.msk [vmem:[#allocation3 + $0xf8] sm:$0xff] %vm1268_vm6, %v1836_v47  ;;  %v1201_v40 = vpop.permute.xlu0 %1200 }
 0x20c   : > { %1283 = vst.msk [vmem:[#allocation3 + $0x150] sm:$0xff] %vm1268_vm6, %v1201_v40  ;;  %2047 = vrot.lane.b32.xlu1 %v6793_v11, %s5941_s23 }
 0x20d   : > { %1409 = vrot.lane.b32.xlu0 %v6811_v52, %s5941_s23 }
 0x20e   : > { %v2028_v58 = vpop.permute.xlu1 %2027 }
 0x20f   : > { %2113 = vst.msk [vmem:[#allocation3 + $0xf8] sm:$0xff] %vm1461_vm7, %v2028_v58  ;;  %v2034_v8 = vpop.permute.xlu0 %2033  ;;  %v2235_v40 = vld [vmem:[#allocation3 + $0x120] sm:$0xff] }
 0x210   : > { %1033 = vrot.lane.b32.xlu1 %v6831_v31, %s5938_s24  ;;  %v7138_v11 = vpop.f32.mrb[46].mxu0 }
 0x211   : > { %1031 = vrot.lane.b32.xlu0 %v6836_v29, %s5938_s24  ;;  %v7140_v24 = vpop.f32.mrb[47].mxu0 }
 0x212   : > { %v1392_v16 = vpop.permute.xlu1 %1391 }
 0x213   : > { %1475 = vst.msk [vmem:[#allocation3 + $0x138] sm:$0xff] %vm1461_vm7, %v1392_v16  ;;  %v1012_v17 = vpop.permute.xlu0 %1011 }
 0x214   : > { %1092 = vst.msk [vmem:[#allocation3 + $0x180] sm:$0xff] %vm1075_vm5, %v1012_v17  ;;  %1859 = vrot.lane.b32.xlu1 %v6848_v41, %s5939_s25 }
 0x215   : > { %1861 = vrot.lane.b32.xlu0 %v6850_v53, %s5939_s25 }
 0x216   : > { %v1014_v52 = vpop.permute.xlu1 %1013  ;;  %v2230_v61 = vld [vmem:[#allocation3 + $0xf8] sm:$0xff] }
 0x217   : > { %1093 = vst.msk [vmem:[#allocation3 + $0x198] sm:$0xff] %vm1075_vm5, %v1014_v52  ;;  %v1842_v45 = vpop.permute.xlu0 %1841  ;;  %2548 = vmatprep.mubr.f32.mxu1 %v2230_v61 }
 0x218   : > { %1924 = vst.msk [vmem:[#allocation3 + $0x140] sm:$0xff] %vm1268_vm6, %v1842_v45  ;;  %2051 = vrot.lane.b32.xlu1 %v6836_v29, %s5941_s23  ;;  %2549 = vmatmul.mubr.f32.gmra.mrb[20].mxu1 %v2229_v15  ;;  %v7155_v29 = vld [vmem:[#allocation2 + $0x1f0] sm:$0xff] }
 0x219   : > { %2116 = vst.msk [vmem:[#allocation3 + $0x140] sm:$0xff] %vm1461_vm7, %v2034_v8  ;;  %1035 = vrot.lane.b32.xlu0 %v6863_v30, %s5938_s24  ;;  %2553 = vmatprep.mubr.f32.mxu1 %v2233_v5 }
 0x21a   : > { %v1653_v46 = vpop.permute.xlu1 %1652  ;;  %v2238_v16 = vld [vmem:[#allocation3 + $0x138] sm:$0xff] }
 0x21b   : > { %1733 = vst.msk [vmem:[#allocation3 + $0x170] sm:$0xff] %vm1075_vm5, %v1653_v46  ;;  %v1651_v59 = vpop.permute.xlu0 %1650 }
 0x21c   : > { %1732 = vst.msk [vmem:[#allocation3 + $0x158] sm:$0xff] %vm1075_vm5, %v1651_v59  ;;  %1037 = vrot.lane.b32.xlu1 %v6875_v33, %s5938_s24  ;;  %2554 = vmatmul.mubr.f32.gmra.mrb[22].mxu1 %v2232_v37 }
 0x21d   : > { %1039 = vrot.lane.b32.xlu0 %v6877_v38, %s5938_s24 }
 0x21e   : > { %v1207_v28 = vpop.permute.xlu1 %1206 }
 0x21f   : > { %1286 = vst.msk [vmem:[#allocation3 + $0x198] sm:$0xff] %vm1268_vm6, %v1207_v28  ;;  %v1394_v34 = vpop.permute.xlu0 %1393 }
 0x220   : > { %1476 = vst.msk [vmem:[#allocation3 + $0x150] sm:$0xff] %vm1461_vm7, %v1394_v34  ;;  %1041 = vrot.lane.b32.xlu1 %v7155_v29, %s5938_s24  ;;  %v2239_v58 = vld [vmem:[#allocation3 + $0x140] sm:$0xff] }
 0x221   : > { %2053 = vrot.lane.b32.xlu0 %v6831_v31, %s5941_s23 }
 0x222   : > { %v1840_v12 = vpop.permute.xlu1 %1839 }
 0x223   : > { %1923 = vst.msk [vmem:[#allocation3 + $0x128] sm:$0xff] %vm1268_vm6, %v1840_v12  ;;  %v1205_v25 = vpop.permute.xlu0 %1204 }
 0x224   : > { %1285 = vst.msk [vmem:[#allocation3 + $0x180] sm:$0xff] %vm1268_vm6, %v1205_v25  ;;  %1218 = vrot.lane.b32.xlu1 %v6724_v6, %s5939_s25  ;;  %v7243_v25 = vld [vmem:[#allocation2 + $0x207] sm:$0xff] }
 0x225   : > { %1670 = vrot.lane.b32.xlu0 %v6749_v44, %s5938_s24 }
 0x226   : > { %v2032_v51 = vpop.permute.xlu1 %2031  ;;  %v7180_v6 = vpop.f32.mrb[48].mxu0 }
 0x227   : > { %2115 = vst.msk [vmem:[#allocation3 + $0x128] sm:$0xff] %vm1461_vm7, %v2032_v51  ;;  %v2038_v35 = vpop.permute.xlu0 %2037  ;;  %v2241_v46 = vld [vmem:[#allocation3 + $0x150] sm:$0xff] }
 0x228   : > { %1411 = vrot.lane.b32.xlu1 %v6803_v19, %s5941_s23  ;;  %v7182_v19 = vpop.f32.mrb[49].mxu0 }
 0x229   : > { %1220 = vrot.lane.b32.xlu0 %v6742_v32, %s5939_s25 }
 0x22a   : > { %v1396_v31 = vpop.permute.xlu1 %1395 }
 0x22b   : > { %1477 = vst.msk [vmem:[#allocation3 + $0x168] sm:$0xff] %vm1461_vm7, %v1396_v31  ;;  %v1016_v42 = vpop.permute.xlu0 %1015  ;;  %v7251_v31 = vld [vmem:[#allocation2 + $0x20f] sm:$0xff] }
 0x22c   : > { %1094 = vst.msk [vmem:[#allocation3 + $0x1b0] sm:$0xff] %vm1075_vm5, %v1016_v42  ;;  %1863 = vrot.lane.b32.xlu1 %v6903_v18, %s5939_s25 }
 0x22d   : > { %1413 = vrot.lane.b32.xlu0 %v6848_v41, %s5941_s23 }
 0x22e   : > { %v1018_v49 = vpop.permute.xlu1 %1017  ;;  %v2236_v47 = vld [vmem:[#allocation3 + $0x128] sm:$0xff] }
 0x22f   : > { %1095 = vst.msk [vmem:[#allocation3 + $0x1c8] sm:$0xff] %vm1075_vm5, %v1018_v49  ;;  %v1846_v32 = vpop.permute.xlu0 %1845  ;;  %2558 = vmatprep.mubr.f32.mxu1 %v2236_v47  ;;  %v4421_v49 = vld [vmem:[%s8651_s5 + $0x8] sm:$0xff] }
 0x230   : > { %1926 = vst.msk [vmem:[#allocation3 + $0x170] sm:$0xff] %vm1268_vm6, %v1846_v32  ;;  %2055 = vrot.lane.b32.xlu1 %v6863_v30, %s5941_s23  ;;  %2559 = vmatmul.mubr.f32.gmra.mrb[24].mxu1 %v2235_v40 }
 0x231   : > { %2118 = vst.msk [vmem:[#allocation3 + $0x170] sm:$0xff] %vm1461_vm7, %v2038_v35  ;;  %1865 = vrot.lane.b32.xlu0 %v6907_v54, %s5939_s25  ;;  %2563 = vmatprep.mubr.f32.mxu1 %v2239_v58 }
 0x232   : > { %v1657_v41 = vpop.permute.xlu1 %1656  ;;  %v2244_v34 = vld [vmem:[#allocation3 + $0x168] sm:$0xff] }
 0x233   : > { %1735 = vst.msk [vmem:[#allocation3 + $0x1a0] sm:$0xff] %vm1075_vm5, %v1657_v41  ;;  %v1655_v8 = vpop.permute.xlu0 %1654  ;;  %v4422_v41 = vld [vmem:[%s8651_s5 + $0x10] sm:$0xff] }
 0x234   : > { %1734 = vst.msk [vmem:[#allocation3 + $0x188] sm:$0xff] %vm1075_vm5, %v1655_v8  ;;  %1672 = vrot.lane.b32.xlu1 %v6865_v63, %s5938_s24  ;;  %2564 = vmatmul.mubr.f32.gmra.mrb[26].mxu1 %v2238_v16  ;;  %v4423_v8 = vld [vmem:[%s8651_s5 + $0x18] sm:$0xff] }
 0x235   : > { %2057 = vrot.lane.b32.xlu0 %v6875_v33, %s5941_s23  ;;  %v5730_v16 = vpack.c.bf16 %v4423_v8, %v4422_v41  ;;  %v4455_v41 = vld [vmem:[%s8651_s5 + $0x118] sm:$0xff] }
 0x236   : > { %v1211_v30 = vpop.permute.xlu1 %1210 }
 0x237   : > { %1288 = vst.msk [vmem:[#allocation3 + $0x1c8] sm:$0xff] %vm1268_vm6, %v1211_v30  ;;  %v1398_v17 = vpop.permute.xlu0 %1397  ;;  %v2165_v30 = vld [vmem:[#allocation2 + $0x229] sm:$0xff] }
 0x238   : > { %1478 = vst.msk [vmem:[#allocation3 + $0x180] sm:$0xff] %vm1461_vm7, %v1398_v17  ;;  %1222 = vrot.lane.b32.xlu1 %v6801_v10, %s5939_s25 }
 0x239   : > { %1674 = vrot.lane.b32.xlu0 %v6758_v39, %s5938_s24  ;;  %2197 = vst.msk [vmem:[#allocation3 + $0x2e0] sm:$0xff] %vm342_vm2, %v2165_v30 }
 0x23a   : > { %v1844_v52 = vpop.permute.xlu1 %1843 }
 0x23b   : > { %1925 = vst.msk [vmem:[#allocation3 + $0x158] sm:$0xff] %vm1268_vm6, %v1844_v52  ;;  %v1209_v61 = vpop.permute.xlu0 %1208  ;;  %v2166_v52 = vld [vmem:[#allocation2 + $0x231] sm:$0xff] }
 0x23c   : > { %1287 = vst.msk [vmem:[#allocation3 + $0x1b0] sm:$0xff] %vm1268_vm6, %v1209_v61  ;;  %1415 = vrot.lane.b32.xlu1 %v6850_v53, %s5941_s23 }
 0x23d   : > { %1224 = vrot.lane.b32.xlu0 %v6749_v44, %s5939_s25  ;;  %2198 = vst.msk [vmem:[#allocation3 + $0x2f8] sm:$0xff] %vm342_vm2, %v2166_v52 }
 0x23e   : > { %v2036_v33 = vpop.permute.xlu1 %2035 }
 0x23f   : > { %2117 = vst.msk [vmem:[#allocation3 + $0x158] sm:$0xff] %vm1461_vm7, %v2036_v33  ;;  %v2042_v45 = vpop.permute.xlu0 %2041  ;;  %v2247_v58 = vld [vmem:[#allocation3 + $0x180] sm:$0xff] }
 0x240   : > { %1867 = vrot.lane.b32.xlu1 %v6923_v23, %s5939_s25 }
 0x241   : > { %1417 = vrot.lane.b32.xlu0 %v6903_v18, %s5941_s23  ;;  %v2245_v18 = vld [vmem:[#allocation3 + $0x170] sm:$0xff] }
 0x242   : > { %v1400_v10 = vpop.permute.xlu1 %1399 }
 0x243   : > { %1479 = vst.msk [vmem:[#allocation3 + $0x198] sm:$0xff] %vm1461_vm7, %v1400_v10  ;;  %v1020_v15 = vpop.permute.xlu0 %1019  ;;  %v4425_v10 = vld [vmem:[%s8651_s5 + $0x28] sm:$0xff] }
 0x244   : > { %1096 = vst.msk [vmem:[#allocation3 + $0x1e0] sm:$0xff] %vm1075_vm5, %v1020_v15  ;;  %2059 = vrot.lane.b32.xlu1 %v6877_v38, %s5941_s23  ;;  %v7227_v38 = vpop.f32.mrb[50].mxu0 }
 0x245   : > { %1869 = vrot.lane.b32.xlu0 %v6925_v43, %s5939_s25  ;;  %v7229_v37 = vpop.f32.mrb[51].mxu0 }
 0x246   : > { %v1022_v44 = vpop.permute.xlu1 %1021  ;;  %v2242_v53 = vld [vmem:[#allocation3 + $0x158] sm:$0xff] }
 0x247   : > { %1097 = vst.msk [vmem:[#allocation3 + $0x1f8] sm:$0xff] %vm1075_vm5, %v1022_v44  ;;  %v1850_v5 = vpop.permute.xlu0 %1849  ;;  %2568 = vmatprep.mubr.f32.mxu1 %v2242_v53  ;;  %v1781_v44 = vld [vmem:[#allocation2 + $0x227] sm:$0xff] }
 0x248   : > { %1928 = vst.msk [vmem:[#allocation3 + $0x1a0] sm:$0xff] %vm1268_vm6, %v1850_v5  ;;  %1676 = vrot.lane.b32.xlu1 %v6900_v21, %s5938_s24  ;;  %2569 = vmatmul.mubr.f32.gmra.mrb[28].mxu1 %v2241_v46  ;;  %v4426_v46 = vld [vmem:[%s8651_s5 + $0x30] sm:$0xff] }
 0x249   : > { %2120 = vst.msk [vmem:[#allocation3 + $0x1a0] sm:$0xff] %vm1461_vm7, %v2042_v45  ;;  %2061 = vrot.lane.b32.xlu0 %v7155_v29, %s5941_s23  ;;  %2573 = vmatprep.mubr.f32.mxu1 %v2245_v18  ;;  %v7284_v17 = vpop.f32.mrb[52].mxu0 }
 0x24a   : > { %v1661_v59 = vpop.permute.xlu1 %1660  ;;  %v7287_v33 = vpop.f32.mrb[53].mxu0  ;;  %v2250_v45 = vld [vmem:[#allocation3 + $0x198] sm:$0xff] }
 0x24b   : > { %1737 = vst.msk [vmem:[#allocation3 + $0x1d0] sm:$0xff] %vm1075_vm5, %v1661_v59  ;;  %v1659_v28 = vpop.permute.xlu0 %1658  ;;  %v1973_v59 = vld [vmem:[#allocation2 + $0x228] sm:$0xff] }
 0x24c   : > { %1736 = vst.msk [vmem:[#allocation3 + $0x1b8] sm:$0xff] %vm1075_vm5, %v1659_v28  ;;  %1226 = vrot.lane.b32.xlu1 %v6865_v63, %s5939_s25  ;;  %2574 = vmatmul.mubr.f32.gmra.mrb[30].mxu1 %v2244_v34  ;;  %v2294_v28 = vld [vmem:[#allocation3 + $0x2f8] sm:$0xff] }
 0x24d   : > { %1678 = vrot.lane.b32.xlu0 %v6768_v0, %s5938_s24  ;;  %4323 = vst.msk [vmem:[#allocation3 + $0x2f8] sm:$0xff] %vm342_vm2, %v2166_v52 }
 0x24e   : > { %v1215_v29 = vpop.permute.xlu1 %1214 }
 0x24f   : > { %1290 = vst.msk [vmem:[#allocation3 + $0x1f8] sm:$0xff] %vm1268_vm6, %v1215_v29  ;;  %v1402_v12 = vpop.permute.xlu0 %1401  ;;  %v1782_v29 = vld [vmem:[#allocation2 + $0x22f] sm:$0xff] }
 0x250   : > { %1480 = vst.msk [vmem:[#allocation3 + $0x1b0] sm:$0xff] %vm1461_vm7, %v1402_v12  ;;  %1419 = vrot.lane.b32.xlu1 %v6907_v54, %s5941_s23 }
 0x251   : > { %1228 = vrot.lane.b32.xlu0 %v6758_v39, %s5939_s25 }
 0x252   : > { %v1848_v51 = vpop.permute.xlu1 %1847 }
 0x253   : > { %1927 = vst.msk [vmem:[#allocation3 + $0x188] sm:$0xff] %vm1268_vm6, %v1848_v51  ;;  %v1213_v63 = vpop.permute.xlu0 %1212  ;;  %v4429_v51 = vld [vmem:[%s8651_s5 + $0x48] sm:$0xff] }
 0x254   : > { %1289 = vst.msk [vmem:[#allocation3 + $0x1e0] sm:$0xff] %vm1268_vm6, %v1213_v63  ;;  %1871 = vrot.lane.b32.xlu1 %v7243_v25, %s5939_s25 }
 0x255   : > { %1421 = vrot.lane.b32.xlu0 %v6923_v23, %s5941_s23  ;;  %v4420_v23 = vld [vmem:[%s8651_s5] sm:$0xff] }
 0x256   : > { %v2040_v35 = vpop.permute.xlu1 %2039 }
 0x257   : > { %2119 = vst.msk [vmem:[#allocation3 + $0x188] sm:$0xff] %vm1461_vm7, %v2040_v35  ;;  %v2046_v39 = vpop.permute.xlu0 %2045  ;;  %v4452_v35 = vld [vmem:[%s8651_s5 + $0x100] sm:$0xff]  ;;  %v2253_v52 = vld [vmem:[#allocation3 + $0x1b0] sm:$0xff] }
 0x258   : > { %2063 = vrot.lane.b32.xlu1 %v7002_v9, %s5941_s23  ;;  %v5727_v9 = vpack.c.bf16 %v4421_v49, %v4420_v23 }
 0x259   : > { %1873 = vrot.lane.b32.xlu0 %v7251_v31, %s5939_s25 }
 0x25a   : > { %v1404_v54 = vpop.permute.xlu1 %1403  ;;  %5728 = vmatpush1.bf16.msra.mxu0 %v5727_v9  ;;  %v4430_v9 = vld [vmem:[%s8651_s5 + $0x50] sm:$0xff] }
 0x25b   : > { %1481 = vst.msk [vmem:[#allocation3 + $0x1c8] sm:$0xff] %vm1461_vm7, %v1404_v54  ;;  %v1024_v42 = vpop.permute.xlu0 %1023  ;;  %5729 = vmatprep.subr.bf16.mxu0 %v5940_v50 }
 0x25c   : > { %1098 = vst.msk [vmem:[#allocation3 + $0x210] sm:$0xff] %vm1075_vm5, %v1024_v42  ;;  %1680 = vrot.lane.b32.xlu1 %v6918_v4, %s5938_s24  ;;  %v1974_v42 = vld [vmem:[#allocation2 + $0x230] sm:$0xff] }
 0x25d   : > { %2065 = vrot.lane.b32.xlu0 %v7015_v55, %s5941_s23  ;;  %v2251_v55 = vld [vmem:[#allocation3 + $0x1a0] sm:$0xff] }
 0x25e   : > { %v1026_v47 = vpop.permute.xlu1 %1025  ;;  %v2248_v32 = vld [vmem:[#allocation3 + $0x188] sm:$0xff]  ;;  %5731 = vmatpush1.bf16.msra.mxu0 %v5730_v16 }
 0x25f   : > { %1099 = vst.msk [vmem:[#allocation3 + $0x228] sm:$0xff] %vm1075_vm5, %v1026_v47  ;;  %v1854_v40 = vpop.permute.xlu0 %1853  ;;  %2578 = vmatprep.mubr.f32.mxu1 %v2248_v32  ;;  %5732 = vmatprep.subr.bf16.mxu0 %v5940_v50  ;;  %v4431_v47 = vld [vmem:[%s8651_s5 + $0x58] sm:$0xff] }
 0x260   : > { %1930 = vst.msk [vmem:[#allocation3 + $0x1d0] sm:$0xff] %vm1268_vm6, %v1854_v40  ;;  %1230 = vrot.lane.b32.xlu1 %v6900_v21, %s5939_s25  ;;  %2579 = vmatmul.mubr.f32.gmra.mrb[32].mxu1 %v2247_v58  ;;  %v5742_v32 = vpack.c.bf16 %v4431_v47, %v4430_v9  ;;  %v7348_v40 = vld [vmem:[%s8650_s4] ss:$0 sm:$0xff]  ;;  %v4454_v58 = vld [vmem:[%s8651_s5 + $0x110] sm:$0xff] }
 0x261   : > { %2122 = vst.msk [vmem:[#allocation3 + $0x1d0] sm:$0xff] %vm1461_vm7, %v2046_v39  ;;  %1682 = vrot.lane.b32.xlu0 %v6774_v3, %s5938_s24  ;;  %2583 = vmatprep.mubr.f32.mxu1 %v2251_v55  ;;  %v4424_v3 = vld [vmem:[%s8651_s5 + $0x20] sm:$0xff]  ;;  %v4453_v39 = vld [vmem:[%s8651_s5 + $0x108] sm:$0xff]  ;;  %v5778_v55 = vpack.c.bf16 %v4455_v41, %v4454_v58  ;;  %v4438_v58 = vld [vmem:[%s8651_s5 + $0x90] sm:$0xff] }
 0x262   : > { %v1665_v61 = vpop.permute.xlu1 %1664  ;;  %v5733_v15 = vpack.c.bf16 %v4425_v10, %v4424_v3  ;;  %v5774_v23 = vpack.c.bf16 %v4453_v39, %v4452_v35  ;;  %v4439_v41 = vld [vmem:[%s8651_s5 + $0x98] sm:$0xff] }
 0x263   : > { %1739 = vst.msk [vmem:[#allocation3 + $0x200] sm:$0xff] %vm1075_vm5, %v1665_v61  ;;  %v1663_v21 = vpop.permute.xlu0 %1662  ;;  %v4432_v61 = vld [vmem:[%s8651_s5 + $0x60] sm:$0xff] }
 0x264   : > { %1738 = vst.msk [vmem:[#allocation3 + $0x1e8] sm:$0xff] %vm1075_vm5, %v1663_v21  ;;  %1423 = vrot.lane.b32.xlu1 %v6925_v43, %s5941_s23  ;;  %2584 = vmatmul.mubr.f32.gmra.mrb[34].mxu1 %v2250_v45  ;;  %v4427_v43 = vld [vmem:[%s8651_s5 + $0x38] sm:$0xff]  ;;  %v4433_v21 = vld [vmem:[%s8651_s5 + $0x68] sm:$0xff] }
 0x265   : > { %1232 = vrot.lane.b32.xlu0 %v6768_v0, %s5939_s25  ;;  %5734 = vmatpush1.bf16.msra.mxu0 %v5733_v15  ;;  %v2291_v0 = vld [vmem:[#allocation3 + $0x2e0] sm:$0xff]  ;;  %v5736_v18 = vpack.c.bf16 %v4427_v43, %v4426_v46  ;;  %v7372_v46 = vpop.f32.mrb[54].mxu0 }
 0x266   : > { %v1852_v53 = vpop.permute.xlu1 %1851  ;;  %5735 = vmatprep.subr.bf16.mxu0 %v5940_v50  ;;  %5603 = vmatprep.mubr.msk.f32.mxu0 %vm342_vm2, %v2291_v0  ;;  %4322 = vst.msk [vmem:[#allocation3 + $0x2e0] sm:$0xff] %vm342_vm2, %v2165_v30  ;;  %v2980_v15 = vld [vmem:[#allocation2 + $0x7] sm:$0xff] }
 0x267   : > { %1929 = vst.msk [vmem:[#allocation3 + $0x1b8] sm:$0xff] %vm1268_vm6, %v1852_v53  ;;  %v1406_v5 = vpop.permute.xlu0 %1405  ;;  %5604 = vmatmul.mubr.msk.f32.gmra.mrb[62].mxu0 %vm342_vm2, %v2294_v28  ;;  %5775 = vmatprep.subr.bf16.mxu1 %v5774_v23  ;;  %v2256_v0 = vld [vmem:[#allocation3 + $0x1c8] sm:$0xff] }
 0x268   : > { %1482 = vst.msk [vmem:[#allocation3 + $0x1e0] sm:$0xff] %vm1461_vm7, %v1406_v5  ;;  %1875 = vrot.lane.b32.xlu1 %v1781_v44, %s5939_s25  ;;  %5777 = vmatpush3.bf16.msra.mxu1 %v5774_v23  ;;  %v2257_v10 = vld [vmem:[#allocation3 + $0x1d0] sm:$0xff]  ;;  %v5745_v44 = vpack.c.bf16 %v4433_v21, %v4432_v61 }
 0x269   : > { %1425 = vrot.lane.b32.xlu0 %v7243_v25, %s5941_s23  ;;  %5737 = vmatpush1.bf16.msra.mxu0 %v5736_v18  ;;  %v4428_v25 = vld [vmem:[%s8651_s5 + $0x40] sm:$0xff]  ;;  %3012 = vst.msk [vmem:[#allocation3] sm:$0xff] %vm342_vm2, %v2980_v15  ;;  %v4434_v18 = vld [vmem:[%s8651_s5 + $0x70] sm:$0xff] }
 0x26a   : > { %v2044_v34 = vpop.permute.xlu1 %2043  ;;  %5738 = vmatprep.subr.bf16.mxu0 %v5940_v50  ;;  %v5739_v63 = vpack.c.bf16 %v4429_v51, %v4428_v25  ;;  %5779 = vmatprep.subr.bf16.mxu1 %v5778_v55  ;;  %v3044_v51 = vld [vmem:[#allocation2 + $0x8] sm:$0xff] }
 0x26b   : > { %2121 = vst.msk [vmem:[#allocation3 + $0x1b8] sm:$0xff] %vm1461_vm7, %v2044_v34  ;;  %v1217_v12 = vpop.permute.xlu0 %1216 }
 0x26c   : > { %1291 = vst.msk [vmem:[#allocation3 + $0x210] sm:$0xff] %vm1268_vm6, %v1217_v12  ;;  %2067 = vrot.lane.b32.xlu1 %v1973_v59, %s5941_s23  ;;  %5781 = vmatpush3.bf16.msra.mxu1 %v5778_v55  ;;  %v2981_v12 = vld [vmem:[#allocation2 + $0xf] sm:$0xff] }
 0x26d   : > { %1877 = vrot.lane.b32.xlu0 %v1782_v29, %s5939_s25  ;;  %5740 = vmatpush1.bf16.msra.mxu0 %v5739_v63  ;;  %v7385_v29 = vpop.f32.mrb[55].mxu0  ;;  %3013 = vst.msk [vmem:[#allocation3 + $0x18] sm:$0xff] %vm342_vm2, %v2981_v12  ;;  %v4443_v12 = vld [vmem:[%s8651_s5 + $0xb8] sm:$0xff] }
 0x26e   : > { %v1408_v54 = vpop.permute.xlu1 %1407  ;;  %5741 = vmatprep.subr.bf16.mxu0 %v5940_v50 }
 0x26f   : > { %1483 = vst.msk [vmem:[#allocation3 + $0x1f8] sm:$0xff] %vm1461_vm7, %v1408_v54  ;;  %v2050_v49 = vpop.permute.xlu0 %2049 }
 0x270   : > { %1684 = vrot.lane.b32.xlu1 %v7049_v22, %s5938_s24 }
 0x271   : > { %2069 = vrot.lane.b32.xlu0 %v1974_v42, %s5941_s23  ;;  %5743 = vmatpush1.bf16.msra.mxu0 %v5742_v32  ;;  %v4437_v42 = vld [vmem:[%s8651_s5 + $0x88] sm:$0xff] }
 0x272   : > { %v1030_v22 = vpop.permute.xlu1 %1029  ;;  %v2254_v8 = vld [vmem:[#allocation3 + $0x1b8] sm:$0xff]  ;;  %5744 = vmatprep.subr.bf16.mxu0 %v5940_v50 }
 0x273   : > { %1101 = vst.msk [vmem:[#allocation3 + $0x258] sm:$0xff] %vm1075_vm5, %v1030_v22  ;;  %v1028_v16 = vpop.permute.xlu0 %1027  ;;  %v2500_v30 = vpop.f32.mrb[0].mxu1  ;;  %2588 = vmatprep.mubr.f32.mxu1 %v2254_v8  ;;  %v5754_v22 = vpack.c.bf16 %v4439_v41, %v4438_v58  ;;  %v3045_v8 = vld [vmem:[#allocation2 + $0x10] sm:$0xff] }
 0x274   : > { %1100 = vst.msk [vmem:[#allocation3 + $0x240] sm:$0xff] %vm1075_vm5, %v1028_v16  ;;  %v2501_v45 = vadd.f32 %v7348_v40, %v2500_v30  ;;  %v2502_v3 = vpop.f32.mrb[1].mxu1  ;;  %1234 = vrot.lane.b32.xlu1 %v6918_v4, %s5939_s25  ;;  %2589 = vmatmul.mubr.f32.gmra.mrb[36].mxu1 %v2253_v52  ;;  %v4446_v41 = vld [vmem:[%s8651_s5 + $0xd0] sm:$0xff] }
 0x275   : > { %2593 = vmatprep.mubr.f32.mxu1 %v2257_v10  ;;  %5746 = vmatpush1.bf16.msra.mxu0 %v5745_v44  ;;  %v7413_v16 = vpop.f32.mrb[56].mxu0  ;;  %v4441_v3 = vld [vmem:[%s8651_s5 + $0xa8] sm:$0xff]  ;;  %v3237_v10 = vld [vmem:[#allocation2 + $0x11] sm:$0xff] }
 0x276   : > { %v2726_v53 = vadd.f32 %v7028_v60, %v2501_v45  ;;  %v1669_v5 = vpop.permute.xlu1 %1668  ;;  %v4435_v60 = vld [vmem:[%s8651_s5 + $0x78] sm:$0xff]  ;;  %5747 = vmatprep.subr.bf16.mxu0 %v5940_v50  ;;  %v7418_v21 = vpop.f32.mrb[57].mxu0  ;;  %v4440_v45 = vld [vmem:[%s8651_s5 + $0xa0] sm:$0xff] }
 0x277   : > { %1741 = vst.msk [vmem:[#allocation3 + $0x230] sm:$0xff] %vm1075_vm5, %v1669_v5  ;;  %v1858_v43 = vpop.permute.xlu0 %1857  ;;  %v2505_v4 = vpop.f32.mrb[2].mxu1  ;;  %v5748_v25 = vpack.c.bf16 %v4435_v60, %v4434_v18  ;;  %v5757_v15 = vpack.c.bf16 %v4441_v3, %v4440_v45  ;;  %v2259_v60 = vld [vmem:[#allocation3 + $0x1e0] sm:$0xff] }
 0x278   : > { %v2884_v59 = vmul.f32 0.01, %v2726_v53  ;;  %1932 = vst.msk [vmem:[#allocation3 + $0x200] sm:$0xff] %vm1268_vm6, %v1858_v43  ;;  %v2506_v28 = vadd.f32 %v7348_v40, %v2505_v4  ;;  %v2507_v34 = vpop.f32.mrb[3].mxu1  ;;  %1427 = vrot.lane.b32.xlu1 %v7251_v31, %s5941_s23  ;;  %2594 = vmatmul.mubr.f32.gmra.mrb[38].mxu1 %v2256_v0  ;;  %v4436_v31 = vld [vmem:[%s8651_s5 + $0x80] sm:$0xff] }
 0x279   : > { %2124 = vst.msk [vmem:[#allocation3 + $0x200] sm:$0xff] %vm1461_vm7, %v2050_v49  ;;  %5749 = vmatpush1.bf16.msra.mxu0 %v5748_v25  ;;  %v3236_v49 = vld [vmem:[#allocation2 + $0x9] sm:$0xff] }
 0x27a   : > { %v2916_v63 = vmax.f32 %v2726_v53, %v2884_v59  ;;  %v2731_v35 = vadd.f32 %v7026_v14, %v2506_v28  ;;  %v1856_v39 = vpop.permute.xlu1 %1855  ;;  %5750 = vmatprep.subr.bf16.mxu0 %v5940_v50  ;;  %v5751_v14 = vpack.c.bf16 %v4437_v42, %v4436_v31  ;;  %v4442_v28 = vld [vmem:[%s8651_s5 + $0xb0] sm:$0xff]  ;;  %v4445_v31 = vld [vmem:[%s8651_s5 + $0xc8] sm:$0xff] }
 0x27b   : > { %1931 = vst.msk [vmem:[#allocation3 + $0x1e8] sm:$0xff] %vm1268_vm6, %v1856_v39  ;;  %v1667_v54 = vpop.permute.xlu0 %1666 }
 0x27c   : > { %2948 = vst.msk [vmem:[#allocation2 + $0x28] sm:$0xff] %vm342_vm2, %v2916_v63  ;;  %v2885_v23 = vmul.f32 0.01, %v2731_v35  ;;  %3108 = vrot.lane.b32.xlu1 %v3044_v51, %s5938_s24  ;;  %v5760_v51 = vpack.c.bf16 %v4443_v12, %v4442_v28  ;;  %v4450_v12 = vld [vmem:[%s8651_s5 + $0xf0] sm:$0xff] }
 0x27d   : > { %1740 = vst.msk [vmem:[#allocation3 + $0x218] sm:$0xff] %vm1075_vm5, %v1667_v54  ;;  %5752 = vmatpush1.bf16.msra.mxu0 %v5751_v14  ;;  %v4444_v54 = vld [vmem:[%s8651_s5 + $0xc0] sm:$0xff]  ;;  %v2262_v14 = vld [vmem:[#allocation3 + $0x1f8] sm:$0xff] }
 0x27e   : > { %v2917_v9 = vmax.f32 %v2731_v35, %v2885_v23  ;;  %v2048_v47 = vpop.permute.xlu1 %2047  ;;  %5753 = vmatprep.subr.bf16.mxu0 %v5940_v50 }
 0x27f   : > { %2123 = vst.msk [vmem:[#allocation3 + $0x1e8] sm:$0xff] %vm1461_vm7, %v2048_v47  ;;  %v1410_v32 = vpop.permute.xlu0 %1409 }
 0x280   : > { %2949 = vst.msk [vmem:[#allocation2 + $0x30] sm:$0xff] %vm342_vm2, %v2917_v9  ;;  %3300 = vrot.lane.b32.xlu1 %v3236_v49, %s5939_s25  ;;  %v2263_v34 = vld [vmem:[#allocation3 + $0x200] sm:$0xff]  ;;  %v5763_v49 = vpack.c.bf16 %v4445_v31, %v4444_v54 }
 0x281   : > { %1484 = vst.msk [vmem:[#allocation3 + $0x210] sm:$0xff] %vm1461_vm7, %v1410_v32  ;;  %5755 = vmatpush1.bf16.msra.mxu0 %v5754_v22  ;;  %v7432_v5 = vpop.f32.mrb[58].mxu0  ;;  %v4447_v22 = vld [vmem:[%s8651_s5 + $0xd8] sm:$0xff] }
 0x282   : > { %v1034_v55 = vpop.permute.xlu1 %1033  ;;  %5756 = vmatprep.subr.bf16.mxu0 %v5940_v50  ;;  %v7437_v18 = vpop.f32.mrb[59].mxu0 }
 0x283   : > { %1103 = vst.msk [vmem:[#allocation3 + $0x288] sm:$0xff] %vm1075_vm5, %v1034_v55  ;;  %v1032_v30 = vpop.permute.xlu0 %1031  ;;  %v3428_v52 = vld [vmem:[#allocation2 + $0x27] sm:$0xff] }
 0x284   : > { %v7416_v61 = vld [vmem:[#allocation2 + $0x28] sm:$0xff]  ;;  %1102 = vst.msk [vmem:[#allocation3 + $0x270] sm:$0xff] %vm1075_vm5, %v1032_v30  ;;  %3110 = vrot.lane.b32.xlu1 %v3045_v8, %s5938_s24  ;;  %v5766_v30 = vpack.c.bf16 %v4447_v22, %v4446_v41 }
 0x285   : > { %3652 = vst.msk [vmem:[#allocation3 + $0x8] sm:$0xff] %vm342_vm2, %v7416_v61  ;;  %3014 = vst.msk [vmem:[#allocation3 + $0x30] sm:$0xff] %vm342_vm2, %v3428_v52  ;;  %5758 = vmatpush1.bf16.msra.mxu0 %v5757_v15 }
 0x286   : > { %v1860_v44 = vpop.permute.xlu1 %1859  ;;  %v2260_v53 = vld [vmem:[#allocation3 + $0x1e8] sm:$0xff]  ;;  %5759 = vmatprep.subr.bf16.mxu0 %v5940_v50 }
 0x287   : > { %1933 = vst.msk [vmem:[#allocation3 + $0x218] sm:$0xff] %vm1268_vm6, %v1860_v44  ;;  %v1862_v43 = vpop.permute.xlu0 %1861  ;;  %2598 = vmatprep.mubr.f32.mxu1 %v2260_v53  ;;  %v7435_v4 = vld [vmem:[#allocation2 + $0x29] sm:$0xff]  ;;  %v7456_v39 = vld [vmem:[#allocation2 + $0x31] sm:$0xff]  ;;  %v4448_v53 = vld [vmem:[%s8651_s5 + $0xe0] sm:$0xff] }
 0x288   : > { %v3429_v0 = vld [vmem:[#allocation2 + $0x2f] sm:$0xff]  ;;  %1934 = vst.msk [vmem:[#allocation3 + $0x230] sm:$0xff] %vm1268_vm6, %v1862_v43  ;;  %3302 = vrot.lane.b32.xlu1 %v3237_v10, %s5939_s25  ;;  %3748 = vrot.lane.b32.xlu0 %v7435_v4, %s5938_s24 }
 0x289   : > { %v7443_v59 = vld [vmem:[#allocation2 + $0x30] sm:$0xff]  ;;  %3015 = vst.msk [vmem:[#allocation3 + $0x48] sm:$0xff] %vm342_vm2, %v3429_v0  ;;  %2599 = vmatmul.mubr.f32.gmra.mrb[40].mxu1 %v2259_v60  ;;  %5761 = vmatpush1.bf16.msra.mxu0 %v5760_v51 }
 0x28a   : > { %3653 = vst.msk [vmem:[#allocation3 + $0x20] sm:$0xff] %vm342_vm2, %v7443_v59  ;;  %2603 = vmatprep.mubr.f32.mxu1 %v2263_v34  ;;  %v2052_v25 = vpop.permute.xlu1 %2051  ;;  %5762 = vmatprep.subr.bf16.mxu0 %v5940_v50  ;;  %v2265_v44 = vld [vmem:[#allocation3 + $0x210] sm:$0xff] }
 0x28b   : > { %2125 = vst.msk [vmem:[#allocation3 + $0x218] sm:$0xff] %vm1461_vm7, %v2052_v25  ;;  %v1036_v63 = vpop.permute.xlu0 %1035  ;;  %v2510_v35 = vpop.f32.mrb[4].mxu1  ;;  %v4451_v25 = vld [vmem:[%s8651_s5 + $0xf8] sm:$0xff] }
 0x28c   : > { %1104 = vst.msk [vmem:[#allocation3 + $0x2a0] sm:$0xff] %vm1075_vm5, %v1036_v63  ;;  %v2511_v42 = vadd.f32 %v7348_v40, %v2510_v35  ;;  %3750 = vrot.lane.b32.xlu0 %v7456_v39, %s5938_s24  ;;  %3492 = vrot.lane.b32.xlu1 %v3428_v52, %s5941_s23  ;;  %v2512_v23 = vpop.f32.mrb[5].mxu1 }
 0x28d   : > { %2604 = vmatmul.mubr.f32.gmra.mrb[42].mxu1 %v2262_v14  ;;  %5764 = vmatpush1.bf16.msra.mxu0 %v5763_v49 }
 0x28e   : > { %v2736_v9 = vadd.f32 %v7038_v1, %v2511_v42  ;;  %v1038_v47 = vpop.permute.xlu1 %1037  ;;  %5765 = vmatprep.subr.bf16.mxu0 %v5940_v50 }
 0x28f   : > { %1105 = vst.msk [vmem:[#allocation3 + $0x2b8] sm:$0xff] %vm1075_vm5, %v1038_v47  ;;  %v1040_v32 = vpop.permute.xlu0 %1039  ;;  %v2515_v58 = vpop.f32.mrb[6].mxu1 }
 0x290   : > { %v2886_v8 = vmul.f32 0.01, %v2736_v9  ;;  %1106 = vst.msk [vmem:[#allocation3 + $0x2d0] sm:$0xff] %vm1075_vm5, %v1040_v32  ;;  %v2516_v1 = vadd.f32 %v7348_v40, %v2515_v58  ;;  %3112 = vrot.lane.b32.xlu1 %v7416_v61, %s5938_s24  ;;  %v2517_v55 = vpop.f32.mrb[7].mxu1  ;;  %v4449_v61 = vld [vmem:[%s8651_s5 + $0xe8] sm:$0xff] }
 0x291   : > { %5767 = vmatpush1.bf16.msra.mxu0 %v5766_v30  ;;  %v5769_v43 = vpack.c.bf16 %v4449_v61, %v4448_v53 }
 0x292   : > { %v2918_v52 = vmax.f32 %v2736_v9, %v2886_v8  ;;  %v2741_v45 = vadd.f32 %v7036_v48, %v2516_v1  ;;  %v1042_v3 = vpop.permute.xlu1 %1041  ;;  %v2266_v10 = vld [vmem:[#allocation3 + $0x218] sm:$0xff]  ;;  %5768 = vmatprep.subr.bf16.mxu0 %v5940_v50 }
 0x293   : > { %1107 = vst.msk [vmem:[#allocation3 + $0x2e8] sm:$0xff] %vm1075_vm5, %v1042_v3  ;;  %v2054_v15 = vpop.permute.xlu0 %2053  ;;  %2608 = vmatprep.mubr.f32.mxu1 %v2266_v10 }
 0x294   : > { %2950 = vst.msk [vmem:[#allocation2 + $0x48] sm:$0xff] %vm342_vm2, %v2918_v52  ;;  %v2887_v48 = vmul.f32 0.01, %v2741_v45  ;;  %3494 = vrot.lane.b32.xlu1 %v3429_v0, %s5941_s23  ;;  %2609 = vmatmul.mubr.f32.gmra.mrb[44].mxu1 %v2265_v44  ;;  %v5772_v0 = vpack.c.bf16 %v4451_v25, %v4450_v12 }
 0x295   : > { %2126 = vst.msk [vmem:[#allocation3 + $0x230] sm:$0xff] %vm1461_vm7, %v2054_v15  ;;  %5770 = vmatpush1.bf16.msra.mxu0 %v5769_v43 }
 0x296   : > { %v2919_v60 = vmax.f32 %v2741_v45, %v2887_v48  ;;  %v1219_v28 = vpop.permute.xlu1 %1218  ;;  %5771 = vmatprep.subr.bf16.mxu0 %v5940_v50 }
 0x297   : > { %1292 = vst.msk [vmem:[#allocation3 + $0x228] sm:$0xff] %vm1268_vm6, %v1219_v28  ;;  %v1671_v34 = vpop.permute.xlu0 %1670 }
 0x298   : > { %2951 = vst.msk [vmem:[#allocation2 + $0x50] sm:$0xff] %vm342_vm2, %v2919_v60  ;;  %3304 = vrot.lane.b32.xlu1 %v7435_v4, %s5939_s25 }
 0x299   : > { %1742 = vst.msk [vmem:[#allocation3 + $0x248] sm:$0xff] %vm1075_vm5, %v1671_v34  ;;  %5773 = vmatpush1.bf16.msra.mxu0 %v5772_v0 }
 0x29a   : > { %v1412_v51 = vpop.permute.xlu1 %1411 }
 0x29b   : > { %1485 = vst.msk [vmem:[#allocation3 + $0x228] sm:$0xff] %vm1461_vm7, %v1412_v51  ;;  %v1221_v63 = vpop.permute.xlu0 %1220  ;;  %v3876_v54 = vld [vmem:[#allocation2 + $0x47] sm:$0xff] }
 0x29c   : > { %v2269_v35 = vld [vmem:[#allocation3 + $0x230] sm:$0xff]  ;;  %1293 = vst.msk [vmem:[#allocation3 + $0x240] sm:$0xff] %vm1268_vm6, %v1221_v63  ;;  %3114 = vrot.lane.b32.xlu1 %v7443_v59, %s5938_s24  ;;  %v2984_v31 = vld [vmem:[#allocation2 + $0x47] sm:$0xff]  ;;  %3940 = vrot.lane.b32.xlu0 %v3876_v54, %s5939_s25 }
 0x29d   : > { %2613 = vmatprep.mubr.f32.mxu1 %v2269_v35  ;;  %v3622_v42 = vld [vmem:[#allocation2 + $0x48] sm:$0xff]  ;;  %3016 = vst.msk [vmem:[#allocation3 + $0x60] sm:$0xff] %vm342_vm2, %v2984_v31 }
 0x29e   : > { %3654 = vst.msk [vmem:[#allocation3 + $0x38] sm:$0xff] %vm342_vm2, %v3622_v42  ;;  %v1864_v50 = vpop.permute.xlu1 %1863  ;;  %v4068_v23 = vld [vmem:[#allocation2 + $0x48] sm:$0xff] }
 0x29f   : > { %1935 = vst.msk [vmem:[#allocation3 + $0x248] sm:$0xff] %vm1268_vm6, %v1864_v50  ;;  %v1414_v4 = vpop.permute.xlu0 %1413  ;;  %v3686_v14 = vld [vmem:[#allocation2 + $0x49] sm:$0xff]  ;;  %v7518_v59 = vld [vmem:[#allocation2 + $0x51] sm:$0xff] }
 0x2a0   : > { %1486 = vst.msk [vmem:[#allocation3 + $0x240] sm:$0xff] %vm1461_vm7, %v1414_v4  ;;  %3306 = vrot.lane.b32.xlu1 %v7456_v39, %s5939_s25  ;;  %v3623_v49 = vld [vmem:[#allocation2 + $0x50] sm:$0xff]  ;;  %4132 = vrot.lane.b32.xlu0 %v4068_v23, %s5941_s23 }
 0x2a1   : > { %4292 = vst.msk [vmem:[#allocation3 + $0x10] sm:$0xff] %vm342_vm2, %v3686_v14  ;;  %v2985_v9 = vld [vmem:[#allocation2 + $0x4f] sm:$0xff]  ;;  %4293 = vst.msk [vmem:[#allocation3 + $0x28] sm:$0xff] %vm342_vm2, %v7518_v59 }
 0x2a2   : > { %3655 = vst.msk [vmem:[#allocation3 + $0x50] sm:$0xff] %vm342_vm2, %v3623_v49  ;;  %3017 = vst.msk [vmem:[#allocation3 + $0x78] sm:$0xff] %vm342_vm2, %v2985_v9  ;;  %v2056_v47 = vpop.permute.xlu1 %2055  ;;  %v2268_v32 = vld [vmem:[#allocation3 + $0x228] sm:$0xff]  ;;  %v4069_v15 = vld [vmem:[#allocation2 + $0x50] sm:$0xff] }
 0x2a3   : > { %2127 = vst.msk [vmem:[#allocation3 + $0x248] sm:$0xff] %vm1461_vm7, %v2056_v47  ;;  %v1866_v39 = vpop.permute.xlu0 %1865  ;;  %v2520_v58 = vpop.f32.mrb[8].mxu1  ;;  %2614 = vmatmul.mubr.f32.gmra.mrb[46].mxu1 %v2268_v32  ;;  %v3877_v8 = vld [vmem:[#allocation2 + $0x4f] sm:$0xff] }
 0x2a4   : > { %v2521_v41 = vadd.f32 %v7348_v40, %v2520_v58  ;;  %v2522_v22 = vpop.f32.mrb[9].mxu1  ;;  %3496 = vrot.lane.b32.xlu1 %v3876_v54, %s5941_s23  ;;  %3942 = vrot.lane.b32.xlu0 %v3877_v8, %s5939_s25 }
 0x2a6   : > { %v2746_v1 = vadd.f32 %v7051_v57, %v2521_v41  ;;  %v1673_v55 = vpop.permute.xlu1 %1672 }
 0x2a7   : > { %1743 = vst.msk [vmem:[#allocation3 + $0x260] sm:$0xff] %vm1075_vm5, %v1673_v55  ;;  %v2058_v30 = vpop.permute.xlu0 %2057  ;;  %v2525_v52 = vpop.f32.mrb[10].mxu1  ;;  %v2271_v43 = vld [vmem:[#allocation3 + $0x240] sm:$0xff] }
 0x2a8   : > { %v2888_v45 = vmul.f32 0.01, %v2746_v1  ;;  %1936 = vst.msk [vmem:[#allocation3 + $0x260] sm:$0xff] %vm1268_vm6, %v1866_v39  ;;  %v2526_v3 = vadd.f32 %v7348_v40, %v2525_v52  ;;  %v2527_v10 = vpop.f32.mrb[11].mxu1  ;;  %3116 = vrot.lane.b32.xlu1 %v4068_v23, %s5938_s24  ;;  %4134 = vrot.lane.b32.xlu0 %v4069_v15, %s5941_s23 }
 0x2a9   : > { %2128 = vst.msk [vmem:[#allocation3 + $0x260] sm:$0xff] %vm1461_vm7, %v2058_v30 }
 0x2aa   : > { %v2920_v44 = vmax.f32 %v2746_v1, %v2888_v45  ;;  %v2751_v57 = vadd.f32 %v7047_v62, %v2526_v3  ;;  %v1223_v53 = vpop.permute.xlu1 %1222  ;;  %v2272_v61 = vld [vmem:[#allocation3 + $0x248] sm:$0xff] }
 0x2ab   : > { %1294 = vst.msk [vmem:[#allocation3 + $0x258] sm:$0xff] %vm1268_vm6, %v1223_v53  ;;  %v1675_v48 = vpop.permute.xlu0 %1674  ;;  %2618 = vmatprep.mubr.f32.mxu1 %v2272_v61 }
 0x2ac   : > { %2952 = vst.msk [vmem:[#allocation2 + $0x68] sm:$0xff] %vm342_vm2, %v2920_v44  ;;  %v2889_v60 = vmul.f32 0.01, %v2751_v57  ;;  %2619 = vmatmul.mubr.f32.gmra.mrb[48].mxu1 %v2271_v43  ;;  %3498 = vrot.lane.b32.xlu1 %v3877_v8, %s5941_s23 }
 0x2ad   : > { %1744 = vst.msk [vmem:[#allocation3 + $0x278] sm:$0xff] %vm1075_vm5, %v1675_v48  ;;  %3752 = vrot.lane.b32.xlu0 %v3686_v14, %s5938_s24  ;;  %v7584_v48 = vpop.f32.mrb[60].mxu0 }
 0x2ae   : > { %v2921_v28 = vmax.f32 %v2751_v57, %v2889_v60  ;;  %v1416_v34 = vpop.permute.xlu1 %1415 }
 0x2af   : > { %1487 = vst.msk [vmem:[#allocation3 + $0x258] sm:$0xff] %vm1461_vm7, %v1416_v34  ;;  %v1225_v62 = vpop.permute.xlu0 %1224 }
 0x2b0   : > { %2953 = vst.msk [vmem:[#allocation2 + $0x70] sm:$0xff] %vm342_vm2, %v2921_v28  ;;  %3308 = vrot.lane.b32.xlu1 %v3686_v14, %s5939_s25  ;;  %v2275_v12 = vld [vmem:[#allocation3 + $0x260] sm:$0xff] }
 0x2b1   : > { %1295 = vst.msk [vmem:[#allocation3 + $0x270] sm:$0xff] %vm1268_vm6, %v1225_v62  ;;  %3754 = vrot.lane.b32.xlu0 %v7518_v59, %s5938_s24  ;;  %2623 = vmatprep.mubr.f32.mxu1 %v2275_v12 }
 0x2b2   : > { %v1868_v25 = vpop.permute.xlu1 %1867 }
 0x2b3   : > { %1937 = vst.msk [vmem:[#allocation3 + $0x278] sm:$0xff] %vm1268_vm6, %v1868_v25  ;;  %v1418_v0 = vpop.permute.xlu0 %1417  ;;  %v3878_v51 = vld [vmem:[#allocation2 + $0x67] sm:$0xff] }
 0x2b4   : > { %v2986_v63 = vld [vmem:[#allocation2 + $0x67] sm:$0xff]  ;;  %1488 = vst.msk [vmem:[#allocation3 + $0x270] sm:$0xff] %vm1461_vm7, %v1418_v0  ;;  %3118 = vrot.lane.b32.xlu1 %v4069_v15, %s5938_s24 }
 0x2b5   : > { %3018 = vst.msk [vmem:[#allocation3 + $0x90] sm:$0xff] %vm342_vm2, %v2986_v63  ;;  %v3624_v35 = vld [vmem:[#allocation2 + $0x68] sm:$0xff]  ;;  %3944 = vrot.lane.b32.xlu0 %v3878_v51, %s5939_s25 }
 0x2b6   : > { %3656 = vst.msk [vmem:[#allocation3 + $0x68] sm:$0xff] %vm342_vm2, %v3624_v35  ;;  %v2060_v54 = vpop.permute.xlu1 %2059  ;;  %v2274_v31 = vld [vmem:[#allocation3 + $0x258] sm:$0xff]  ;;  %v4070_v50 = vld [vmem:[#allocation2 + $0x68] sm:$0xff] }
 0x2b7   : > { %2129 = vst.msk [vmem:[#allocation3 + $0x278] sm:$0xff] %vm1461_vm7, %v2060_v54  ;;  %v1870_v42 = vpop.permute.xlu0 %1869  ;;  %2624 = vmatmul.mubr.f32.gmra.mrb[50].mxu1 %v2274_v31  ;;  %v3688_v4 = vld [vmem:[#allocation2 + $0x69] sm:$0xff]  ;;  %v7558_v23 = vld [vmem:[#allocation2 + $0x71] sm:$0xff] }
 0x2b8   : > { %3310 = vrot.lane.b32.xlu1 %v7518_v59, %s5939_s25  ;;  %4294 = vst.msk [vmem:[#allocation3 + $0x40] sm:$0xff] %vm342_vm2, %v3688_v4  ;;  %v3625_v14 = vld [vmem:[#allocation2 + $0x70] sm:$0xff]  ;;  %4295 = vst.msk [vmem:[#allocation3 + $0x58] sm:$0xff] %vm342_vm2, %v7558_v23 }
 0x2b9   : > { %v2987_v49 = vld [vmem:[#allocation2 + $0x6f] sm:$0xff]  ;;  %4136 = vrot.lane.b32.xlu0 %v4070_v50, %s5941_s23  ;;  %3657 = vst.msk [vmem:[#allocation3 + $0x80] sm:$0xff] %vm342_vm2, %v3625_v14 }
 0x2ba   : > { %3019 = vst.msk [vmem:[#allocation3 + $0xa8] sm:$0xff] %vm342_vm2, %v2987_v49  ;;  %v1677_v9 = vpop.permute.xlu1 %1676  ;;  %v3879_v58 = vld [vmem:[#allocation2 + $0x6f] sm:$0xff] }
 0x2bb   : > { %1745 = vst.msk [vmem:[#allocation3 + $0x290] sm:$0xff] %vm1075_vm5, %v1677_v9  ;;  %v2062_v47 = vpop.permute.xlu0 %2061  ;;  %v2530_v59 = vpop.f32.mrb[12].mxu1  ;;  %v2277_v30 = vld [vmem:[#allocation3 + $0x270] sm:$0xff] }
 0x2bc   : > { %1938 = vst.msk [vmem:[#allocation3 + $0x290] sm:$0xff] %vm1268_vm6, %v1870_v42  ;;  %v2531_v32 = vadd.f32 %v7348_v40, %v2530_v59  ;;  %v2532_v39 = vpop.f32.mrb[13].mxu1  ;;  %3500 = vrot.lane.b32.xlu1 %v3878_v51, %s5941_s23  ;;  %v4071_v10 = vld [vmem:[#allocation2 + $0x70] sm:$0xff] }
 0x2bd   : > { %2130 = vst.msk [vmem:[#allocation3 + $0x290] sm:$0xff] %vm1461_vm7, %v2062_v47  ;;  %3946 = vrot.lane.b32.xlu0 %v3879_v58, %s5939_s25 }
 0x2be   : > { %v2756_v41 = vadd.f32 %v7063_v26, %v2531_v32  ;;  %v1227_v22 = vpop.permute.xlu1 %1226  ;;  %v2278_v8 = vld [vmem:[#allocation3 + $0x278] sm:$0xff] }
 0x2bf   : > { %1296 = vst.msk [vmem:[#allocation3 + $0x288] sm:$0xff] %vm1268_vm6, %v1227_v22  ;;  %v1679_v1 = vpop.permute.xlu0 %1678  ;;  %v2535_v55 = vpop.f32.mrb[14].mxu1  ;;  %2628 = vmatprep.mubr.f32.mxu1 %v2278_v8 }
 0x2c0   : > { %v2890_v52 = vmul.f32 0.01, %v2756_v41  ;;  %1746 = vst.msk [vmem:[#allocation3 + $0x2a8] sm:$0xff] %vm1075_vm5, %v1679_v1  ;;  %v2536_v45 = vadd.f32 %v7348_v40, %v2535_v55  ;;  %v2537_v3 = vpop.f32.mrb[15].mxu1  ;;  %2629 = vmatmul.mubr.f32.gmra.mrb[52].mxu1 %v2277_v30  ;;  %3120 = vrot.lane.b32.xlu1 %v4070_v50, %s5938_s24 }
 0x2c1   : > { %4138 = vrot.lane.b32.xlu0 %v4071_v10, %s5941_s23 }
 0x2c2   : > { %v2922_v26 = vmax.f32 %v2756_v41, %v2890_v52  ;;  %v2761_v15 = vadd.f32 %v7061_v20, %v2536_v45  ;;  %v1420_v44 = vpop.permute.xlu1 %1419  ;;  %v7586_v20 = vpop.f32.mrb[61].mxu0 }
 0x2c3   : > { %1489 = vst.msk [vmem:[#allocation3 + $0x288] sm:$0xff] %vm1461_vm7, %v1420_v44  ;;  %v1229_v57 = vpop.permute.xlu0 %1228 }
 0x2c4   : > { %2954 = vst.msk [vmem:[#allocation2 + $0x88] sm:$0xff] %vm342_vm2, %v2922_v26  ;;  %v2891_v53 = vmul.f32 0.01, %v2761_v15  ;;  %3502 = vrot.lane.b32.xlu1 %v3879_v58, %s5941_s23  ;;  %v2281_v61 = vld [vmem:[#allocation3 + $0x290] sm:$0xff] }
 0x2c5   : > { %1297 = vst.msk [vmem:[#allocation3 + $0x2a0] sm:$0xff] %vm1268_vm6, %v1229_v57  ;;  %3756 = vrot.lane.b32.xlu0 %v3688_v4, %s5938_s24  ;;  %2633 = vmatprep.mubr.f32.mxu1 %v2281_v61 }
 0x2c6   : > { %v2923_v43 = vmax.f32 %v2761_v15, %v2891_v53  ;;  %v1872_v60 = vpop.permute.xlu1 %1871 }
 0x2c7   : > { %1939 = vst.msk [vmem:[#allocation3 + $0x2a8] sm:$0xff] %vm1268_vm6, %v1872_v60  ;;  %v1422_v28 = vpop.permute.xlu0 %1421 }
 0x2c8   : > { %2955 = vst.msk [vmem:[#allocation2 + $0x90] sm:$0xff] %vm342_vm2, %v2923_v43  ;;  %3312 = vrot.lane.b32.xlu1 %v3688_v4, %s5939_s25 }
 0x2c9   : > { %1490 = vst.msk [vmem:[#allocation3 + $0x2a0] sm:$0xff] %vm1461_vm7, %v1422_v28  ;;  %3758 = vrot.lane.b32.xlu0 %v7558_v23, %s5938_s24 }
 0x2ca   : > { %v2064_v34 = vpop.permute.xlu1 %2063  ;;  %v2280_v62 = vld [vmem:[#allocation3 + $0x288] sm:$0xff] }
 0x2cb   : > { %2131 = vst.msk [vmem:[#allocation3 + $0x2a8] sm:$0xff] %vm1461_vm7, %v2064_v34  ;;  %v1874_v12 = vpop.permute.xlu0 %1873  ;;  %2634 = vmatmul.mubr.f32.gmra.mrb[54].mxu1 %v2280_v62  ;;  %v3880_v25 = vld [vmem:[#allocation2 + $0x87] sm:$0xff] }
 0x2cc   : > { %v2988_v0 = vld [vmem:[#allocation2 + $0x87] sm:$0xff]  ;;  %3122 = vrot.lane.b32.xlu1 %v4071_v10, %s5938_s24 }
 0x2cd   : > { %3020 = vst.msk [vmem:[#allocation3 + $0xc0] sm:$0xff] %vm342_vm2, %v2988_v0  ;;  %v3626_v51 = vld [vmem:[#allocation2 + $0x88] sm:$0xff]  ;;  %3948 = vrot.lane.b32.xlu0 %v3880_v25, %s5939_s25 }
 0x2ce   : > { %3658 = vst.msk [vmem:[#allocation3 + $0x98] sm:$0xff] %vm342_vm2, %v3626_v51  ;;  %v1681_v63 = vpop.permute.xlu1 %1680  ;;  %v4072_v54 = vld [vmem:[#allocation2 + $0x88] sm:$0xff] }
 0x2cf   : > { %1747 = vst.msk [vmem:[#allocation3 + $0x2c0] sm:$0xff] %vm1075_vm5, %v1681_v63  ;;  %v2066_v35 = vpop.permute.xlu0 %2065  ;;  %v3690_v31 = vld [vmem:[#allocation2 + $0x89] sm:$0xff]  ;;  %v7603_v42 = vld [vmem:[#allocation2 + $0x91] sm:$0xff] }
 0x2d0   : > { %1940 = vst.msk [vmem:[#allocation3 + $0x2c0] sm:$0xff] %vm1268_vm6, %v1874_v12  ;;  %3314 = vrot.lane.b32.xlu1 %v7558_v23, %s5939_s25  ;;  %v3627_v50 = vld [vmem:[#allocation2 + $0x90] sm:$0xff]  ;;  %v2283_v47 = vld [vmem:[#allocation3 + $0x2a0] sm:$0xff] }
 0x2d1   : > { %2132 = vst.msk [vmem:[#allocation3 + $0x2c0] sm:$0xff] %vm1461_vm7, %v2066_v35  ;;  %4140 = vrot.lane.b32.xlu0 %v4072_v54, %s5941_s23  ;;  %v2989_v4 = vld [vmem:[#allocation2 + $0x8f] sm:$0xff] }
 0x2d2   : > { %4296 = vst.msk [vmem:[#allocation3 + $0x70] sm:$0xff] %vm342_vm2, %v3690_v31  ;;  %4297 = vst.msk [vmem:[#allocation3 + $0x88] sm:$0xff] %vm342_vm2, %v7603_v42  ;;  %v1231_v14 = vpop.permute.xlu1 %1230  ;;  %v2284_v49 = vld [vmem:[#allocation3 + $0x2a8] sm:$0xff]  ;;  %v4073_v52 = vld [vmem:[#allocation2 + $0x90] sm:$0xff] }
 0x2d3   : > { %3659 = vst.msk [vmem:[#allocation3 + $0xb0] sm:$0xff] %vm342_vm2, %v3627_v50  ;;  %3021 = vst.msk [vmem:[#allocation3 + $0xd8] sm:$0xff] %vm342_vm2, %v2989_v4  ;;  %v1683_v23 = vpop.permute.xlu0 %1682  ;;  %v2540_v9 = vpop.f32.mrb[16].mxu1  ;;  %2638 = vmatprep.mubr.f32.mxu1 %v2284_v49  ;;  %v3881_v39 = vld [vmem:[#allocation2 + $0x8f] sm:$0xff] }
 0x2d4   : > { %1298 = vst.msk [vmem:[#allocation3 + $0x2b8] sm:$0xff] %vm1268_vm6, %v1231_v14  ;;  %v2541_v59 = vadd.f32 %v7348_v40, %v2540_v9  ;;  %v2542_v32 = vpop.f32.mrb[17].mxu1  ;;  %2639 = vmatmul.mubr.f32.gmra.mrb[56].mxu1 %v2283_v47  ;;  %3504 = vrot.lane.b32.xlu1 %v3880_v25, %s5941_s23 }
 0x2d5   : > { %1748 = vst.msk [vmem:[#allocation3 + $0x2d8] sm:$0xff] %vm1075_vm5, %v1683_v23  ;;  %3950 = vrot.lane.b32.xlu0 %v3881_v39, %s5939_s25 }
 0x2d6   : > { %v2766_v58 = vadd.f32 %v7074_v36, %v2541_v59  ;;  %v1424_v41 = vpop.permute.xlu1 %1423 }
 0x2d7   : > { %1491 = vst.msk [vmem:[#allocation3 + $0x2b8] sm:$0xff] %vm1461_vm7, %v1424_v41  ;;  %v1233_v22 = vpop.permute.xlu0 %1232  ;;  %v2545_v8 = vpop.f32.mrb[18].mxu1 }
 0x2d8   : > { %v2892_v1 = vmul.f32 0.01, %v2766_v58  ;;  %1299 = vst.msk [vmem:[#allocation3 + $0x2d0] sm:$0xff] %vm1268_vm6, %v1233_v22  ;;  %v2546_v55 = vadd.f32 %v7348_v40, %v2545_v8  ;;  %v2547_v30 = vpop.f32.mrb[19].mxu1  ;;  %3124 = vrot.lane.b32.xlu1 %v4072_v54, %s5938_s24  ;;  %v2287_v45 = vld [vmem:[#allocation3 + $0x2c0] sm:$0xff] }
 0x2d9   : > { %4142 = vrot.lane.b32.xlu0 %v4073_v52, %s5941_s23  ;;  %2643 = vmatprep.mubr.f32.mxu1 %v2287_v45 }
 0x2da   : > { %v2924_v3 = vmax.f32 %v2766_v58, %v2892_v1  ;;  %v2771_v36 = vadd.f32 %v7072_v13, %v2546_v55  ;;  %v1876_v10 = vpop.permute.xlu1 %1875 }
 0x2db   : > { %1941 = vst.msk [vmem:[#allocation3 + $0x2d8] sm:$0xff] %vm1268_vm6, %v1876_v10  ;;  %v1426_v26 = vpop.permute.xlu0 %1425  ;;  %v4338_v10 = vld [vmem:[#allocation3 + $0x70] sm:$0xff] }
 0x2dc   : > { %2956 = vst.msk [vmem:[#allocation2 + $0xa8] sm:$0xff] %vm342_vm2, %v2924_v3  ;;  %v2893_v15 = vmul.f32 0.01, %v2771_v36  ;;  %3506 = vrot.lane.b32.xlu1 %v3881_v39, %s5941_s23 }
 0x2dd   : > { %1492 = vst.msk [vmem:[#allocation3 + $0x2d0] sm:$0xff] %vm1461_vm7, %v1426_v26  ;;  %3760 = vrot.lane.b32.xlu0 %v3690_v31, %s5938_s24 }
 0x2de   : > { %v2925_v44 = vmax.f32 %v2771_v36, %v2893_v15  ;;  %v2068_v57 = vpop.permute.xlu1 %2067  ;;  %v2286_v53 = vld [vmem:[#allocation3 + $0x2b8] sm:$0xff] }
 0x2df   : > { %2133 = vst.msk [vmem:[#allocation3 + $0x2d8] sm:$0xff] %vm1461_vm7, %v2068_v57  ;;  %2644 = vmatmul.mubr.f32.gmra.mrb[58].mxu1 %v2286_v53  ;;  %v1878_v13 = vpop.permute.xlu0 %1877  ;;  %v4335_v36 = vld [vmem:[#allocation3 + $0x58] sm:$0xff]  ;;  %v4341_v53 = vld [vmem:[#allocation3 + $0x88] sm:$0xff] }
 0x2e0   : > { %2957 = vst.msk [vmem:[#allocation2 + $0xb0] sm:$0xff] %vm342_vm2, %v2925_v44  ;;  %3316 = vrot.lane.b32.xlu1 %v3690_v31, %s5939_s25 }
 0x2e1   : > { %3762 = vrot.lane.b32.xlu0 %v7603_v42, %s5938_s24 }
 0x2e2   : > { %v1685_v61 = vpop.permute.xlu1 %1684 }
 0x2e3   : > { %1749 = vst.msk [vmem:[#allocation3 + $0x2f0] sm:$0xff] %vm1075_vm5, %v1685_v61  ;;  %v3882_v43 = vld [vmem:[#allocation2 + $0xa7] sm:$0xff]  ;;  %v2070_v60 = vpop.permute.xlu0 %2069 }
 0x2e4   : > { %3126 = vrot.lane.b32.xlu1 %v4073_v52, %s5938_s24  ;;  %1942 = vst.msk [vmem:[#allocation3 + $0x2f0] sm:$0xff] %vm1268_vm6, %v1878_v13  ;;  %v2990_v28 = vld [vmem:[#allocation2 + $0xa7] sm:$0xff]  ;;  %v2289_v25 = vld [vmem:[#allocation3 + $0x2d0] sm:$0xff] }
 0x2e5   : > { %v3628_v34 = vld [vmem:[#allocation2 + $0xa8] sm:$0xff]  ;;  %3952 = vrot.lane.b32.xlu0 %v3882_v43, %s5939_s25  ;;  %2134 = vst.msk [vmem:[#allocation3 + $0x2f0] sm:$0xff] %vm1461_vm7, %v2070_v60 }
 0x2e6   : > { %3022 = vst.msk [vmem:[#allocation3 + $0xf0] sm:$0xff] %vm342_vm2, %v2990_v28  ;;  %3660 = vst.msk [vmem:[#allocation3 + $0xc8] sm:$0xff] %vm342_vm2, %v3628_v34  ;;  %v1235_v62 = vpop.permute.xlu1 %1234  ;;  %v2290_v12 = vld [vmem:[#allocation3 + $0x2d8] sm:$0xff]  ;;  %v4074_v0 = vld [vmem:[#allocation2 + $0xa8] sm:$0xff] }
 0x2e7   : > { %1300 = vst.msk [vmem:[#allocation3 + $0x2e8] sm:$0xff] %vm1268_vm6, %v1235_v62  ;;  %2648 = vmatprep.mubr.f32.mxu1 %v2290_v12  ;;  %v3692_v51 = vld [vmem:[#allocation2 + $0xa9] sm:$0xff]  ;;  %v7644_v63 = vld [vmem:[#allocation2 + $0xb1] sm:$0xff] }
 0x2e8   : > { %2649 = vmatmul.mubr.f32.gmra.mrb[60].mxu1 %v2289_v25  ;;  %3318 = vrot.lane.b32.xlu1 %v7603_v42, %s5939_s25  ;;  %4298 = vst.msk [vmem:[#allocation3 + $0xa0] sm:$0xff] %vm342_vm2, %v3692_v51  ;;  %v3629_v35 = vld [vmem:[#allocation2 + $0xb0] sm:$0xff]  ;;  %4299 = vst.msk [vmem:[#allocation3 + $0xb8] sm:$0xff] %vm342_vm2, %v7644_v63  ;;  %v4329_v52 = vld [vmem:[#allocation3 + $0x28] sm:$0xff] }
 0x2e9   : > { %v2991_v54 = vld [vmem:[#allocation2 + $0xaf] sm:$0xff]  ;;  %4144 = vrot.lane.b32.xlu0 %v4074_v0, %s5941_s23  ;;  %3661 = vst.msk [vmem:[#allocation3 + $0xe0] sm:$0xff] %vm342_vm2, %v3629_v35  ;;  %v7698_v25 = vld [vmem:[%s8650_s4] ss:$0 sm:$0xff] }
 0x2ea   : > { %3023 = vst.msk [vmem:[#allocation3 + $0x108] sm:$0xff] %vm342_vm2, %v2991_v54  ;;  %v1428_v31 = vpop.permute.xlu1 %1427  ;;  %v3883_v14 = vld [vmem:[#allocation2 + $0xaf] sm:$0xff] }
 0x2eb   : > { %1493 = vst.msk [vmem:[#allocation3 + $0x2e8] sm:$0xff] %vm1461_vm7, %v1428_v31  ;;  %v2550_v50 = vpop.f32.mrb[20].mxu1  ;;  %v4075_v58 = vld [vmem:[#allocation2 + $0xb0] sm:$0xff] }
 0x2ec   : > { %v2551_v42 = vadd.f32 %v7348_v40, %v2550_v50  ;;  %v2552_v4 = vpop.f32.mrb[21].mxu1  ;;  %3508 = vrot.lane.b32.xlu1 %v3882_v43, %s5941_s23  ;;  %v2293_v49 = vld [vmem:[#allocation3 + $0x2f0] sm:$0xff] }
 0x2ed   : > { %3954 = vrot.lane.b32.xlu0 %v3883_v14, %s5939_s25  ;;  %2653 = vmatprep.mubr.f32.mxu1 %v2293_v49 }
 0x2ee   : > { %v2776_v23 = vadd.f32 %v7085_v2, %v2551_v42  ;;  %v3109_v9 = vpop.permute.xlu1 %3108  ;;  %v4326_v2 = vld [vmem:[#allocation3 + $0x10] sm:$0xff] }
 0x2ef   : > { %3204 = vst.msk [vmem:[#allocation3] sm:$0xff] %vm1075_vm5, %v3109_v9  ;;  %v2555_v47 = vpop.f32.mrb[22].mxu1  ;;  %v4344_v13 = vld [vmem:[#allocation3 + $0xa0] sm:$0xff]  ;;  %v4347_v62 = vld [vmem:[#allocation3 + $0xb8] sm:$0xff] }
 0x2f0   : > { %v2894_v59 = vmul.f32 0.01, %v2776_v23  ;;  %v2556_v32 = vadd.f32 %v7348_v40, %v2555_v47  ;;  %v2557_v39 = vpop.f32.mrb[23].mxu1  ;;  %3128 = vrot.lane.b32.xlu1 %v4074_v0, %s5938_s24 }
 0x2f1   : > { %4146 = vrot.lane.b32.xlu0 %v4075_v58, %s5941_s23 }
 0x2f2   : > { %v2926_v41 = vmax.f32 %v2776_v23, %v2894_v59  ;;  %v2781_v22 = vadd.f32 %v7083_v7, %v2556_v32  ;;  %v3301_v8 = vpop.permute.xlu1 %3300  ;;  %v2292_v1 = vld [vmem:[#allocation3 + $0x2e8] sm:$0xff]  ;;  %v4332_v7 = vld [vmem:[#allocation3 + $0x40] sm:$0xff] }
 0x2f3   : > { %3396 = vst.msk [vmem:[#allocation3] sm:$0xff] %vm1268_vm6, %v3301_v8  ;;  %2654 = vmatmul.mubr.f32.gmra.mrb[62].mxu1 %v2292_v1 }
 0x2f4   : > { %2958 = vst.msk [vmem:[#allocation2 + $0xc8] sm:$0xff] %vm342_vm2, %v2926_v41  ;;  %v2895_v55 = vmul.f32 0.01, %v2781_v22  ;;  %5614 = vmatprep.mubr.msk.f32.mxu1 %vm342_vm2, %v4326_v2  ;;  %3510 = vrot.lane.b32.xlu1 %v3883_v14, %s5941_s23 }
 0x2f5   : > { %3764 = vrot.lane.b32.xlu0 %v3692_v51, %s5938_s24 }
 0x2f6   : > { %v2927_v40 = vmax.f32 %v2781_v22, %v2895_v55  ;;  %v3111_v30 = vpop.permute.xlu1 %3110 }
 0x2f7   : > { %3205 = vst.msk [vmem:[#allocation3 + $0x18] sm:$0xff] %vm1075_vm5, %v3111_v30  ;;  %5615 = vmatmul.mubr.msk.f32.vlgmr.msra.gmra.mrb[64].mxu1 %vm342_vm2, %v4329_v52 }
 0x2f8   : > { %2959 = vst.msk [vmem:[#allocation2 + $0xd0] sm:$0xff] %vm342_vm2, %v2927_v40  ;;  %5617 = vmatprep.mubr.msk.f32.mxu1 %vm342_vm2, %v4332_v7  ;;  %3320 = vrot.lane.b32.xlu1 %v3692_v51, %s5939_s25 }
 0x2f9   : > { %3766 = vrot.lane.b32.xlu0 %v7644_v63, %s5938_s24 }
 0x2fa   : > { %v3303_v45 = vpop.permute.xlu1 %3302  ;;  %v3749_v3 = vpop.permute.xlu0 %3748 }
 0x2fb   : > { %3397 = vst.msk [vmem:[#allocation3 + $0x18] sm:$0xff] %vm1268_vm6, %v3303_v45  ;;  %5618 = vmatmul.mubr.msk.f32.gmra.mrb[66].mxu1 %vm342_vm2, %v4335_v36  ;;  %v3884_v26 = vld [vmem:[#allocation2 + $0xc7] sm:$0xff] }
 0x2fc   : > { %3844 = vst.msk [vmem:[#allocation3 + $0x8] sm:$0xff] %vm1075_vm5, %v3749_v3  ;;  %v4076_v15 = vld [vmem:[#allocation2 + $0xc8] sm:$0xff]  ;;  %5620 = vmatprep.mubr.msk.f32.mxu1 %vm342_vm2, %v4338_v10  ;;  %3130 = vrot.lane.b32.xlu1 %v4075_v58, %s5938_s24 }
 0x2fd   : > { %3024 = vst.msk [vmem:[#allocation3 + $0x120] sm:$0xff] %vm342_vm2, %v3884_v26  ;;  %3662 = vst.msk [vmem:[#allocation3 + $0xf8] sm:$0xff] %vm342_vm2, %v4076_v15  ;;  %3956 = vrot.lane.b32.xlu0 %v3884_v26, %s5939_s25 }
 0x2fe   : > { %v3751_v44 = vpop.permute.xlu0 %3750  ;;  %v3493_v57 = vpop.permute.xlu1 %3492 }
 0x2ff   : > { %3845 = vst.msk [vmem:[#allocation3 + $0x20] sm:$0xff] %vm1075_vm5, %v3751_v44  ;;  %5621 = vmatmul.mubr.msk.f32.gmra.mrb[68].mxu1 %vm342_vm2, %v4341_v53  ;;  %v3885_v61 = vld [vmem:[#allocation2 + $0xcf] sm:$0xff] }
 0x300   : > { %3588 = vst.msk [vmem:[#allocation3] sm:$0xff] %vm1461_vm7, %v3493_v57  ;;  %v4268_v43 = vld [vmem:[#allocation2 + $0xc9] sm:$0xff]  ;;  %5623 = vmatprep.mubr.msk.f32.mxu1 %vm342_vm2, %v4344_v13  ;;  %3322 = vrot.lane.b32.xlu1 %v7644_v63, %s5939_s25  ;;  %v4269_v28 = vld [vmem:[#allocation2 + $0xd1] sm:$0xff] }
 0x301   : > { %v4077_v60 = vld [vmem:[#allocation2 + $0xd0] sm:$0xff]  ;;  %4300 = vst.msk [vmem:[#allocation3 + $0xd0] sm:$0xff] %vm342_vm2, %v4268_v43  ;;  %3025 = vst.msk [vmem:[#allocation3 + $0x138] sm:$0xff] %vm342_vm2, %v3885_v61  ;;  %4148 = vrot.lane.b32.xlu0 %v4076_v15, %s5941_s23 }
 0x302   : > { %3663 = vst.msk [vmem:[#allocation3 + $0x110] sm:$0xff] %vm342_vm2, %v4077_v60  ;;  %4301 = vst.msk [vmem:[#allocation3 + $0xe8] sm:$0xff] %vm342_vm2, %v4269_v28  ;;  %v3113_v34 = vpop.permute.xlu1 %3112 }
 0x303   : > { %3206 = vst.msk [vmem:[#allocation3 + $0x30] sm:$0xff] %vm1075_vm5, %v3113_v34  ;;  %v2560_v12 = vpop.f32.mrb[24].mxu1  ;;  %5624 = vmatmul.mubr.msk.f32.gmra.mrb[70].mxu1 %vm342_vm2, %v4347_v62 }
 0x304   : > { %v2561_v0 = vadd.f32 %v7698_v25, %v2560_v12  ;;  %v2562_v51 = vpop.f32.mrb[25].mxu1  ;;  %3512 = vrot.lane.b32.xlu1 %v3884_v26, %s5941_s23 }
 0x305   : > { %3958 = vrot.lane.b32.xlu0 %v3885_v61, %s5939_s25 }
 0x306   : > { %v2786_v63 = vadd.f32 %v7100_v56, %v2561_v0  ;;  %v3495_v35 = vpop.permute.xlu1 %3494 }
 0x307   : > { %3589 = vst.msk [vmem:[#allocation3 + $0x18] sm:$0xff] %vm1461_vm7, %v3495_v35  ;;  %v2565_v54 = vpop.f32.mrb[26].mxu1  ;;  %v4324_v10 = vld [vmem:[#allocation3] sm:$0xff] }
 0x308   : > { %v4350_v31 = vld [vmem:[#allocation3 + $0xd0] sm:$0xff]  ;;  %v2896_v50 = vmul.f32 0.01, %v2786_v63  ;;  %v2566_v42 = vadd.f32 %v7698_v25, %v2565_v54  ;;  %v2567_v4 = vpop.f32.mrb[27].mxu1  ;;  %3132 = vrot.lane.b32.xlu1 %v4076_v15, %s5938_s24 }
 0x309   : > { %5626 = vmatprep.mubr.msk.f32.mxu1 %vm342_vm2, %v4350_v31  ;;  %v4353_v14 = vld [vmem:[#allocation3 + $0xe8] sm:$0xff]  ;;  %4150 = vrot.lane.b32.xlu0 %v4077_v60, %s5941_s23 }
 0x30a   : > { %5627 = vmatmul.mubr.msk.f32.gmra.mrb[72].mxu1 %vm342_vm2, %v4353_v14  ;;  %v2928_v49 = vmax.f32 %v2786_v63, %v2896_v50  ;;  %v2791_v56 = vadd.f32 %v7098_v27, %v2566_v42  ;;  %v3305_v23 = vpop.permute.xlu1 %3304 }
 0x30b   : > { %3398 = vst.msk [vmem:[#allocation3 + $0x30] sm:$0xff] %vm1268_vm6, %v3305_v23 }
 0x30c   : > { %2960 = vst.msk [vmem:[#allocation2 + $0xe8] sm:$0xff] %vm342_vm2, %v2928_v49  ;;  %v2897_v9 = vmul.f32 0.01, %v2791_v56  ;;  %3514 = vrot.lane.b32.xlu1 %v3885_v61, %s5941_s23 }
 0x30d   : > { %3768 = vrot.lane.b32.xlu0 %v4268_v43, %s5938_s24 }
 0x30e   : > { %v2929_v47 = vmax.f32 %v2791_v56, %v2897_v9  ;;  %v3115_v59 = vpop.permute.xlu1 %3114  ;;  %v3941_v32 = vpop.permute.xlu0 %3940  ;;  %v4327_v51 = vld [vmem:[#allocation3 + $0x18] sm:$0xff] }
 0x30f   : > { %3207 = vst.msk [vmem:[#allocation3 + $0x48] sm:$0xff] %vm1075_vm5, %v3115_v59 }
 0x310   : > { %2961 = vst.msk [vmem:[#allocation2 + $0xf0] sm:$0xff] %vm342_vm2, %v2929_v47  ;;  %3324 = vrot.lane.b32.xlu1 %v4268_v43, %s5939_s25 }
 0x311   : > { %4036 = vst.msk [vmem:[#allocation3 + $0x8] sm:$0xff] %vm1268_vm6, %v3941_v32  ;;  %3770 = vrot.lane.b32.xlu0 %v4269_v28, %s5938_s24 }
 0x312   : > { %v3307_v27 = vpop.permute.xlu1 %3306  ;;  %v4133_v39 = vpop.permute.xlu0 %4132 }
 0x313   : > { %3399 = vst.msk [vmem:[#allocation3 + $0x48] sm:$0xff] %vm1268_vm6, %v3307_v27  ;;  %v3886_v58 = vld [vmem:[#allocation2 + $0xe7] sm:$0xff] }
 0x314   : > { %v4078_v41 = vld [vmem:[#allocation2 + $0xe8] sm:$0xff]  ;;  %4228 = vst.msk [vmem:[#allocation3 + $0x8] sm:$0xff] %vm1461_vm7, %v4133_v39  ;;  %3134 = vrot.lane.b32.xlu1 %v4077_v60, %s5938_s24 }
 0x315   : > { %3026 = vst.msk [vmem:[#allocation3 + $0x150] sm:$0xff] %vm342_vm2, %v3886_v58  ;;  %3664 = vst.msk [vmem:[#allocation3 + $0x128] sm:$0xff] %vm342_vm2, %v4078_v41  ;;  %3960 = vrot.lane.b32.xlu0 %v3886_v58, %s5939_s25 }
 0x316   : > { %v3497_v22 = vpop.permute.xlu1 %3496  ;;  %v3943_v8 = vpop.permute.xlu0 %3942 }
 0x317   : > { %3590 = vst.msk [vmem:[#allocation3 + $0x30] sm:$0xff] %vm1461_vm7, %v3497_v22  ;;  %v3887_v1 = vld [vmem:[#allocation2 + $0xef] sm:$0xff] }
 0x318   : > { %v4270_v2 = vld [vmem:[#allocation2 + $0xe9] sm:$0xff]  ;;  %4037 = vst.msk [vmem:[#allocation3 + $0x20] sm:$0xff] %vm1268_vm6, %v3943_v8  ;;  %3326 = vrot.lane.b32.xlu1 %v4269_v28, %s5939_s25  ;;  %v7732_v40 = vld [vmem:[#allocation2 + $0xf1] sm:$0xff] }
 0x319   : > { %v7727_v55 = vld [vmem:[#allocation2 + $0xf0] sm:$0xff]  ;;  %4302 = vst.msk [vmem:[#allocation3 + $0x100] sm:$0xff] %vm342_vm2, %v4270_v2  ;;  %3027 = vst.msk [vmem:[#allocation3 + $0x168] sm:$0xff] %vm342_vm2, %v3887_v1  ;;  %4152 = vrot.lane.b32.xlu0 %v4078_v41, %s5941_s23 }
 0x31a   : > { %3665 = vst.msk [vmem:[#allocation3 + $0x140] sm:$0xff] %vm342_vm2, %v7727_v55  ;;  %4303 = vst.msk [vmem:[#allocation3 + $0x118] sm:$0xff] %vm342_vm2, %v7732_v40  ;;  %v3117_v30 = vpop.permute.xlu1 %3116  ;;  %v4135_v52 = vpop.permute.xlu0 %4134 }
 0x31b   : > { %3208 = vst.msk [vmem:[#allocation3 + $0x60] sm:$0xff] %vm1075_vm5, %v3117_v30  ;;  %v2570_v7 = vpop.f32.mrb[28].mxu1  ;;  %v4325_v45 = vld [vmem:[#allocation3 + $0x8] sm:$0xff] }
 0x31c   : > { %4229 = vst.msk [vmem:[#allocation3 + $0x20] sm:$0xff] %vm1461_vm7, %v4135_v52  ;;  %v2571_v3 = vadd.f32 %v7698_v25, %v2570_v7  ;;  %4623 = vmatprep.mubr.f32.mxu0 %v4325_v45  ;;  %v2572_v36 = vpop.f32.mrb[29].mxu1  ;;  %3516 = vrot.lane.b32.xlu1 %v3886_v58, %s5941_s23 }
 0x31d   : > { %4624 = vmatmul.mubr.f32.vlgmr.msra.gmra.mrb[64].mxu0 %v4324_v10  ;;  %3962 = vrot.lane.b32.xlu0 %v3887_v1, %s5939_s25 }
 0x31e   : > { %v2796_v26 = vadd.f32 %v7140_v24, %v2571_v3  ;;  %v3499_v15 = vpop.permute.xlu1 %3498 }
 0x31f   : > { %v3753_v44 = vpop.permute.xlu0 %3752  ;;  %3591 = vst.msk [vmem:[#allocation3 + $0x48] sm:$0xff] %vm1461_vm7, %v3499_v15  ;;  %v2575_v57 = vpop.f32.mrb[30].mxu1 }
 0x320   : > { %v4356_v53 = vld [vmem:[#allocation3 + $0x100] sm:$0xff]  ;;  %v2898_v13 = vmul.f32 0.01, %v2796_v26  ;;  %3846 = vst.msk [vmem:[#allocation3 + $0x38] sm:$0xff] %vm1075_vm5, %v3753_v44  ;;  %v2576_v61 = vadd.f32 %v7698_v25, %v2575_v57  ;;  %v2577_v43 = vpop.f32.mrb[31].mxu1  ;;  %3136 = vrot.lane.b32.xlu1 %v4078_v41, %s5938_s24  ;;  %v4330_v41 = vld [vmem:[#allocation3 + $0x30] sm:$0xff] }
 0x321   : > { %5629 = vmatprep.mubr.msk.f32.mxu1 %vm342_vm2, %v4356_v53  ;;  %v4359_v60 = vld [vmem:[#allocation3 + $0x118] sm:$0xff]  ;;  %4154 = vrot.lane.b32.xlu0 %v7727_v55, %s5941_s23 }
 0x322   : > { %5630 = vmatmul.mubr.msk.f32.gmra.mrb[74].mxu1 %vm342_vm2, %v4359_v60  ;;  %v2930_v24 = vmax.f32 %v2796_v26, %v2898_v13  ;;  %v2801_v28 = vadd.f32 %v7138_v11, %v2576_v61  ;;  %v3309_v34 = vpop.permute.xlu1 %3308 }
 0x323   : > { %v3755_v62 = vpop.permute.xlu0 %3754  ;;  %3400 = vst.msk [vmem:[#allocation3 + $0x60] sm:$0xff] %vm1268_vm6, %v3309_v34  ;;  %v4328_v12 = vld [vmem:[#allocation3 + $0x20] sm:$0xff] }
 0x324   : > { %2962 = vst.msk [vmem:[#allocation2 + $0x108] sm:$0xff] %vm342_vm2, %v2930_v24  ;;  %v2899_v0 = vmul.f32 0.01, %v2801_v28  ;;  %4628 = vmatprep.mubr.f32.mxu0 %v4328_v12  ;;  %3518 = vrot.lane.b32.xlu1 %v3887_v1, %s5941_s23 }
 0x325   : > { %3847 = vst.msk [vmem:[#allocation3 + $0x50] sm:$0xff] %vm1075_vm5, %v3755_v62  ;;  %4629 = vmatmul.mubr.f32.gmra.mrb[66].mxu0 %v4327_v51  ;;  %3772 = vrot.lane.b32.xlu0 %v4270_v2, %s5938_s24 }
 0x326   : > { %v2931_v63 = vmax.f32 %v2801_v28, %v2899_v0  ;;  %v3119_v35 = vpop.permute.xlu1 %3118  ;;  %v4333_v15 = vld [vmem:[#allocation3 + $0x48] sm:$0xff] }
 0x327   : > { %v3945_v11 = vpop.permute.xlu0 %3944  ;;  %3209 = vst.msk [vmem:[#allocation3 + $0x78] sm:$0xff] %vm1075_vm5, %v3119_v35 }
 0x328   : > { %2963 = vst.msk [vmem:[#allocation2 + $0x110] sm:$0xff] %vm342_vm2, %v2931_v63  ;;  %3328 = vrot.lane.b32.xlu1 %v4270_v2, %s5939_s25 }
 0x329   : > { %4038 = vst.msk [vmem:[#allocation3 + $0x38] sm:$0xff] %vm1268_vm6, %v3945_v11  ;;  %3774 = vrot.lane.b32.xlu0 %v7732_v40, %s5938_s24 }
 0x32a   : > { %v3311_v54 = vpop.permute.xlu1 %3310 }
 0x32b   : > { %v4137_v31 = vpop.permute.xlu0 %4136  ;;  %3401 = vst.msk [vmem:[#allocation3 + $0x78] sm:$0xff] %vm1268_vm6, %v3311_v54  ;;  %v3888_v50 = vld [vmem:[#allocation2 + $0x107] sm:$0xff] }
 0x32c   : > { %v4080_v42 = vld [vmem:[#allocation2 + $0x108] sm:$0xff]  ;;  %4230 = vst.msk [vmem:[#allocation3 + $0x38] sm:$0xff] %vm1461_vm7, %v4137_v31  ;;  %3138 = vrot.lane.b32.xlu1 %v7727_v55, %s5938_s24 }
 0x32d   : > { %3028 = vst.msk [vmem:[#allocation3 + $0x180] sm:$0xff] %vm342_vm2, %v3888_v50  ;;  %3666 = vst.msk [vmem:[#allocation3 + $0x158] sm:$0xff] %vm342_vm2, %v4080_v42  ;;  %3964 = vrot.lane.b32.xlu0 %v3888_v50, %s5939_s25 }
 0x32e   : > { %v3501_v4 = vpop.permute.xlu1 %3500 }
 0x32f   : > { %v3947_v14 = vpop.permute.xlu0 %3946  ;;  %3592 = vst.msk [vmem:[#allocation3 + $0x60] sm:$0xff] %vm1461_vm7, %v3501_v4  ;;  %v3889_v49 = vld [vmem:[#allocation2 + $0x10f] sm:$0xff] }
 0x330   : > { %v4272_v56 = vld [vmem:[#allocation2 + $0x109] sm:$0xff]  ;;  %4039 = vst.msk [vmem:[#allocation3 + $0x50] sm:$0xff] %vm1268_vm6, %v3947_v14  ;;  %3330 = vrot.lane.b32.xlu1 %v7732_v40, %s5939_s25  ;;  %v7780_v9 = vld [vmem:[#allocation2 + $0x111] sm:$0xff] }
 0x331   : > { %v7774_v23 = vld [vmem:[#allocation2 + $0x110] sm:$0xff]  ;;  %4304 = vst.msk [vmem:[#allocation3 + $0x130] sm:$0xff] %vm342_vm2, %v4272_v56  ;;  %3029 = vst.msk [vmem:[#allocation3 + $0x198] sm:$0xff] %vm342_vm2, %v3889_v49  ;;  %4156 = vrot.lane.b32.xlu0 %v4080_v42, %s5941_s23 }
 0x332   : > { %3667 = vst.msk [vmem:[#allocation3 + $0x170] sm:$0xff] %vm342_vm2, %v7774_v23  ;;  %4305 = vst.msk [vmem:[#allocation3 + $0x148] sm:$0xff] %vm342_vm2, %v7780_v9  ;;  %v3121_v47 = vpop.permute.xlu1 %3120 }
 0x333   : > { %v4139_v59 = vpop.permute.xlu0 %4138  ;;  %3210 = vst.msk [vmem:[#allocation3 + $0x90] sm:$0xff] %vm1075_vm5, %v3121_v47  ;;  %v2580_v32 = vpop.f32.mrb[32].mxu1  ;;  %v4331_v27 = vld [vmem:[#allocation3 + $0x38] sm:$0xff] }
 0x334   : > { %4231 = vst.msk [vmem:[#allocation3 + $0x50] sm:$0xff] %vm1461_vm7, %v4139_v59  ;;  %v2581_v39 = vadd.f32 %v7698_v25, %v2580_v32  ;;  %4633 = vmatprep.mubr.f32.mxu0 %v4331_v27  ;;  %v2582_v58 = vpop.f32.mrb[33].mxu1  ;;  %3520 = vrot.lane.b32.xlu1 %v3888_v50, %s5941_s23 }
 0x335   : > { %3966 = vrot.lane.b32.xlu0 %v3889_v49, %s5939_s25  ;;  %4634 = vmatmul.mubr.f32.gmra.mrb[68].mxu0 %v4330_v41 }
 0x336   : > { %v2806_v22 = vadd.f32 %v7182_v19, %v2581_v39  ;;  %v3503_v8 = vpop.permute.xlu1 %3502 }
 0x337   : > { %v3757_v1 = vpop.permute.xlu0 %3756  ;;  %3593 = vst.msk [vmem:[#allocation3 + $0x78] sm:$0xff] %vm1461_vm7, %v3503_v8  ;;  %v2585_v2 = vpop.f32.mrb[34].mxu1 }
 0x338   : > { %v4362_v55 = vld [vmem:[#allocation3 + $0x130] sm:$0xff]  ;;  %v2900_v40 = vmul.f32 0.01, %v2806_v22  ;;  %3848 = vst.msk [vmem:[#allocation3 + $0x68] sm:$0xff] %vm1075_vm5, %v3757_v1  ;;  %v2586_v30 = vadd.f32 %v7698_v25, %v2585_v2  ;;  %v2587_v52 = vpop.f32.mrb[35].mxu1  ;;  %3140 = vrot.lane.b32.xlu1 %v4080_v42, %s5938_s24 }
 0x339   : > { %5632 = vmatprep.mubr.msk.f32.mxu1 %vm342_vm2, %v4362_v55  ;;  %v4365_v7 = vld [vmem:[#allocation3 + $0x148] sm:$0xff]  ;;  %4158 = vrot.lane.b32.xlu0 %v7774_v23, %s5941_s23 }
 0x33a   : > { %5633 = vmatmul.mubr.msk.f32.gmra.mrb[76].mxu1 %vm342_vm2, %v4365_v7  ;;  %v2932_v19 = vmax.f32 %v2806_v22, %v2900_v40  ;;  %v2811_v45 = vadd.f32 %v7180_v6, %v2586_v30  ;;  %v3313_v3 = vpop.permute.xlu1 %3312  ;;  %v7808_v44 = vpop.f32.mrb[62].mxu0 }
 0x33b   : > { %v3759_v36 = vpop.permute.xlu0 %3758  ;;  %3402 = vst.msk [vmem:[#allocation3 + $0x90] sm:$0xff] %vm1268_vm6, %v3313_v3  ;;  %v4334_v10 = vld [vmem:[#allocation3 + $0x50] sm:$0xff]  ;;  %v7810_v53 = vpop.f32.mrb[63].mxu0 }
 0x33c   : > { %2964 = vst.msk [vmem:[#allocation2 + $0x128] sm:$0xff] %vm342_vm2, %v2932_v19  ;;  %v2901_v26 = vmul.f32 0.01, %v2811_v45  ;;  %4638 = vmatprep.mubr.f32.mxu0 %v4334_v10  ;;  %3522 = vrot.lane.b32.xlu1 %v3889_v49, %s5941_s23 }
 0x33d   : > { %3849 = vst.msk [vmem:[#allocation3 + $0x80] sm:$0xff] %vm1075_vm5, %v3759_v36  ;;  %3776 = vrot.lane.b32.xlu0 %v4272_v56, %s5938_s24  ;;  %4639 = vmatmul.mubr.f32.gmra.mrb[70].mxu0 %v4333_v15 }
 0x33e   : > { %v2933_v6 = vmax.f32 %v2811_v45, %v2901_v26  ;;  %v3123_v57 = vpop.permute.xlu1 %3122  ;;  %v4339_v8 = vld [vmem:[#allocation3 + $0x78] sm:$0xff] }
 0x33f   : > { %v3949_v13 = vpop.permute.xlu0 %3948  ;;  %3211 = vst.msk [vmem:[#allocation3 + $0xa8] sm:$0xff] %vm1075_vm5, %v3123_v57 }
 0x340   : > { %2965 = vst.msk [vmem:[#allocation2 + $0x130] sm:$0xff] %vm342_vm2, %v2933_v6  ;;  %3332 = vrot.lane.b32.xlu1 %v4272_v56, %s5939_s25 }
 0x341   : > { %4040 = vst.msk [vmem:[#allocation3 + $0x68] sm:$0xff] %vm1268_vm6, %v3949_v13  ;;  %3778 = vrot.lane.b32.xlu0 %v7780_v9, %s5938_s24 }
 0x342   : > { %v3315_v61 = vpop.permute.xlu1 %3314 }
 0x343   : > { %v4141_v43 = vpop.permute.xlu0 %4140  ;;  %3403 = vst.msk [vmem:[#allocation3 + $0xa8] sm:$0xff] %vm1268_vm6, %v3315_v61  ;;  %v3890_v60 = vld [vmem:[#allocation2 + $0x127] sm:$0xff] }
 0x344   : > { %v4082_v24 = vld [vmem:[#allocation2 + $0x128] sm:$0xff]  ;;  %4232 = vst.msk [vmem:[#allocation3 + $0x68] sm:$0xff] %vm1461_vm7, %v4141_v43  ;;  %3142 = vrot.lane.b32.xlu1 %v7774_v23, %s5938_s24  ;;  %v4336_v23 = vld [vmem:[#allocation3 + $0x60] sm:$0xff] }
 0x345   : > { %3030 = vst.msk [vmem:[#allocation3 + $0x1b0] sm:$0xff] %vm342_vm2, %v3890_v60  ;;  %3668 = vst.msk [vmem:[#allocation3 + $0x188] sm:$0xff] %vm342_vm2, %v4082_v24  ;;  %3968 = vrot.lane.b32.xlu0 %v3890_v60, %s5939_s25 }
 0x346   : > { %v3505_v28 = vpop.permute.xlu1 %3504 }
 0x347   : > { %v3951_v34 = vpop.permute.xlu0 %3950  ;;  %3594 = vst.msk [vmem:[#allocation3 + $0x90] sm:$0xff] %vm1461_vm7, %v3505_v28  ;;  %v2590_v62 = vpop.f32.mrb[36].mxu1  ;;  %v3891_v12 = vld [vmem:[#allocation2 + $0x12f] sm:$0xff] }
 0x348   : > { %v4274_v0 = vld [vmem:[#allocation2 + $0x129] sm:$0xff]  ;;  %4041 = vst.msk [vmem:[#allocation3 + $0x80] sm:$0xff] %vm1268_vm6, %v3951_v34  ;;  %v2591_v63 = vadd.f32 %v7698_v25, %v2590_v62  ;;  %v2592_v35 = vpop.f32.mrb[37].mxu1  ;;  %3334 = vrot.lane.b32.xlu1 %v7780_v9, %s5939_s25  ;;  %v7833_v11 = vld [vmem:[#allocation2 + $0x131] sm:$0xff] }
 0x349   : > { %v7826_v51 = vld [vmem:[#allocation2 + $0x130] sm:$0xff]  ;;  %4306 = vst.msk [vmem:[#allocation3 + $0x160] sm:$0xff] %vm342_vm2, %v4274_v0  ;;  %3031 = vst.msk [vmem:[#allocation3 + $0x1c8] sm:$0xff] %vm342_vm2, %v3891_v12  ;;  %4160 = vrot.lane.b32.xlu0 %v4082_v24, %s5941_s23 }
 0x34a   : > { %3669 = vst.msk [vmem:[#allocation3 + $0x1a0] sm:$0xff] %vm342_vm2, %v7826_v51  ;;  %4307 = vst.msk [vmem:[#allocation3 + $0x178] sm:$0xff] %vm342_vm2, %v7833_v11  ;;  %v2816_v54 = vadd.f32 %v7229_v37, %v2591_v63  ;;  %v3125_v31 = vpop.permute.xlu1 %3124 }
 0x34b   : > { %v4143_v50 = vpop.permute.xlu0 %4142  ;;  %3212 = vst.msk [vmem:[#allocation3 + $0xc0] sm:$0xff] %vm1075_vm5, %v3125_v31  ;;  %v2595_v42 = vpop.f32.mrb[38].mxu1  ;;  %v4337_v4 = vld [vmem:[#allocation3 + $0x68] sm:$0xff] }
 0x34c   : > { %v2902_v14 = vmul.f32 0.01, %v2816_v54  ;;  %4233 = vst.msk [vmem:[#allocation3 + $0x80] sm:$0xff] %vm1461_vm7, %v4143_v50  ;;  %v2596_v49 = vadd.f32 %v7698_v25, %v2595_v42  ;;  %4643 = vmatprep.mubr.f32.mxu0 %v4337_v4  ;;  %v2597_v56 = vpop.f32.mrb[39].mxu1  ;;  %3524 = vrot.lane.b32.xlu1 %v3890_v60, %s5941_s23 }
 0x34d   : > { %3970 = vrot.lane.b32.xlu0 %v3891_v12, %s5939_s25  ;;  %4644 = vmatmul.mubr.f32.gmra.mrb[72].mxu0 %v4336_v23 }
 0x34e   : > { %v2934_v37 = vmax.f32 %v2816_v54, %v2902_v14  ;;  %v2821_v9 = vadd.f32 %v7227_v38, %v2596_v49  ;;  %v3507_v47 = vpop.permute.xlu1 %3506 }
 0x34f   : > { %v3761_v59 = vpop.permute.xlu0 %3760  ;;  %3595 = vst.msk [vmem:[#allocation3 + $0xa8] sm:$0xff] %vm1461_vm7, %v3507_v47 }
 0x350   : > { %v4368_v32 = vld [vmem:[#allocation3 + $0x160] sm:$0xff]  ;;  %2966 = vst.msk [vmem:[#allocation2 + $0x148] sm:$0xff] %vm342_vm2, %v2934_v37  ;;  %v2903_v27 = vmul.f32 0.01, %v2821_v9  ;;  %3144 = vrot.lane.b32.xlu1 %v4082_v24, %s5938_s24 }
 0x351   : > { %3850 = vst.msk [vmem:[#allocation3 + $0x98] sm:$0xff] %vm1075_vm5, %v3761_v59  ;;  %5635 = vmatprep.mubr.msk.f32.mxu1 %vm342_vm2, %v4368_v32  ;;  %v4371_v39 = vld [vmem:[#allocation3 + $0x178] sm:$0xff]  ;;  %4162 = vrot.lane.b32.xlu0 %v7826_v51, %s5941_s23 }
 0x352   : > { %5636 = vmatmul.mubr.msk.f32.gmra.mrb[78].mxu1 %vm342_vm2, %v4371_v39  ;;  %v2935_v38 = vmax.f32 %v2821_v9, %v2903_v27  ;;  %v3317_v58 = vpop.permute.xlu1 %3316 }
 0x353   : > { %v3763_v41 = vpop.permute.xlu0 %3762  ;;  %3404 = vst.msk [vmem:[#allocation3 + $0xc0] sm:$0xff] %vm1268_vm6, %v3317_v58  ;;  %v4340_v22 = vld [vmem:[#allocation3 + $0x80] sm:$0xff] }
 0x354   : > { %2967 = vst.msk [vmem:[#allocation2 + $0x150] sm:$0xff] %vm342_vm2, %v2935_v38  ;;  %4648 = vmatprep.mubr.f32.mxu0 %v4340_v22  ;;  %3526 = vrot.lane.b32.xlu1 %v3891_v12, %s5941_s23 }
 0x355   : > { %3851 = vst.msk [vmem:[#allocation3 + $0xb0] sm:$0xff] %vm1075_vm5, %v3763_v41  ;;  %3780 = vrot.lane.b32.xlu0 %v4274_v0, %s5938_s24  ;;  %4649 = vmatmul.mubr.f32.gmra.mrb[74].mxu0 %v4339_v8 }
 0x356   : > { %v3127_v1 = vpop.permute.xlu1 %3126  ;;  %v4345_v9 = vld [vmem:[#allocation3 + $0xa8] sm:$0xff] }
 0x357   : > { %v3953_v2 = vpop.permute.xlu0 %3952  ;;  %3213 = vst.msk [vmem:[#allocation3 + $0xd8] sm:$0xff] %vm1075_vm5, %v3127_v1  ;;  %v3892_v55 = vld [vmem:[#allocation2 + $0x147] sm:$0xff] }
 0x358   : > { %v4084_v40 = vld [vmem:[#allocation2 + $0x148] sm:$0xff]  ;;  %4042 = vst.msk [vmem:[#allocation3 + $0x98] sm:$0xff] %vm1268_vm6, %v3953_v2  ;;  %3336 = vrot.lane.b32.xlu1 %v4274_v0, %s5939_s25 }
 0x359   : > { %3032 = vst.msk [vmem:[#allocation3 + $0x1e0] sm:$0xff] %vm342_vm2, %v3892_v55  ;;  %3670 = vst.msk [vmem:[#allocation3 + $0x1b8] sm:$0xff] %vm342_vm2, %v4084_v40  ;;  %3782 = vrot.lane.b32.xlu0 %v7833_v11, %s5938_s24 }
 0x35a   : > { %v3319_v30 = vpop.permute.xlu1 %3318 }
 0x35b   : > { %v4145_v52 = vpop.permute.xlu0 %4144  ;;  %3405 = vst.msk [vmem:[#allocation3 + $0xd8] sm:$0xff] %vm1268_vm6, %v3319_v30  ;;  %v7869_v7 = vld [vmem:[#allocation2 + $0x149] sm:$0xff]  ;;  %v7873_v45 = vld [vmem:[#allocation2 + $0x151] sm:$0xff] }
 0x35c   : > { %v7871_v19 = vld [vmem:[#allocation2 + $0x14f] sm:$0xff]  ;;  %4234 = vst.msk [vmem:[#allocation3 + $0x98] sm:$0xff] %vm1461_vm7, %v4145_v52  ;;  %v2600_v3 = vpop.f32.mrb[40].mxu1  ;;  %3146 = vrot.lane.b32.xlu1 %v7826_v51, %s5938_s24 }
 0x35d   : > { %4308 = vst.msk [vmem:[#allocation3 + $0x190] sm:$0xff] %vm342_vm2, %v7869_v7  ;;  %4309 = vst.msk [vmem:[#allocation3 + $0x1a8] sm:$0xff] %vm342_vm2, %v7873_v45  ;;  %v7882_v36 = vld [vmem:[#allocation2 + $0x150] sm:$0xff]  ;;  %v2601_v10 = vadd.f32 %v7698_v25, %v2600_v3  ;;  %v2602_v26 = vpop.f32.mrb[41].mxu1  ;;  %3972 = vrot.lane.b32.xlu0 %v3892_v55, %s5939_s25 }
 0x35e   : > { %3033 = vst.msk [vmem:[#allocation3 + $0x1f8] sm:$0xff] %vm342_vm2, %v7871_v19  ;;  %3671 = vst.msk [vmem:[#allocation3 + $0x1d0] sm:$0xff] %vm342_vm2, %v7882_v36  ;;  %v3509_v15 = vpop.permute.xlu1 %3508 }
 0x35f   : > { %v2826_v6 = vadd.f32 %v7287_v33, %v2601_v10  ;;  %v3955_v57 = vpop.permute.xlu0 %3954  ;;  %3596 = vst.msk [vmem:[#allocation3 + $0xc0] sm:$0xff] %vm1461_vm7, %v3509_v15 }
 0x360   : > { %4043 = vst.msk [vmem:[#allocation3 + $0xb0] sm:$0xff] %vm1268_vm6, %v3955_v57  ;;  %v2605_v13 = vpop.f32.mrb[42].mxu1  ;;  %3338 = vrot.lane.b32.xlu1 %v7833_v11, %s5939_s25 }
 0x361   : > { %v2904_v61 = vmul.f32 0.01, %v2826_v6  ;;  %v2606_v43 = vadd.f32 %v7698_v25, %v2605_v13  ;;  %v2607_v60 = vpop.f32.mrb[43].mxu1  ;;  %4164 = vrot.lane.b32.xlu0 %v4084_v40, %s5941_s23 }
 0x362   : > { %v3129_v24 = vpop.permute.xlu1 %3128 }
 0x363   : > { %v2936_v28 = vmax.f32 %v2826_v6, %v2904_v61  ;;  %v2831_v34 = vadd.f32 %v7284_v17, %v2606_v43  ;;  %v4147_v33 = vpop.permute.xlu0 %4146  ;;  %3214 = vst.msk [vmem:[#allocation3 + $0xf0] sm:$0xff] %vm1075_vm5, %v3129_v24  ;;  %v4343_v62 = vld [vmem:[#allocation3 + $0x98] sm:$0xff]  ;;  %v4342_v17 = vld [vmem:[#allocation3 + $0x90] sm:$0xff] }
 0x364   : > { %v4374_v12 = vld [vmem:[#allocation3 + $0x190] sm:$0xff]  ;;  %v4377_v0 = vld [vmem:[#allocation3 + $0x1a8] sm:$0xff]  ;;  %4235 = vst.msk [vmem:[#allocation3 + $0xb0] sm:$0xff] %vm1461_vm7, %v4147_v33  ;;  %4653 = vmatprep.mubr.f32.mxu0 %v4343_v62  ;;  %3528 = vrot.lane.b32.xlu1 %v3892_v55, %s5941_s23 }
 0x365   : > { %5638 = vmatprep.mubr.msk.f32.mxu1 %vm342_vm2, %v4374_v12  ;;  %2968 = vst.msk [vmem:[#allocation2 + $0x168] sm:$0xff] %vm342_vm2, %v2936_v28  ;;  %v2905_v51 = vmul.f32 0.01, %v2831_v34  ;;  %3974 = vrot.lane.b32.xlu0 %v7871_v19, %s5939_s25 }
 0x366   : > { %4654 = vmatmul.mubr.f32.gmra.mrb[76].mxu0 %v4342_v17  ;;  %5639 = vmatmul.mubr.msk.f32.gmra.mrb[80].mxu1 %vm342_vm2, %v4377_v0  ;;  %v3511_v63 = vpop.permute.xlu1 %3510 }
 0x367   : > { %v2937_v35 = vmax.f32 %v2831_v34, %v2905_v51  ;;  %v3765_v11 = vpop.permute.xlu0 %3764  ;;  %3597 = vst.msk [vmem:[#allocation3 + $0xd8] sm:$0xff] %vm1461_vm7, %v3511_v63  ;;  %v2610_v54 = vpop.f32.mrb[44].mxu1 }
 0x368   : > { %3852 = vst.msk [vmem:[#allocation3 + $0xc8] sm:$0xff] %vm1075_vm5, %v3765_v11  ;;  %v2611_v31 = vadd.f32 %v7698_v25, %v2610_v54  ;;  %v2612_v50 = vpop.f32.mrb[45].mxu1  ;;  %3148 = vrot.lane.b32.xlu1 %v4084_v40, %s5938_s24 }
 0x369   : > { %2969 = vst.msk [vmem:[#allocation2 + $0x170] sm:$0xff] %vm342_vm2, %v2937_v35  ;;  %4166 = vrot.lane.b32.xlu0 %v7882_v36, %s5941_s23 }
 0x36a   : > { %v2836_v42 = vadd.f32 %v7385_v29, %v2611_v31  ;;  %v3321_v4 = vpop.permute.xlu1 %3320 }
 0x36b   : > { %v3767_v14 = vpop.permute.xlu0 %3766  ;;  %3406 = vst.msk [vmem:[#allocation3 + $0xf0] sm:$0xff] %vm1268_vm6, %v3321_v4  ;;  %v4346_v49 = vld [vmem:[#allocation3 + $0xb0] sm:$0xff] }
 0x36c   : > { %v2906_v56 = vmul.f32 0.01, %v2836_v42  ;;  %3853 = vst.msk [vmem:[#allocation3 + $0xe0] sm:$0xff] %vm1075_vm5, %v3767_v14  ;;  %4658 = vmatprep.mubr.f32.mxu0 %v4346_v49  ;;  %v3894_v23 = vld [vmem:[#allocation2 + $0x167] sm:$0xff]  ;;  %3530 = vrot.lane.b32.xlu1 %v7871_v19, %s5941_s23 }
 0x36d   : > { %v7916_v37 = vld [vmem:[#allocation2 + $0x168] sm:$0xff]  ;;  %3784 = vrot.lane.b32.xlu0 %v7869_v7, %s5938_s24  ;;  %3034 = vst.msk [vmem:[#allocation3 + $0x210] sm:$0xff] %vm342_vm2, %v3894_v23  ;;  %4659 = vmatmul.mubr.f32.gmra.mrb[78].mxu0 %v4345_v9 }
 0x36e   : > { %3672 = vst.msk [vmem:[#allocation3 + $0x1e8] sm:$0xff] %vm342_vm2, %v7916_v37  ;;  %v2938_v29 = vmax.f32 %v2836_v42, %v2906_v56  ;;  %v3131_v47 = vpop.permute.xlu1 %3130  ;;  %v4351_v33 = vld [vmem:[#allocation3 + $0xd8] sm:$0xff] }
 0x36f   : > { %v3957_v59 = vpop.permute.xlu0 %3956  ;;  %3215 = vst.msk [vmem:[#allocation3 + $0x108] sm:$0xff] %vm1075_vm5, %v3131_v47 }
 0x370   : > { %2970 = vst.msk [vmem:[#allocation2 + $0x188] sm:$0xff] %vm342_vm2, %v2938_v29  ;;  %v7928_v32 = vld [vmem:[#allocation2 + $0x169] sm:$0xff]  ;;  %v7930_v27 = vld [vmem:[#allocation2 + $0x171] sm:$0xff]  ;;  %3340 = vrot.lane.b32.xlu1 %v7869_v7, %s5939_s25 }
 0x371   : > { %4044 = vst.msk [vmem:[#allocation3 + $0xc8] sm:$0xff] %vm1268_vm6, %v3957_v59  ;;  %v7932_v39 = vld [vmem:[#allocation2 + $0x16f] sm:$0xff]  ;;  %3786 = vrot.lane.b32.xlu0 %v7873_v45, %s5938_s24 }
 0x372   : > { %4310 = vst.msk [vmem:[#allocation3 + $0x1c0] sm:$0xff] %vm342_vm2, %v7928_v32  ;;  %4311 = vst.msk [vmem:[#allocation3 + $0x1d8] sm:$0xff] %vm342_vm2, %v7930_v27  ;;  %v7942_v38 = vld [vmem:[#allocation2 + $0x170] sm:$0xff]  ;;  %v3323_v58 = vpop.permute.xlu1 %3322 }
 0x373   : > { %3035 = vst.msk [vmem:[#allocation3 + $0x228] sm:$0xff] %vm342_vm2, %v7932_v39  ;;  %3673 = vst.msk [vmem:[#allocation3 + $0x200] sm:$0xff] %vm342_vm2, %v7942_v38  ;;  %v4149_v41 = vpop.permute.xlu0 %4148 }
 0x374   : > { %3407 = vst.msk [vmem:[#allocation3 + $0x108] sm:$0xff] %vm1268_vm6, %v3323_v58  ;;  %3150 = vrot.lane.b32.xlu1 %v7882_v36, %s5938_s24 }
 0x375   : > { %4236 = vst.msk [vmem:[#allocation3 + $0xc8] sm:$0xff] %vm1461_vm7, %v4149_v41  ;;  %3976 = vrot.lane.b32.xlu0 %v3894_v23, %s5939_s25 }
 0x376   : > { %v2615_v22 = vpop.f32.mrb[46].mxu1  ;;  %v3513_v8 = vpop.permute.xlu1 %3512 }
 0x377   : > { %v2616_v1 = vadd.f32 %v7698_v25, %v2615_v22  ;;  %v3959_v2 = vpop.permute.xlu0 %3958  ;;  %3598 = vst.msk [vmem:[#allocation3 + $0xf0] sm:$0xff] %vm1461_vm7, %v3513_v8  ;;  %v2617_v55 = vpop.f32.mrb[47].mxu1  ;;  %v7955_v40 = vld [vmem:[#allocation2 + $0x187] sm:$0xff] }
 0x378   : > { %v7957_v30 = vld [vmem:[#allocation2 + $0x188] sm:$0xff]  ;;  %4045 = vst.msk [vmem:[#allocation3 + $0xe0] sm:$0xff] %vm1268_vm6, %v3959_v2  ;;  %3342 = vrot.lane.b32.xlu1 %v7873_v45, %s5939_s25 }
 0x379   : > { %v4380_v52 = vld [vmem:[#allocation3 + $0x1c0] sm:$0xff]  ;;  %v4383_v7 = vld [vmem:[#allocation3 + $0x1d8] sm:$0xff]  ;;  %3036 = vst.msk [vmem:[#allocation3 + $0x240] sm:$0xff] %vm342_vm2, %v7955_v40  ;;  %3674 = vst.msk [vmem:[#allocation3 + $0x218] sm:$0xff] %vm342_vm2, %v7957_v30  ;;  %v2841_v19 = vadd.f32 %v7372_v46, %v2616_v1  ;;  %4168 = vrot.lane.b32.xlu0 %v7916_v37, %s5941_s23 }
 0x37a   : > { %5641 = vmatprep.mubr.msk.f32.mxu1 %vm342_vm2, %v4380_v52  ;;  %v3133_v3 = vpop.permute.xlu1 %3132  ;;  %v4348_v46 = vld [vmem:[#allocation3 + $0xc0] sm:$0xff] }
 0x37b   : > { %5642 = vmatmul.mubr.msk.f32.gmra.mrb[82].mxu1 %vm342_vm2, %v4383_v7  ;;  %v2907_v36 = vmul.f32 0.01, %v2841_v19  ;;  %v4151_v10 = vpop.permute.xlu0 %4150  ;;  %3216 = vst.msk [vmem:[#allocation3 + $0x120] sm:$0xff] %vm1075_vm5, %v3133_v3 }
 0x37c   : > { %v4349_v26 = vld [vmem:[#allocation3 + $0xc8] sm:$0xff]  ;;  %4237 = vst.msk [vmem:[#allocation3 + $0xe0] sm:$0xff] %vm1461_vm7, %v4151_v10  ;;  %3532 = vrot.lane.b32.xlu1 %v3894_v23, %s5941_s23 }
 0x37d   : > { %4663 = vmatprep.mubr.f32.mxu0 %v4349_v26  ;;  %v2939_v15 = vmax.f32 %v2841_v19, %v2907_v36  ;;  %3978 = vrot.lane.b32.xlu0 %v7932_v39, %s5939_s25 }
 0x37e   : > { %4664 = vmatmul.mubr.f32.gmra.mrb[80].mxu0 %v4348_v46  ;;  %v3515_v45 = vpop.permute.xlu1 %3514  ;;  %v4354_v58 = vld [vmem:[#allocation3 + $0xf0] sm:$0xff] }
 0x37f   : > { %2971 = vst.msk [vmem:[#allocation2 + $0x190] sm:$0xff] %vm342_vm2, %v2939_v15  ;;  %v3769_v6 = vpop.permute.xlu0 %3768  ;;  %v2620_v57 = vpop.f32.mrb[48].mxu1 }
 0x380   : > { %3599 = vst.msk [vmem:[#allocation3 + $0x108] sm:$0xff] %vm1461_vm7, %v3515_v45  ;;  %v2621_v13 = vadd.f32 %v7698_v25, %v2620_v57  ;;  %v2622_v61 = vpop.f32.mrb[49].mxu1  ;;  %3152 = vrot.lane.b32.xlu1 %v7916_v37, %s5938_s24 }
 0x381   : > { %3854 = vst.msk [vmem:[#allocation3 + $0xf8] sm:$0xff] %vm1075_vm5, %v3769_v6  ;;  %4170 = vrot.lane.b32.xlu0 %v7942_v38, %s5941_s23 }
 0x382   : > { %v2846_v43 = vadd.f32 %v7418_v21, %v2621_v13  ;;  %v3325_v60 = vpop.permute.xlu1 %3324 }
 0x383   : > { %v3771_v24 = vpop.permute.xlu0 %3770  ;;  %3408 = vst.msk [vmem:[#allocation3 + $0x120] sm:$0xff] %vm1268_vm6, %v3325_v60  ;;  %v4352_v28 = vld [vmem:[#allocation3 + $0xe0] sm:$0xff] }
 0x384   : > { %v2908_v34 = vmul.f32 0.01, %v2846_v43  ;;  %3855 = vst.msk [vmem:[#allocation3 + $0x110] sm:$0xff] %vm1075_vm5, %v3771_v24  ;;  %4668 = vmatprep.mubr.f32.mxu0 %v4352_v28  ;;  %3534 = vrot.lane.b32.xlu1 %v7932_v39, %s5941_s23 }
 0x385   : > { %3788 = vrot.lane.b32.xlu0 %v7928_v32, %s5938_s24  ;;  %4669 = vmatmul.mubr.f32.gmra.mrb[82].mxu0 %v4351_v33 }
 0x386   : > { %v2940_v62 = vmax.f32 %v2846_v43, %v2908_v34  ;;  %v3135_v21 = vpop.permute.xlu1 %3134  ;;  %v7991_v12 = vld [vmem:[#allocation2 + $0x189] sm:$0xff]  ;;  %v7993_v0 = vld [vmem:[#allocation2 + $0x191] sm:$0xff]  ;;  %v8106_v34 = vld [vmem:[%s8650_s4] ss:$0 sm:$0xff] }
 0x387   : > { %v7995_v51 = vld [vmem:[#allocation2 + $0x18f] sm:$0xff]  ;;  %v3961_v17 = vpop.permute.xlu0 %3960  ;;  %3217 = vst.msk [vmem:[#allocation3 + $0x138] sm:$0xff] %vm1075_vm5, %v3135_v21 }
 0x388   : > { %4312 = vst.msk [vmem:[#allocation3 + $0x1f0] sm:$0xff] %vm342_vm2, %v7991_v12  ;;  %4313 = vst.msk [vmem:[#allocation3 + $0x208] sm:$0xff] %vm342_vm2, %v7993_v0  ;;  %v8002_v63 = vld [vmem:[#allocation2 + $0x190] sm:$0xff]  ;;  %3344 = vrot.lane.b32.xlu1 %v7928_v32, %s5939_s25 }
 0x389   : > { %3037 = vst.msk [vmem:[#allocation3 + $0x258] sm:$0xff] %vm342_vm2, %v7995_v51  ;;  %2972 = vst.msk [vmem:[#allocation2 + $0x1a8] sm:$0xff] %vm342_vm2, %v2940_v62  ;;  %3790 = vrot.lane.b32.xlu0 %v7930_v27, %s5938_s24 }
 0x38a   : > { %4046 = vst.msk [vmem:[#allocation3 + $0xf8] sm:$0xff] %vm1268_vm6, %v3961_v17  ;;  %v2625_v35 = vpop.f32.mrb[50].mxu1  ;;  %v3327_v11 = vpop.permute.xlu1 %3326 }
 0x38b   : > { %3675 = vst.msk [vmem:[#allocation3 + $0x230] sm:$0xff] %vm342_vm2, %v8002_v63  ;;  %v2626_v54 = vadd.f32 %v7698_v25, %v2625_v35  ;;  %v4153_v31 = vpop.permute.xlu0 %4152  ;;  %v2627_v50 = vpop.f32.mrb[51].mxu1 }
 0x38c   : > { %3409 = vst.msk [vmem:[#allocation3 + $0x138] sm:$0xff] %vm1268_vm6, %v3327_v11  ;;  %3154 = vrot.lane.b32.xlu1 %v7942_v38, %s5938_s24 }
 0x38d   : > { %4238 = vst.msk [vmem:[#allocation3 + $0xf8] sm:$0xff] %vm1461_vm7, %v4153_v31  ;;  %v2851_v42 = vadd.f32 %v7413_v16, %v2626_v54  ;;  %3980 = vrot.lane.b32.xlu0 %v7955_v40, %s5939_s25 }
 0x38e   : > { %v3517_v4 = vpop.permute.xlu1 %3516 }
 0x38f   : > { %v4386_v14 = vld [vmem:[#allocation3 + $0x1f0] sm:$0xff]  ;;  %v4389_v49 = vld [vmem:[#allocation3 + $0x208] sm:$0xff]  ;;  %v2909_v56 = vmul.f32 0.01, %v2851_v42  ;;  %v3963_v23 = vpop.permute.xlu0 %3962  ;;  %3600 = vst.msk [vmem:[#allocation3 + $0x120] sm:$0xff] %vm1461_vm7, %v3517_v4 }
 0x390   : > { %5644 = vmatprep.mubr.msk.f32.mxu1 %vm342_vm2, %v4386_v14  ;;  %v8024_v37 = vld [vmem:[#allocation2 + $0x1a7] sm:$0xff]  ;;  %4047 = vst.msk [vmem:[#allocation3 + $0x110] sm:$0xff] %vm1268_vm6, %v3963_v23  ;;  %3346 = vrot.lane.b32.xlu1 %v7930_v27, %s5939_s25 }
 0x391   : > { %v8026_v9 = vld [vmem:[#allocation2 + $0x1a8] sm:$0xff]  ;;  %5645 = vmatmul.mubr.msk.f32.gmra.mrb[84].mxu1 %vm342_vm2, %v4389_v49  ;;  %3038 = vst.msk [vmem:[#allocation3 + $0x270] sm:$0xff] %vm342_vm2, %v8024_v37  ;;  %v2941_v16 = vmax.f32 %v2851_v42, %v2909_v56  ;;  %4172 = vrot.lane.b32.xlu0 %v7957_v30, %s5941_s23 }
 0x392   : > { %3676 = vst.msk [vmem:[#allocation3 + $0x248] sm:$0xff] %vm342_vm2, %v8026_v9  ;;  %v3137_v29 = vpop.permute.xlu1 %3136 }
 0x393   : > { %2973 = vst.msk [vmem:[#allocation2 + $0x1b0] sm:$0xff] %vm342_vm2, %v2941_v16  ;;  %v4155_v47 = vpop.permute.xlu0 %4154  ;;  %v2630_v59 = vpop.f32.mrb[52].mxu1 }
 0x394   : > { %3218 = vst.msk [vmem:[#allocation3 + $0x150] sm:$0xff] %vm1075_vm5, %v3137_v29  ;;  %v4355_v32 = vld [vmem:[#allocation3 + $0xf8] sm:$0xff]  ;;  %v2631_v39 = vadd.f32 %v7698_v25, %v2630_v59  ;;  %v2632_v38 = vpop.f32.mrb[53].mxu1  ;;  %3536 = vrot.lane.b32.xlu1 %v7955_v40, %s5941_s23 }
 0x395   : > { %4239 = vst.msk [vmem:[#allocation3 + $0x110] sm:$0xff] %vm1461_vm7, %v4155_v47  ;;  %4673 = vmatprep.mubr.f32.mxu0 %v4355_v32  ;;  %3982 = vrot.lane.b32.xlu0 %v7995_v51, %s5939_s25 }
 0x396   : > { %4674 = vmatmul.mubr.f32.gmra.mrb[84].mxu0 %v4354_v58  ;;  %v2856_v27 = vadd.f32 %v7437_v18, %v2631_v39  ;;  %v3519_v41 = vpop.permute.xlu1 %3518  ;;  %v4360_v35 = vld [vmem:[#allocation3 + $0x120] sm:$0xff] }
 0x397   : > { %v3773_v22 = vpop.permute.xlu0 %3772  ;;  %3601 = vst.msk [vmem:[#allocation3 + $0x138] sm:$0xff] %vm1461_vm7, %v3519_v41 }
 0x398   : > { %v2910_v8 = vmul.f32 0.01, %v2856_v27  ;;  %3856 = vst.msk [vmem:[#allocation3 + $0x128] sm:$0xff] %vm1075_vm5, %v3773_v22  ;;  %3156 = vrot.lane.b32.xlu1 %v7957_v30, %s5938_s24  ;;  %v4357_v30 = vld [vmem:[#allocation3 + $0x108] sm:$0xff] }
 0x399   : > { %4174 = vrot.lane.b32.xlu0 %v8002_v63, %s5941_s23 }
 0x39a   : > { %v2942_v1 = vmax.f32 %v2856_v27, %v2910_v8  ;;  %v3329_v2 = vpop.permute.xlu1 %3328  ;;  %v8053_v55 = vld [vmem:[#allocation2 + $0x1a9] sm:$0xff]  ;;  %v8055_v18 = vld [vmem:[#allocation2 + $0x1b1] sm:$0xff] }
 0x39b   : > { %v8057_v40 = vld [vmem:[#allocation2 + $0x1af] sm:$0xff]  ;;  %v3775_v52 = vpop.permute.xlu0 %3774  ;;  %3410 = vst.msk [vmem:[#allocation3 + $0x150] sm:$0xff] %vm1268_vm6, %v3329_v2 }
 0x39c   : > { %v4358_v7 = vld [vmem:[#allocation3 + $0x110] sm:$0xff]  ;;  %4314 = vst.msk [vmem:[#allocation3 + $0x220] sm:$0xff] %vm342_vm2, %v8053_v55  ;;  %4315 = vst.msk [vmem:[#allocation3 + $0x238] sm:$0xff] %vm342_vm2, %v8055_v18  ;;  %3538 = vrot.lane.b32.xlu1 %v7995_v51, %s5941_s23 }
 0x39d   : > { %v8064_v19 = vld [vmem:[#allocation2 + $0x1b0] sm:$0xff]  ;;  %3039 = vst.msk [vmem:[#allocation3 + $0x288] sm:$0xff] %vm342_vm2, %v8057_v40  ;;  %2974 = vst.msk [vmem:[#allocation2 + $0x1c8] sm:$0xff] %vm342_vm2, %v2942_v1  ;;  %4678 = vmatprep.mubr.f32.mxu0 %v4358_v7  ;;  %3792 = vrot.lane.b32.xlu0 %v7991_v12, %s5938_s24 }
 0x39e   : > { %3857 = vst.msk [vmem:[#allocation3 + $0x140] sm:$0xff] %vm1075_vm5, %v3775_v52  ;;  %4679 = vmatmul.mubr.f32.gmra.mrb[86].mxu0 %v4357_v30  ;;  %v2635_v3 = vpop.f32.mrb[54].mxu1  ;;  %v3139_v36 = vpop.permute.xlu1 %3138  ;;  %v4363_v16 = vld [vmem:[#allocation3 + $0x138] sm:$0xff] }
 0x39f   : > { %3677 = vst.msk [vmem:[#allocation3 + $0x260] sm:$0xff] %vm342_vm2, %v8064_v19  ;;  %v2636_v10 = vadd.f32 %v7698_v25, %v2635_v3  ;;  %v3965_v26 = vpop.permute.xlu0 %3964  ;;  %v2637_v46 = vpop.f32.mrb[55].mxu1 }
 0x3a0   : > { %3219 = vst.msk [vmem:[#allocation3 + $0x168] sm:$0xff] %vm1075_vm5, %v3139_v36  ;;  %3348 = vrot.lane.b32.xlu1 %v7991_v12, %s5939_s25 }
 0x3a1   : > { %4048 = vst.msk [vmem:[#allocation3 + $0x128] sm:$0xff] %vm1268_vm6, %v3965_v26  ;;  %v2861_v15 = vadd.f32 %v7432_v5, %v2636_v10  ;;  %3794 = vrot.lane.b32.xlu0 %v7993_v0, %s5938_s24 }
 0x3a2   : > { %v3331_v45 = vpop.permute.xlu1 %3330 }
 0x3a3   : > { %v4392_v6 = vld [vmem:[#allocation3 + $0x220] sm:$0xff]  ;;  %v4395_v57 = vld [vmem:[#allocation3 + $0x238] sm:$0xff]  ;;  %v2911_v13 = vmul.f32 0.01, %v2861_v15  ;;  %v4157_v61 = vpop.permute.xlu0 %4156  ;;  %3411 = vst.msk [vmem:[#allocation3 + $0x168] sm:$0xff] %vm1268_vm6, %v3331_v45 }
 0x3a4   : > { %5647 = vmatprep.mubr.msk.f32.mxu1 %vm342_vm2, %v4392_v6  ;;  %v8086_v25 = vld [vmem:[#allocation2 + $0x1c7] sm:$0xff]  ;;  %4240 = vst.msk [vmem:[#allocation3 + $0x128] sm:$0xff] %vm1461_vm7, %v4157_v61  ;;  %3158 = vrot.lane.b32.xlu1 %v8002_v63, %s5938_s24 }
 0x3a5   : > { %v8088_v43 = vld [vmem:[#allocation2 + $0x1c8] sm:$0xff]  ;;  %5648 = vmatmul.mubr.msk.f32.gmra.mrb[86].mxu1 %vm342_vm2, %v4395_v57  ;;  %3040 = vst.msk [vmem:[#allocation3 + $0x2a0] sm:$0xff] %vm342_vm2, %v8086_v25  ;;  %v2943_v5 = vmax.f32 %v2861_v15, %v2911_v13  ;;  %3984 = vrot.lane.b32.xlu0 %v8024_v37, %s5939_s25 }
 0x3a6   : > { %3678 = vst.msk [vmem:[#allocation3 + $0x278] sm:$0xff] %vm342_vm2, %v8088_v43  ;;  %v3521_v60 = vpop.permute.xlu1 %3520 }
 0x3a7   : > { %2975 = vst.msk [vmem:[#allocation2 + $0x1d0] sm:$0xff] %vm342_vm2, %v2943_v5  ;;  %v3967_v24 = vpop.permute.xlu0 %3966  ;;  %v2640_v28 = vpop.f32.mrb[56].mxu1 }
 0x3a8   : > { %3602 = vst.msk [vmem:[#allocation3 + $0x150] sm:$0xff] %vm1461_vm7, %v3521_v60  ;;  %v2641_v33 = vadd.f32 %v8106_v34, %v2640_v28  ;;  %v2642_v62 = vpop.f32.mrb[57].mxu1  ;;  %3350 = vrot.lane.b32.xlu1 %v7993_v0, %s5939_s25 }
 0x3a9   : > { %4049 = vst.msk [vmem:[#allocation3 + $0x140] sm:$0xff] %vm1268_vm6, %v3967_v24  ;;  %4176 = vrot.lane.b32.xlu0 %v8026_v9, %s5941_s23 }
 0x3aa   : > { %v2866_v21 = vadd.f32 %v7586_v20, %v2641_v33  ;;  %v3141_v12 = vpop.permute.xlu1 %3140 }
 0x3ab   : > { %v4159_v51 = vpop.permute.xlu0 %4158  ;;  %3220 = vst.msk [vmem:[#allocation3 + $0x180] sm:$0xff] %vm1075_vm5, %v3141_v12  ;;  %v4361_v17 = vld [vmem:[#allocation3 + $0x128] sm:$0xff] }
 0x3ac   : > { %v2912_v63 = vmul.f32 0.01, %v2866_v21  ;;  %4241 = vst.msk [vmem:[#allocation3 + $0x140] sm:$0xff] %vm1461_vm7, %v4159_v51  ;;  %4683 = vmatprep.mubr.f32.mxu0 %v4361_v17  ;;  %3540 = vrot.lane.b32.xlu1 %v8024_v37, %s5941_s23 }
 0x3ad   : > { %3986 = vrot.lane.b32.xlu0 %v8057_v40, %s5939_s25  ;;  %4684 = vmatmul.mubr.f32.gmra.mrb[88].mxu0 %v4360_v35 }
 0x3ae   : > { %v2944_v11 = vmax.f32 %v2866_v21, %v2912_v63  ;;  %v3523_v20 = vpop.permute.xlu1 %3522  ;;  %v8120_v0 = vld [vmem:[#allocation2 + $0x1c9] sm:$0xff]  ;;  %v8122_v54 = vld [vmem:[#allocation2 + $0x1d1] sm:$0xff] }
 0x3af   : > { %v8124_v31 = vld [vmem:[#allocation2 + $0x1cf] sm:$0xff]  ;;  %v3777_v50 = vpop.permute.xlu0 %3776  ;;  %3603 = vst.msk [vmem:[#allocation3 + $0x168] sm:$0xff] %vm1461_vm7, %v3523_v20 }
 0x3b0   : > { %4316 = vst.msk [vmem:[#allocation3 + $0x250] sm:$0xff] %vm342_vm2, %v8120_v0  ;;  %4317 = vst.msk [vmem:[#allocation3 + $0x268] sm:$0xff] %vm342_vm2, %v8122_v54  ;;  %v8131_v42 = vld [vmem:[#allocation2 + $0x1d0] sm:$0xff]  ;;  %3160 = vrot.lane.b32.xlu1 %v8026_v9, %s5938_s24 }
 0x3b1   : > { %3041 = vst.msk [vmem:[#allocation3 + $0x2b8] sm:$0xff] %vm342_vm2, %v8124_v31  ;;  %2976 = vst.msk [vmem:[#allocation2 + $0x1e8] sm:$0xff] %vm342_vm2, %v2944_v11  ;;  %4178 = vrot.lane.b32.xlu0 %v8064_v19, %s5941_s23 }
 0x3b2   : > { %3858 = vst.msk [vmem:[#allocation3 + $0x158] sm:$0xff] %vm1075_vm5, %v3777_v50  ;;  %v2645_v4 = vpop.f32.mrb[58].mxu1  ;;  %v3333_v14 = vpop.permute.xlu1 %3332 }
 0x3b3   : > { %3679 = vst.msk [vmem:[#allocation3 + $0x290] sm:$0xff] %vm342_vm2, %v8131_v42  ;;  %v2646_v49 = vadd.f32 %v8106_v34, %v2645_v4  ;;  %v3779_v56 = vpop.permute.xlu0 %3778  ;;  %v2647_v23 = vpop.f32.mrb[59].mxu1  ;;  %v4364_v37 = vld [vmem:[#allocation3 + $0x140] sm:$0xff] }
 0x3b4   : > { %3412 = vst.msk [vmem:[#allocation3 + $0x180] sm:$0xff] %vm1268_vm6, %v3333_v14  ;;  %4688 = vmatprep.mubr.f32.mxu0 %v4364_v37  ;;  %3542 = vrot.lane.b32.xlu1 %v8057_v40, %s5941_s23 }
 0x3b5   : > { %3859 = vst.msk [vmem:[#allocation3 + $0x170] sm:$0xff] %vm1075_vm5, %v3779_v56  ;;  %v2871_v29 = vadd.f32 %v7584_v48, %v2646_v49  ;;  %3796 = vrot.lane.b32.xlu0 %v8053_v55, %s5938_s24  ;;  %4689 = vmatmul.mubr.f32.gmra.mrb[90].mxu0 %v4363_v16 }
 0x3b6   : > { %v3143_v9 = vpop.permute.xlu1 %3142  ;;  %v4369_v62 = vld [vmem:[#allocation3 + $0x168] sm:$0xff] }
 0x3b7   : > { %v4398_v47 = vld [vmem:[#allocation3 + $0x250] sm:$0xff]  ;;  %v4401_v59 = vld [vmem:[#allocation3 + $0x268] sm:$0xff]  ;;  %v2913_v32 = vmul.f32 0.01, %v2871_v29  ;;  %v3969_v39 = vpop.permute.xlu0 %3968  ;;  %3221 = vst.msk [vmem:[#allocation3 + $0x198] sm:$0xff] %vm1075_vm5, %v3143_v9 }
 0x3b8   : > { %5650 = vmatprep.mubr.msk.f32.mxu1 %vm342_vm2, %v4398_v47  ;;  %v8153_v38 = vld [vmem:[#allocation2 + $0x1e7] sm:$0xff]  ;;  %4050 = vst.msk [vmem:[#allocation3 + $0x158] sm:$0xff] %vm1268_vm6, %v3969_v39  ;;  %3352 = vrot.lane.b32.xlu1 %v8053_v55, %s5939_s25 }
 0x3b9   : > { %v8155_v58 = vld [vmem:[#allocation2 + $0x1e8] sm:$0xff]  ;;  %5651 = vmatmul.mubr.msk.f32.gmra.mrb[88].mxu1 %vm342_vm2, %v4401_v59  ;;  %3042 = vst.msk [vmem:[#allocation3 + $0x2d0] sm:$0xff] %vm342_vm2, %v8153_v38  ;;  %v2945_v48 = vmax.f32 %v2871_v29, %v2913_v32  ;;  %3798 = vrot.lane.b32.xlu0 %v8055_v18, %s5938_s24 }
 0x3ba   : > { %3680 = vst.msk [vmem:[#allocation3 + $0x2a8] sm:$0xff] %vm342_vm2, %v8155_v58  ;;  %v3335_v27 = vpop.permute.xlu1 %3334 }
 0x3bb   : > { %2977 = vst.msk [vmem:[#allocation2 + $0x1f0] sm:$0xff] %vm342_vm2, %v2945_v48  ;;  %v4161_v41 = vpop.permute.xlu0 %4160  ;;  %v2650_v22 = vpop.f32.mrb[60].mxu1 }
 0x3bc   : > { %3413 = vst.msk [vmem:[#allocation3 + $0x198] sm:$0xff] %vm1268_vm6, %v3335_v27  ;;  %v2651_v8 = vadd.f32 %v8106_v34, %v2650_v22  ;;  %v2652_v1 = vpop.f32.mrb[61].mxu1  ;;  %3544 = vrot.lane.b32.xlu1 %v8086_v25, %s5941_s23 }
 0x3bd   : > { %4242 = vst.msk [vmem:[#allocation3 + $0x158] sm:$0xff] %vm1461_vm7, %v4161_v41  ;;  %3988 = vrot.lane.b32.xlu0 %v8086_v25, %s5939_s25 }
 0x3be   : > { %v2876_v2 = vadd.f32 %v7810_v53, %v2651_v8  ;;  %v3525_v55 = vpop.permute.xlu1 %3524 }
 0x3bf   : > { %v3971_v40 = vpop.permute.xlu0 %3970  ;;  %3604 = vst.msk [vmem:[#allocation3 + $0x180] sm:$0xff] %vm1461_vm7, %v3525_v55 }
 0x3c0   : > { %v2914_v52 = vmul.f32 0.01, %v2876_v2  ;;  %4051 = vst.msk [vmem:[#allocation3 + $0x170] sm:$0xff] %vm1268_vm6, %v3971_v40  ;;  %3162 = vrot.lane.b32.xlu1 %v8064_v19, %s5938_s24  ;;  %v4366_v19 = vld [vmem:[#allocation3 + $0x150] sm:$0xff] }
 0x3c1   : > { %4180 = vrot.lane.b32.xlu0 %v8088_v43, %s5941_s23 }
 0x3c2   : > { %v2946_v7 = vmax.f32 %v2876_v2, %v2914_v52  ;;  %v3145_v30 = vpop.permute.xlu1 %3144  ;;  %v8182_v3 = vld [vmem:[#allocation2 + $0x1e9] sm:$0xff]  ;;  %v8184_v36 = vld [vmem:[#allocation2 + $0x1f1] sm:$0xff] }
 0x3c3   : > { %v8186_v53 = vld [vmem:[#allocation2 + $0x1ef] sm:$0xff]  ;;  %v4163_v10 = vpop.permute.xlu0 %4162  ;;  %3222 = vst.msk [vmem:[#allocation3 + $0x1b0] sm:$0xff] %vm1075_vm5, %v3145_v30 }
 0x3c4   : > { %v4367_v26 = vld [vmem:[#allocation3 + $0x158] sm:$0xff]  ;;  %4318 = vst.msk [vmem:[#allocation3 + $0x280] sm:$0xff] %vm342_vm2, %v8182_v3  ;;  %4319 = vst.msk [vmem:[#allocation3 + $0x298] sm:$0xff] %vm342_vm2, %v8184_v36  ;;  %v8193_v46 = vld [vmem:[#allocation2 + $0x1f0] sm:$0xff]  ;;  %3354 = vrot.lane.b32.xlu1 %v8055_v18, %s5939_s25 }
 0x3c5   : > { %3043 = vst.msk [vmem:[#allocation3 + $0x2e8] sm:$0xff] %vm342_vm2, %v8186_v53  ;;  %2978 = vst.msk [vmem:[#allocation2 + $0x208] sm:$0xff] %vm342_vm2, %v2946_v7  ;;  %4693 = vmatprep.mubr.f32.mxu0 %v4367_v26  ;;  %3990 = vrot.lane.b32.xlu0 %v8124_v31, %s5939_s25 }
 0x3c6   : > { %4243 = vst.msk [vmem:[#allocation3 + $0x170] sm:$0xff] %vm1461_vm7, %v4163_v10  ;;  %4694 = vmatmul.mubr.f32.gmra.mrb[92].mxu0 %v4366_v19  ;;  %v2655_v15 = vpop.f32.mrb[62].mxu1  ;;  %v3527_v45 = vpop.permute.xlu1 %3526  ;;  %v4372_v9 = vld [vmem:[#allocation3 + $0x180] sm:$0xff] }
 0x3c7   : > { %3681 = vst.msk [vmem:[#allocation3 + $0x2c0] sm:$0xff] %vm342_vm2, %v8193_v46  ;;  %v2656_v6 = vadd.f32 %v8106_v34, %v2655_v15  ;;  %v3781_v57 = vpop.permute.xlu0 %3780  ;;  %v2657_v13 = vpop.f32.mrb[63].mxu1 }
 0x3c8   : > { %3605 = vst.msk [vmem:[#allocation3 + $0x198] sm:$0xff] %vm1461_vm7, %v3527_v45  ;;  %3546 = vrot.lane.b32.xlu1 %v8124_v31, %s5941_s23 }
 0x3c9   : > { %3860 = vst.msk [vmem:[#allocation3 + $0x188] sm:$0xff] %vm1075_vm5, %v3781_v57  ;;  %v2881_v61 = vadd.f32 %v7808_v44, %v2656_v6  ;;  %4182 = vrot.lane.b32.xlu0 %v8131_v42, %s5941_s23 }
 0x3ca   : > { %v8213_v25 = vpop.f32.mrb[64].mxu1  ;;  %v3337_v18 = vpop.permute.xlu1 %3336 }
 0x3cb   : > { %v4404_v5 = vld [vmem:[#allocation3 + $0x280] sm:$0xff]  ;;  %v4407_v60 = vld [vmem:[#allocation3 + $0x298] sm:$0xff]  ;;  %v2915_v24 = vmul.f32 0.01, %v2881_v61  ;;  %v3783_v28 = vpop.permute.xlu0 %3782  ;;  %3414 = vst.msk [vmem:[#allocation3 + $0x1b0] sm:$0xff] %vm1268_vm6, %v3337_v18  ;;  %v8216_v33 = vpop.f32.mrb[65].mxu1 }
 0x3cc   : > { %5653 = vmatprep.mubr.msk.f32.mxu1 %vm342_vm2, %v4404_v5  ;;  %v8219_v44 = vld [vmem:[#allocation2 + $0x208] sm:$0xff]  ;;  %3861 = vst.msk [vmem:[#allocation3 + $0x1a0] sm:$0xff] %vm1075_vm5, %v3783_v28  ;;  %3164 = vrot.lane.b32.xlu1 %v8088_v43, %s5938_s24 }
 0x3cd   : > { %v4370_v34 = vld [vmem:[#allocation3 + $0x170] sm:$0xff]  ;;  %5654 = vmatmul.mubr.msk.f32.gmra.mrb[90].mxu1 %vm342_vm2, %v4407_v60  ;;  %3682 = vst.msk [vmem:[#allocation3 + $0x2d8] sm:$0xff] %vm342_vm2, %v8219_v44  ;;  %v2947_v21 = vmax.f32 %v2881_v61, %v2915_v24  ;;  %3800 = vrot.lane.b32.xlu0 %v8120_v0, %s5938_s24  ;;  %v3904_v8 = vld [vmem:[#allocation2 + $0x207] sm:$0xff] }
 0x3ce   : > { %4698 = vmatprep.mubr.f32.mxu0 %v4370_v34  ;;  %v8229_v12 = vpop.f32.mrb[66].mxu1  ;;  %v3147_v51 = vpop.permute.xlu1 %3146  ;;  %v3906_v34 = vld [vmem:[#allocation2 + $0x227] sm:$0xff] }
 0x3cf   : > { %4699 = vmatmul.mubr.f32.gmra.mrb[94].mxu0 %v4369_v62  ;;  %2979 = vst.msk [vmem:[#allocation2 + $0x210] sm:$0xff] %vm342_vm2, %v2947_v21  ;;  %v3973_v17 = vpop.permute.xlu0 %3972  ;;  %v8233_v63 = vpop.f32.mrb[67].mxu1  ;;  %v4375_v27 = vld [vmem:[#allocation3 + $0x198] sm:$0xff]  ;;  %v4098_v62 = vld [vmem:[#allocation2 + $0x228] sm:$0xff] }
 0x3d0   : > { %3223 = vst.msk [vmem:[#allocation3 + $0x1c8] sm:$0xff] %vm1075_vm5, %v3147_v51  ;;  %3356 = vrot.lane.b32.xlu1 %v8120_v0, %s5939_s25  ;;  %v4419_v21 = vld [vmem:[#allocation3 + $0x2f8] sm:$0xff] }
 0x3d1   : > { %4052 = vst.msk [vmem:[#allocation3 + $0x188] sm:$0xff] %vm1268_vm6, %v3973_v17  ;;  %3802 = vrot.lane.b32.xlu0 %v8122_v54, %s5938_s24 }
 0x3d2   : > { %v8240_v35 = vpop.f32.mrb[68].mxu1  ;;  %v3339_v43 = vpop.permute.xlu1 %3338 }
 0x3d3   : > { %v4165_v11 = vpop.permute.xlu0 %4164  ;;  %3415 = vst.msk [vmem:[#allocation3 + $0x1c8] sm:$0xff] %vm1268_vm6, %v3339_v43  ;;  %v8243_v20 = vpop.f32.mrb[69].mxu1 }
 0x3d4   : > { %4244 = vst.msk [vmem:[#allocation3 + $0x188] sm:$0xff] %vm1461_vm7, %v4165_v11  ;;  %3548 = vrot.lane.b32.xlu1 %v8153_v38, %s5941_s23 }
 0x3d5   : > { %3992 = vrot.lane.b32.xlu0 %v8153_v38, %s5939_s25 }
 0x3d6   : > { %v8250_v31 = vpop.f32.mrb[70].mxu1  ;;  %v8252_v50 = vld [vmem:[#allocation2 + $0x209] sm:$0xff]  ;;  %v8254_v0 = vld [vmem:[#allocation2 + $0x211] sm:$0xff]  ;;  %v3529_v14 = vpop.permute.xlu1 %3528 }
 0x3d7   : > { %v3975_v4 = vpop.permute.xlu0 %3974  ;;  %4320 = vst.msk [vmem:[#allocation3 + $0x2b0] sm:$0xff] %vm342_vm2, %v8252_v50  ;;  %4321 = vst.msk [vmem:[#allocation3 + $0x2c8] sm:$0xff] %vm342_vm2, %v8254_v0  ;;  %v8260_v49 = vld [vmem:[#allocation2 + $0x210] sm:$0xff]  ;;  %v8264_v56 = vpop.f32.mrb[71].mxu1 }
 0x3d8   : > { %4053 = vst.msk [vmem:[#allocation3 + $0x1a0] sm:$0xff] %vm1268_vm6, %v3975_v4  ;;  %3166 = vrot.lane.b32.xlu1 %v8131_v42, %s5938_s24  ;;  %v3905_v15 = vld [vmem:[#allocation2 + $0x20f] sm:$0xff] }
 0x3d9   : > { %3606 = vst.msk [vmem:[#allocation3 + $0x1b0] sm:$0xff] %vm1461_vm7, %v3529_v14  ;;  %4184 = vrot.lane.b32.xlu0 %v8155_v58, %s5941_s23 }
 0x3da   : > { %3683 = vst.msk [vmem:[#allocation3 + $0x2f0] sm:$0xff] %vm342_vm2, %v8260_v49  ;;  %v3149_v37 = vpop.permute.xlu1 %3148 }
 0x3db   : > { %v4167_v23 = vpop.permute.xlu0 %4166  ;;  %v4373_v16 = vld [vmem:[#allocation3 + $0x188] sm:$0xff]  ;;  %3224 = vst.msk [vmem:[#allocation3 + $0x1e0] sm:$0xff] %vm1075_vm5, %v3149_v37 }
 0x3dc   : > { %4245 = vst.msk [vmem:[#allocation3 + $0x1a0] sm:$0xff] %vm1461_vm7, %v4167_v23  ;;  %4703 = vmatprep.mubr.f32.mxu0 %v4373_v16  ;;  %3358 = vrot.lane.b32.xlu1 %v8122_v54, %s5939_s25 }
 0x3dd   : > { %v8274_v29 = vpop.f32.mrb[72].mxu1  ;;  %3994 = vrot.lane.b32.xlu0 %v8186_v53, %s5939_s25  ;;  %4704 = vmatmul.mubr.f32.gmra.mrb[96].mxu0 %v4372_v9 }
 0x3de   : > { %v8278_v47 = vpop.f32.mrb[73].mxu1  ;;  %v4410_v42 = vld [vmem:[#allocation3 + $0x2b0] sm:$0xff]  ;;  %v4413_v59 = vld [vmem:[#allocation3 + $0x2c8] sm:$0xff]  ;;  %v3531_v39 = vpop.permute.xlu1 %3530 }
 0x3df   : > { %v3785_v32 = vpop.permute.xlu0 %3784  ;;  %5656 = vmatprep.mubr.msk.f32.mxu1 %vm342_vm2, %v4410_v42  ;;  %3607 = vst.msk [vmem:[#allocation3 + $0x1c8] sm:$0xff] %vm1461_vm7, %v3531_v39 }
 0x3e0   : > { %3862 = vst.msk [vmem:[#allocation3 + $0x1b8] sm:$0xff] %vm1075_vm5, %v3785_v32  ;;  %5657 = vmatmul.mubr.msk.f32.gmra.mrb[92].mxu1 %vm342_vm2, %v4413_v59  ;;  %3550 = vrot.lane.b32.xlu1 %v8186_v53, %s5941_s23  ;;  %v4378_v45 = vld [vmem:[#allocation3 + $0x1b0] sm:$0xff] }
 0x3e1   : > { %4186 = vrot.lane.b32.xlu0 %v8193_v46, %s5941_s23  ;;  %v4099_v32 = vld [vmem:[#allocation2 + $0x230] sm:$0xff] }
 0x3e2   : > { %v3341_v54 = vpop.permute.xlu1 %3340 }
 0x3e3   : > { %v3787_v38 = vpop.permute.xlu0 %3786  ;;  %v4376_v48 = vld [vmem:[#allocation3 + $0x1a0] sm:$0xff]  ;;  %3416 = vst.msk [vmem:[#allocation3 + $0x1e0] sm:$0xff] %vm1268_vm6, %v3341_v54 }
 0x3e4   : > { %3863 = vst.msk [vmem:[#allocation3 + $0x1d0] sm:$0xff] %vm1075_vm5, %v3787_v38  ;;  %4708 = vmatprep.mubr.f32.mxu0 %v4376_v48  ;;  %3168 = vrot.lane.b32.xlu1 %v8155_v58, %s5938_s24  ;;  %v8309_v58 = vld [vmem:[%s8652_s6] ss:$0 sm:$0xff] }
 0x3e5   : > { %3804 = vrot.lane.b32.xlu0 %v8182_v3, %s5938_s24  ;;  %4709 = vmatmul.mubr.f32.gmra.mrb[98].mxu0 %v4375_v27 }
 0x3e6   : > { %v3151_v22 = vpop.permute.xlu1 %3150  ;;  %v4381_v28 = vld [vmem:[#allocation3 + $0x1c8] sm:$0xff] }
 0x3e7   : > { %v3977_v41 = vpop.permute.xlu0 %3976  ;;  %3225 = vst.msk [vmem:[#allocation3 + $0x1f8] sm:$0xff] %vm1075_vm5, %v3151_v22 }
 0x3e8   : > { %4054 = vst.msk [vmem:[#allocation3 + $0x1b8] sm:$0xff] %vm1268_vm6, %v3977_v41  ;;  %3360 = vrot.lane.b32.xlu1 %v8182_v3, %s5939_s25 }
 0x3e9   : > { %3996 = vrot.lane.b32.xlu0 %v3904_v8, %s5939_s25 }
 0x3ea   : > { %v3343_v2 = vpop.permute.xlu1 %3342 }
 0x3eb   : > { %v4169_v1 = vpop.permute.xlu0 %4168  ;;  %3417 = vst.msk [vmem:[#allocation3 + $0x1f8] sm:$0xff] %vm1268_vm6, %v3343_v2 }
 0x3ec   : > { %4246 = vst.msk [vmem:[#allocation3 + $0x1b8] sm:$0xff] %vm1461_vm7, %v4169_v1  ;;  %3552 = vrot.lane.b32.xlu1 %v3904_v8, %s5941_s23 }
 0x3ed   : > { %4188 = vrot.lane.b32.xlu0 %v8219_v44, %s5941_s23 }
 0x3ee   : > { %v3533_v40 = vpop.permute.xlu1 %3532 }
 0x3ef   : > { %v3979_v55 = vpop.permute.xlu0 %3978  ;;  %3608 = vst.msk [vmem:[#allocation3 + $0x1e0] sm:$0xff] %vm1461_vm7, %v3533_v40 }
 0x3f0   : > { %4055 = vst.msk [vmem:[#allocation3 + $0x1d0] sm:$0xff] %vm1268_vm6, %v3979_v55  ;;  %v4625_v52 = vpop.f32.mrb[64].mxu0  ;;  %3170 = vrot.lane.b32.xlu1 %v8193_v46, %s5938_s24 }
 0x3f1   : > { %v4626_v7 = vadd.f32 %v8309_v58, %v4625_v52  ;;  %v4627_v30 = vpop.f32.mrb[65].mxu0  ;;  %3806 = vrot.lane.b32.xlu0 %v8184_v36, %s5938_s24 }
 0x3f2   : > { %v3153_v26 = vpop.permute.xlu1 %3152 }
 0x3f3   : > { %v8319_v3 = vadd.f32 %v8216_v33, %v4626_v7  ;;  %v4171_v53 = vpop.permute.xlu0 %4170  ;;  %v4379_v10 = vld [vmem:[#allocation3 + $0x1b8] sm:$0xff]  ;;  %3226 = vst.msk [vmem:[#allocation3 + $0x210] sm:$0xff] %vm1075_vm5, %v3153_v26 }
 0x3f4   : > { %4247 = vst.msk [vmem:[#allocation3 + $0x1d0] sm:$0xff] %vm1461_vm7, %v4171_v53  ;;  %4713 = vmatprep.mubr.f32.mxu0 %v4379_v10  ;;  %3362 = vrot.lane.b32.xlu1 %v8184_v36, %s5939_s25 }
 0x3f5   : > { %v8322_v19 = vpop.f32.mrb[74].mxu1  ;;  %3998 = vrot.lane.b32.xlu0 %v3905_v15, %s5939_s25  ;;  %4714 = vmatmul.mubr.f32.gmra.mrb[100].mxu0 %v4378_v45 }
 0x3f6   : > { %v8326_v6 = vpop.f32.mrb[75].mxu1  ;;  %v3535_v57 = vpop.permute.xlu1 %3534  ;;  %v4384_v59 = vld [vmem:[#allocation3 + $0x1e0] sm:$0xff] }
 0x3f7   : > { %v3789_v46 = vpop.permute.xlu0 %3788  ;;  %3609 = vst.msk [vmem:[#allocation3 + $0x1f8] sm:$0xff] %vm1461_vm7, %v3535_v57 }
 0x3f8   : > { %3864 = vst.msk [vmem:[#allocation3 + $0x1e8] sm:$0xff] %vm1075_vm5, %v3789_v46  ;;  %v4630_v13 = vpop.f32.mrb[66].mxu0  ;;  %3554 = vrot.lane.b32.xlu1 %v3905_v15, %s5941_s23 }
 0x3f9   : > { %v4631_v61 = vadd.f32 %v8309_v58, %v4630_v13  ;;  %v4632_v18 = vpop.f32.mrb[67].mxu0  ;;  %4190 = vrot.lane.b32.xlu0 %v8260_v49, %s5941_s23  ;;  %v3907_v49 = vld [vmem:[#allocation2 + $0x22f] sm:$0xff] }
 0x3fa   : > { %v3345_v24 = vpop.permute.xlu1 %3344 }
 0x3fb   : > { %v8337_v5 = vadd.f32 %v8213_v25, %v4631_v61  ;;  %v3791_v60 = vpop.permute.xlu0 %3790  ;;  %v4382_v36 = vld [vmem:[#allocation3 + $0x1d0] sm:$0xff]  ;;  %3418 = vst.msk [vmem:[#allocation3 + $0x210] sm:$0xff] %vm1268_vm6, %v3345_v24  ;;  %v4416_v25 = vld [vmem:[#allocation3 + $0x2e0] sm:$0xff] }
 0x3fc   : > { %3865 = vst.msk [vmem:[#allocation3 + $0x200] sm:$0xff] %vm1075_vm5, %v3791_v60  ;;  %4718 = vmatprep.mubr.f32.mxu0 %v4382_v36  ;;  %5659 = vmatprep.mubr.msk.f32.mxu1 %vm342_vm2, %v4416_v25 }
 0x3fd   : > { %3808 = vrot.lane.b32.xlu0 %v8252_v50, %s5938_s24  ;;  %4719 = vmatmul.mubr.f32.gmra.mrb[102].mxu0 %v4381_v28  ;;  %v8395_v28 = vld [vmem:[%s8653_s7] ss:$0 sm:$0xff] }
 0x3fe   : > { %v3155_v44 = vpop.permute.xlu1 %3154  ;;  %5660 = vmatmul.mubr.msk.f32.gmra.mrb[94].mxu1 %vm342_vm2, %v4419_v21  ;;  %v4387_v1 = vld [vmem:[#allocation3 + $0x1f8] sm:$0xff]  ;;  %v5016_v21 = vmul.f32 %v8395_v28, %v8319_v3 }
 0x3ff   : > { %v3981_v33 = vpop.permute.xlu0 %3980  ;;  %3227 = vst.msk [vmem:[#allocation3 + $0x228] sm:$0xff] %vm1075_vm5, %v3155_v44 }
 0x400   : > { %4056 = vst.msk [vmem:[#allocation3 + $0x1e8] sm:$0xff] %vm1268_vm6, %v3981_v33 }
 0x401   : > { %4000 = vrot.lane.b32.xlu0 %v3906_v34, %s5939_s25 }
 0x402   : > { %v3347_v17 = vpop.permute.xlu1 %3346 }
 0x403   : > { %v4173_v51 = vpop.permute.xlu0 %4172  ;;  %3419 = vst.msk [vmem:[#allocation3 + $0x228] sm:$0xff] %vm1268_vm6, %v3347_v17 }
 0x404   : > { %4248 = vst.msk [vmem:[#allocation3 + $0x1e8] sm:$0xff] %vm1461_vm7, %v4173_v51 }
 0x405   : > { %4192 = vrot.lane.b32.xlu0 %v4098_v62, %s5941_s23 }
 0x406   : > { %v3537_v11 = vpop.permute.xlu1 %3536 }
 0x407   : > { %v3983_v43 = vpop.permute.xlu0 %3982  ;;  %3610 = vst.msk [vmem:[#allocation3 + $0x210] sm:$0xff] %vm1461_vm7, %v3537_v11 }
 0x408   : > { %4057 = vst.msk [vmem:[#allocation3 + $0x200] sm:$0xff] %vm1268_vm6, %v3983_v43  ;;  %v4635_v50 = vpop.f32.mrb[68].mxu0 }
 0x409   : > { %v4636_v4 = vadd.f32 %v8309_v58, %v4635_v50  ;;  %3810 = vrot.lane.b32.xlu0 %v8254_v0, %s5938_s24  ;;  %v4637_v14 = vpop.f32.mrb[69].mxu0  ;;  %s5942_s24 = smov [#allocation4]  }
 0x40a   : > { %v3157_v9 = vpop.permute.xlu1 %3156 }
 0x40b   : > { %v8357_v23 = vadd.f32 %v8233_v63, %v4636_v4  ;;  %v4175_v37 = vpop.permute.xlu0 %4174  ;;  %v4385_v16 = vld [vmem:[#allocation3 + $0x1e8] sm:$0xff]  ;;  %3228 = vst.msk [vmem:[#allocation3 + $0x240] sm:$0xff] %vm1075_vm5, %v3157_v9 }
 0x40c   : > { %4249 = vst.msk [vmem:[#allocation3 + $0x200] sm:$0xff] %vm1461_vm7, %v4175_v37  ;;  %4723 = vmatprep.mubr.f32.mxu0 %v4385_v16 }
 0x40d   : > { %v8360_v42 = vpop.f32.mrb[76].mxu1  ;;  %4002 = vrot.lane.b32.xlu0 %v3907_v49, %s5939_s25  ;;  %4724 = vmatmul.mubr.f32.gmra.mrb[104].mxu0 %v4384_v59  ;;  %v5018_v3 = vmul.f32 %v8395_v28, %v8357_v23  ;;  %s5845_s25 = sshll.u32 %s5942_s24, 4  ;;  %s5846_s25 = int_to_ptr.vmem [resolvable:$false] %s5845_s25 }
 0x40e   : > { %v8364_v0 = vpop.f32.mrb[77].mxu1  ;;  %v3539_v63 = vpop.permute.xlu1 %3538  ;;  %v4390_v57 = vld [vmem:[#allocation3 + $0x210] sm:$0xff] }
 0x40f   : > { %v3793_v39 = vpop.permute.xlu0 %3792  ;;  %3611 = vst.msk [vmem:[#allocation3 + $0x228] sm:$0xff] %vm1461_vm7, %v3539_v63 }
 0x410   : > { %3866 = vst.msk [vmem:[#allocation3 + $0x218] sm:$0xff] %vm1075_vm5, %v3793_v39  ;;  %v4640_v38 = vpop.f32.mrb[70].mxu0 }
 0x411   : > { %v4641_v54 = vadd.f32 %v8309_v58, %v4640_v38  ;;  %4194 = vrot.lane.b32.xlu0 %v4099_v32, %s5941_s23  ;;  %v4642_v48 = vpop.f32.mrb[71].mxu0  ;;  %s8559_s23 = sand.u32 1, %s5927_s10  }
 0x412   : > { %v3349_v8 = vpop.permute.xlu1 %3348  ;;  %s8656_s17 = sshll.u32 %s8559_s23, 3  ;;  %s5137_s14 = scalar_lea.sflag [#allocation5], %s8559_s23 }
 0x413   : > { %v8371_v27 = vadd.f32 %v8229_v12, %v4641_v54  ;;  %v3795_v41 = vpop.permute.xlu0 %3794  ;;  %v4388_v22 = vld [vmem:[#allocation3 + $0x200] sm:$0xff]  ;;  %3420 = vst.msk [vmem:[#allocation3 + $0x240] sm:$0xff] %vm1268_vm6, %v3349_v8  ;;  %s329_s26 = scalar_lea.vmem [#allocation4], %s8656_s17  ;;  %s5847_s17 = scalar_lea.vmem %s5846_s25, 256 }
 0x414   : > { %3867 = vst.msk [vmem:[#allocation3 + $0x230] sm:$0xff] %vm1075_vm5, %v3795_v41  ;;  %4728 = vmatprep.mubr.f32.mxu0 %v4388_v22  ;;  %s5156_s27 = sshll.u32 %s329_s26, 4  ;;  %s8572_s27 = int_to_ptr.vmem [resolvable:$true] %s5156_s27 }
 0x415   : > { %4729 = vmatmul.mubr.f32.gmra.mrb[106].mxu0 %v4387_v1  ;;  %s5841_s16 = scalar_lea.vmem %s8572_s27, 128  ;;  %p5848_p0 = scmp.lt.s32.totalorder %s8572_s27, %s5846_s25 }
 0x416   : > { %v3159_v55 = vpop.permute.xlu1 %3158  ;;  %v4393_v62 = vld [vmem:[#allocation3 + $0x228] sm:$0xff]  ;;  %p5842_p11 = scmp.ne.s32.totalorder %s8572_s27, %s5841_s16  ;;  %p5849_p1 = scmp.lt.s32.totalorder %s5847_s17, %s5841_s16 }
 0x417   : > { %v3985_v2 = vpop.permute.xlu0 %3984  ;;  %3229 = vst.msk [vmem:[#allocation3 + $0x258] sm:$0xff] %vm1075_vm5, %v3159_v55 }
 0x418   : > { %4058 = vst.msk [vmem:[#allocation3 + $0x218] sm:$0xff] %vm1268_vm6, %v3985_v2  ;;  %p5843_p12 = pnand %p5842_p11, %p6032_p5  ;;  %p5850_p2 = por %p5849_p1, %p5848_p0 }
 0x41a   : > { %v3351_v12 = vpop.permute.xlu1 %3350  ;;  %p5844_p13 = pneg %p5843_p12 }
 0x41b   : > { %v4177_v40 = vpop.permute.xlu0 %4176  ;;  %3421 = vst.msk [vmem:[#allocation3 + $0x258] sm:$0xff] %vm1268_vm6, %v3351_v12 }
 0x41c   : > { %4250 = vst.msk [vmem:[#allocation3 + $0x218] sm:$0xff] %vm1461_vm7, %v4177_v40  ;;  %p5851_p3 = pnand %p5850_p2, %p5844_p13 }
 0x41e   : > { %v3541_v7 = vpop.permute.xlu1 %3540 }
 0x41f   : > { %v3987_v52 = vpop.permute.xlu0 %3986  ;;  %3612 = vst.msk [vmem:[#allocation3 + $0x240] sm:$0xff] %vm1461_vm7, %v3541_v7 }
 0x420   : > { %4059 = vst.msk [vmem:[#allocation3 + $0x230] sm:$0xff] %vm1268_vm6, %v3987_v52  ;;  %v4645_v30 = vpop.f32.mrb[72].mxu0 }
 0x421   : > { %v4646_v53 = vadd.f32 %v8309_v58, %v4645_v30  ;;  %v4647_v10 = vpop.f32.mrb[73].mxu0 }
 0x422   : > { %v3161_v46 = vpop.permute.xlu1 %3160 }
 0x423   : > { %v4871_v26 = vadd.f32 %v8243_v20, %v4646_v53  ;;  %v4179_v15 = vpop.permute.xlu0 %4178  ;;  %v4391_v45 = vld [vmem:[#allocation3 + $0x218] sm:$0xff]  ;;  %3230 = vst.msk [vmem:[#allocation3 + $0x270] sm:$0xff] %vm1075_vm5, %v3161_v46 }
 0x424   : > { %4251 = vst.msk [vmem:[#allocation3 + $0x230] sm:$0xff] %vm1461_vm7, %v4179_v15  ;;  %4733 = vmatprep.mubr.f32.mxu0 %v4391_v45 }
 0x425   : > { %v8384_v13 = vpop.f32.mrb[78].mxu1  ;;  %4734 = vmatmul.mubr.f32.gmra.mrb[108].mxu0 %v4390_v57  ;;  %v5020_v38 = vmul.f32 %v8395_v28, %v4871_v26 }
 0x426   : > { %v8387_v61 = vpop.f32.mrb[79].mxu1  ;;  %v3543_v60 = vpop.permute.xlu1 %3542  ;;  %v4396_v63 = vld [vmem:[#allocation3 + $0x240] sm:$0xff] }
 0x427   : > { %v3797_v18 = vpop.permute.xlu0 %3796  ;;  %3613 = vst.msk [vmem:[#allocation3 + $0x258] sm:$0xff] %vm1461_vm7, %v3543_v60 }
 0x428   : > { %3868 = vst.msk [vmem:[#allocation3 + $0x248] sm:$0xff] %vm1075_vm5, %v3797_v18  ;;  %v4650_v36 = vpop.f32.mrb[74].mxu0 }
 0x429   : > { %v4651_v20 = vadd.f32 %v8309_v58, %v4650_v36  ;;  %v4652_v24 = vpop.f32.mrb[75].mxu0 }
 0x42a   : > { %v3353_v25 = vpop.permute.xlu1 %3352 }
 0x42b   : > { %v4876_v34 = vadd.f32 %v8240_v35, %v4651_v20  ;;  %v3799_v33 = vpop.permute.xlu0 %3798  ;;  %v4394_v44 = vld [vmem:[#allocation3 + $0x230] sm:$0xff]  ;;  %3422 = vst.msk [vmem:[#allocation3 + $0x270] sm:$0xff] %vm1268_vm6, %v3353_v25  ;;  %v5017_v35 = vmul.f32 %v8395_v28, %v8337_v5  ;;  %v5019_v5 = vmul.f32 %v8395_v28, %v8371_v27 }
 0x42c   : > { %3869 = vst.msk [vmem:[#allocation3 + $0x260] sm:$0xff] %vm1075_vm5, %v3799_v33  ;;  %4738 = vmatprep.mubr.f32.mxu0 %v4394_v44 }
 0x42d   : > { %4739 = vmatmul.mubr.f32.gmra.mrb[110].mxu0 %v4393_v62 }
 0x42e   : > { %v3545_v17 = vpop.permute.xlu1 %3544  ;;  %v4399_v40 = vld [vmem:[#allocation3 + $0x258] sm:$0xff] }
 0x42f   : > { %5048 = vxpose.xlu0.b32.start [1/16] (narrow) %v5016_v21, 8  ;;  %v3989_v51 = vpop.permute.xlu0 %3988  ;;  %3614 = vst.msk [vmem:[#allocation3 + $0x270] sm:$0xff] %vm1461_vm7, %v3545_v17 }
 0x430   : > { %4060 = vst.msk [vmem:[#allocation3 + $0x248] sm:$0xff] %vm1268_vm6, %v3989_v51 }
 0x432   : > { %v3163_v11 = vpop.permute.xlu1 %3162 }
 0x433   : > { %5049 = vxpose.xlu0.b32.cont [2/16] (narrow) %v5017_v35, 8  ;;  %v4181_v43 = vpop.permute.xlu0 %4180  ;;  %3231 = vst.msk [vmem:[#allocation3 + $0x288] sm:$0xff] %vm1075_vm5, %v3163_v11 }
 0x434   : > { %4252 = vst.msk [vmem:[#allocation3 + $0x248] sm:$0xff] %vm1461_vm7, %v4181_v43 }
 0x436   : > { %v3355_v4 = vpop.permute.xlu1 %3354 }
 0x437   : > { %v3991_v50 = vpop.permute.xlu0 %3990  ;;  %5050 = vxpose.xlu0.b32.cont [3/16] (narrow) %v5018_v3, 8  ;;  %3423 = vst.msk [vmem:[#allocation3 + $0x288] sm:$0xff] %vm1268_vm6, %v3355_v4 }
 0x438   : > { %4061 = vst.msk [vmem:[#allocation3 + $0x260] sm:$0xff] %vm1268_vm6, %v3991_v50 }
 0x439   : > { %v4655_v14 = vpop.f32.mrb[76].mxu0  ;;  %v8412_v49 = vpop.f32.mrb[80].mxu1 }
 0x43a   : > { %v4656_v37 = vadd.f32 %v8309_v58, %v4655_v14  ;;  %v4657_v16 = vpop.f32.mrb[77].mxu0  ;;  %v8417_v9 = vpop.f32.mrb[81].mxu1 }
 0x43b   : > { %v4183_v59 = vpop.permute.xlu0 %4182  ;;  %5051 = vxpose.xlu0.b32.cont [4/16] (narrow) %v5019_v5, 8  ;;  %v4397_v23 = vld [vmem:[#allocation3 + $0x248] sm:$0xff]  ;;  %v3547_v39 = vpop.permute.xlu1 %3546 }
 0x43c   : > { %v4881_v32 = vadd.f32 %v8264_v56, %v4656_v37  ;;  %4253 = vst.msk [vmem:[#allocation3 + $0x260] sm:$0xff] %vm1461_vm7, %v4183_v59  ;;  %4743 = vmatprep.mubr.f32.mxu0 %v4397_v23  ;;  %3615 = vst.msk [vmem:[#allocation3 + $0x288] sm:$0xff] %vm1461_vm7, %v3547_v39  ;;  %v5021_v56 = vmul.f32 %v8395_v28, %v4876_v34  ;;  %v4402_v34 = vld [vmem:[#allocation3 + $0x270] sm:$0xff] }
 0x43d   : > { %4744 = vmatmul.mubr.f32.gmra.mrb[112].mxu0 %v4396_v63 }
 0x43e   : > { %v5022_v12 = vmul.f32 %v8395_v28, %v4881_v32 }
 0x43f   : > { %v3801_v54 = vpop.permute.xlu0 %3800  ;;  %5052 = vxpose.xlu0.b32.cont [5/16] (narrow) %v5020_v38, 8  ;;  %v3165_v48 = vpop.permute.xlu1 %3164 }
 0x440   : > { %3870 = vst.msk [vmem:[#allocation3 + $0x278] sm:$0xff] %vm1075_vm5, %v3801_v54  ;;  %3232 = vst.msk [vmem:[#allocation3 + $0x2a0] sm:$0xff] %vm1075_vm5, %v3165_v48  ;;  %v4660_v27 = vpop.f32.mrb[78].mxu0 }
 0x441   : > { %v4661_v41 = vadd.f32 %v8309_v58, %v4660_v27  ;;  %v4662_v22 = vpop.f32.mrb[79].mxu0 }
 0x443   : > { %v3803_v8 = vpop.permute.xlu0 %3802  ;;  %5053 = vxpose.xlu0.b32.cont [6/16] (narrow) %v5021_v56, 8  ;;  %v4400_v1 = vld [vmem:[#allocation3 + $0x260] sm:$0xff]  ;;  %v4886_v2 = vadd.f32 %v8250_v31, %v4661_v41  ;;  %v3357_v55 = vpop.permute.xlu1 %3356  ;;  %v4405_v11 = vld [vmem:[#allocation3 + $0x288] sm:$0xff] }
 0x444   : > { %3871 = vst.msk [vmem:[#allocation3 + $0x290] sm:$0xff] %vm1075_vm5, %v3803_v8  ;;  %4748 = vmatprep.mubr.f32.mxu0 %v4400_v1 }
 0x445   : > { %3424 = vst.msk [vmem:[#allocation3 + $0x2a0] sm:$0xff] %vm1268_vm6, %v3357_v55  ;;  %4749 = vmatmul.mubr.f32.gmra.mrb[114].mxu0 %v4399_v40  ;;  %v5023_v30 = vmul.f32 %v8395_v28, %v4886_v2 }
 0x447   : > { %v3993_v52 = vpop.permute.xlu0 %3992  ;;  %5054 = vxpose.xlu0.b32.cont [7/16] (narrow) %v5022_v12, 8  ;;  %v3549_v7 = vpop.permute.xlu1 %3548 }
 0x448   : > { %4062 = vst.msk [vmem:[#allocation3 + $0x278] sm:$0xff] %vm1268_vm6, %v3993_v52 }
 0x449   : > { %3616 = vst.msk [vmem:[#allocation3 + $0x2a0] sm:$0xff] %vm1461_vm7, %v3549_v7 }
 0x44b   : > { %v4185_v31 = vpop.permute.xlu0 %4184  ;;  %5055 = vxpose.xlu0.b32.cont [8/16] (narrow) %v5023_v30, 8  ;;  %v3167_v53 = vpop.permute.xlu1 %3166 }
 0x44c   : > { %4254 = vst.msk [vmem:[#allocation3 + $0x278] sm:$0xff] %vm1461_vm7, %v4185_v31 }
 0x44d   : > { %3233 = vst.msk [vmem:[#allocation3 + $0x2b8] sm:$0xff] %vm1075_vm5, %v3167_v53 }
 0x44e   : > { %v8436_v10 = vpop.f32.mrb[82].mxu1 }
 0x44f   : > { %v8438_v26 = vpop.f32.mrb[83].mxu1  ;;  %v3995_v15 = vpop.permute.xlu0 %3994 }
 0x450   : > { %4063 = vst.msk [vmem:[#allocation3 + $0x290] sm:$0xff] %vm1268_vm6, %v3995_v15  ;;  %v3359_v45 = vpop.permute.xlu1 %3358  ;;  %v4408_v39 = vld [vmem:[#allocation3 + $0x2a0] sm:$0xff] }
 0x451   : > { %v4665_v46 = vpop.f32.mrb[80].mxu0  ;;  %3425 = vst.msk [vmem:[#allocation3 + $0x2b8] sm:$0xff] %vm1268_vm6, %v3359_v45 }
 0x452   : > { %v4666_v57 = vadd.f32 %v8309_v58, %v4665_v46  ;;  %v4667_v18 = vpop.f32.mrb[81].mxu0 }
 0x453   : > { %v4187_v36 = vpop.permute.xlu0 %4186  ;;  %v4403_v20 = vld [vmem:[#allocation3 + $0x278] sm:$0xff] }
 0x454   : > { %v4891_v60 = vadd.f32 %v8278_v47, %v4666_v57  ;;  %4255 = vst.msk [vmem:[#allocation3 + $0x290] sm:$0xff] %vm1461_vm7, %v4187_v36  ;;  %v3551_v24 = vpop.permute.xlu1 %3550  ;;  %4753 = vmatprep.mubr.f32.mxu0 %v4403_v20 }
 0x455   : > { %3617 = vst.msk [vmem:[#allocation3 + $0x2b8] sm:$0xff] %vm1461_vm7, %v3551_v24  ;;  %4754 = vmatmul.mubr.f32.gmra.mrb[116].mxu0 %v4402_v34 }
 0x456   : > { %v5024_v33 = vmul.f32 %v8395_v28, %v4891_v60 }
 0x457   : > { %v3805_v44 = vpop.permute.xlu0 %3804 }
 0x458   : > { %5056 = vxpose.xlu0.b32.cont [9/16] (narrow) %v5024_v33, 8  ;;  %3872 = vst.msk [vmem:[#allocation3 + $0x2a8] sm:$0xff] %vm1075_vm5, %v3805_v44  ;;  %v3169_v25 = vpop.permute.xlu1 %3168  ;;  %v4670_v62 = vpop.f32.mrb[82].mxu0 }
 0x459   : > { %3234 = vst.msk [vmem:[#allocation3 + $0x2d0] sm:$0xff] %vm1075_vm5, %v3169_v25  ;;  %v4671_v47 = vadd.f32 %v8309_v58, %v4670_v62  ;;  %v4672_v21 = vpop.f32.mrb[83].mxu0 }
 0x45b   : > { %v4896_v51 = vadd.f32 %v8274_v29, %v4671_v47  ;;  %v3997_v17 = vpop.permute.xlu0 %3996  ;;  %v4406_v35 = vld [vmem:[#allocation3 + $0x290] sm:$0xff] }
 0x45c   : > { %4064 = vst.msk [vmem:[#allocation3 + $0x2a8] sm:$0xff] %vm1268_vm6, %v3997_v17  ;;  %v3361_v43 = vpop.permute.xlu1 %3360  ;;  %4758 = vmatprep.mubr.f32.mxu0 %v4406_v35  ;;  %v4411_v40 = vld [vmem:[#allocation3 + $0x2b8] sm:$0xff] }
 0x45d   : > { %3426 = vst.msk [vmem:[#allocation3 + $0x2d0] sm:$0xff] %vm1268_vm6, %v3361_v43  ;;  %4759 = vmatmul.mubr.f32.gmra.mrb[118].mxu0 %v4405_v11  ;;  %v5025_v3 = vmul.f32 %v8395_v28, %v4896_v51 }
 0x45f   : > { %v4189_v50 = vpop.permute.xlu0 %4188  ;;  %5057 = vxpose.xlu0.b32.cont [10/16] (narrow) %v5025_v3, 8 }
 0x460   : > { %4256 = vst.msk [vmem:[#allocation3 + $0x2a8] sm:$0xff] %vm1461_vm7, %v4189_v50  ;;  %v3553_v4 = vpop.permute.xlu1 %3552 }
 0x461   : > { %3618 = vst.msk [vmem:[#allocation3 + $0x2d0] sm:$0xff] %vm1461_vm7, %v3553_v4 }
 0x463   : > { %v3807_v29 = vpop.permute.xlu0 %3806 }
 0x464   : > { %v8456_v14 = vpop.f32.mrb[84].mxu1  ;;  %3873 = vst.msk [vmem:[#allocation3 + $0x2c0] sm:$0xff] %vm1075_vm5, %v3807_v29  ;;  %v3171_v5 = vpop.permute.xlu1 %3170 }
 0x465   : > { %v8459_v37 = vpop.f32.mrb[85].mxu1  ;;  %3235 = vst.msk [vmem:[#allocation3 + $0x2e8] sm:$0xff] %vm1075_vm5, %v3171_v5 }
 0x467   : > { %v3999_v16 = vpop.permute.xlu0 %3998  ;;  %v4409_v59 = vld [vmem:[#allocation3 + $0x2a8] sm:$0xff] }
 0x468   : > { %4065 = vst.msk [vmem:[#allocation3 + $0x2c0] sm:$0xff] %vm1268_vm6, %v3999_v16  ;;  %v3363_v23 = vpop.permute.xlu1 %3362  ;;  %4763 = vmatprep.mubr.f32.mxu0 %v4409_v59  ;;  %v4414_v45 = vld [vmem:[#allocation3 + $0x2d0] sm:$0xff] }
 0x469   : > { %v4675_v32 = vpop.f32.mrb[84].mxu0  ;;  %3427 = vst.msk [vmem:[#allocation3 + $0x2e8] sm:$0xff] %vm1268_vm6, %v3363_v23  ;;  %4764 = vmatmul.mubr.f32.gmra.mrb[120].mxu0 %v4408_v39 }
 0x46a   : > { %v4676_v63 = vadd.f32 %v8309_v58, %v4675_v32  ;;  %v4677_v38 = vpop.f32.mrb[85].mxu0 }
 0x46b   : > { %v4191_v48 = vpop.permute.xlu0 %4190 }
 0x46c   : > { %v4901_v54 = vadd.f32 %v8326_v6, %v4676_v63  ;;  %4257 = vst.msk [vmem:[#allocation3 + $0x2c0] sm:$0xff] %vm1461_vm7, %v4191_v48  ;;  %v3555_v27 = vpop.permute.xlu1 %3554 }
 0x46d   : > { %3619 = vst.msk [vmem:[#allocation3 + $0x2e8] sm:$0xff] %vm1461_vm7, %v3555_v27 }
 0x46e   : > { %v5026_v56 = vmul.f32 %v8395_v28, %v4901_v54 }
 0x46f   : > { %v3809_v41 = vpop.permute.xlu0 %3808 }
 0x470   : > { %5058 = vxpose.xlu0.b32.cont [11/16] (narrow) %v5026_v56, 8  ;;  %3874 = vst.msk [vmem:[#allocation3 + $0x2d8] sm:$0xff] %vm1075_vm5, %v3809_v41 }
 0x471   : > { %v4680_v22 = vpop.f32.mrb[86].mxu0 }
 0x472   : > { %v4681_v8 = vadd.f32 %v8309_v58, %v4680_v22  ;;  %v4682_v1 = vpop.f32.mrb[87].mxu0 }
 0x473   : > { %v4001_v55 = vpop.permute.xlu0 %4000  ;;  %v4412_v6 = vld [vmem:[#allocation3 + $0x2c0] sm:$0xff] }
 0x474   : > { %v4906_v2 = vadd.f32 %v8322_v19, %v4681_v8  ;;  %4066 = vst.msk [vmem:[#allocation3 + $0x2d8] sm:$0xff] %vm1268_vm6, %v4001_v55  ;;  %4768 = vmatprep.mubr.f32.mxu0 %v4412_v6  ;;  %v4417_v62 = vld [vmem:[#allocation3 + $0x2e8] sm:$0xff] }
 0x475   : > { %4769 = vmatmul.mubr.f32.gmra.mrb[122].mxu0 %v4411_v40 }
 0x476   : > { %v5027_v12 = vmul.f32 %v8395_v28, %v4906_v2 }
 0x477   : > { %v4193_v52 = vpop.permute.xlu0 %4192 }
 0x478   : > { %5059 = vxpose.xlu0.b32.cont [12/16] (narrow) %v5027_v12, 8  ;;  %v8474_v7 = vpop.f32.mrb[86].mxu1  ;;  %4258 = vst.msk [vmem:[#allocation3 + $0x2d8] sm:$0xff] %vm1461_vm7, %v4193_v52 }
 0x479   : > { %v8477_v30 = vpop.f32.mrb[87].mxu1 }
 0x47b   : > { %v3811_v31 = vpop.permute.xlu0 %3810 }
 0x47c   : > { %3875 = vst.msk [vmem:[#allocation3 + $0x2f0] sm:$0xff] %vm1075_vm5, %v3811_v31 }
 0x47f   : > { %v4003_v19 = vpop.permute.xlu0 %4002  ;;  %v4415_v53 = vld [vmem:[#allocation3 + $0x2d8] sm:$0xff] }
 0x480   : > { %4067 = vst.msk [vmem:[#allocation3 + $0x2f0] sm:$0xff] %vm1268_vm6, %v4003_v19  ;;  %v4685_v15 = vpop.f32.mrb[88].mxu0  ;;  %4773 = vmatprep.mubr.f32.mxu0 %v4415_v53 }
 0x481   : > { %v4686_v46 = vadd.f32 %v8309_v58, %v4685_v15  ;;  %v4687_v57 = vpop.f32.mrb[89].mxu0  ;;  %4774 = vmatmul.mubr.f32.gmra.mrb[124].mxu0 %v4414_v45 }
 0x483   : > { %v4911_v18 = vadd.f32 %v8364_v0, %v4686_v46  ;;  %v4195_v60 = vpop.permute.xlu0 %4194 }
 0x484   : > { %4259 = vst.msk [vmem:[#allocation3 + $0x2f0] sm:$0xff] %vm1461_vm7, %v4195_v60 }
 0x485   : > { %v5028_v36 = vmul.f32 %v8395_v28, %v4911_v18 }
 0x487   : > { %5060 = vxpose.xlu0.b32.cont [13/16] (narrow) %v5028_v36, 8 }
 0x488   : > { %v4690_v20 = vpop.f32.mrb[90].mxu0 }
 0x489   : > { %v4691_v24 = vadd.f32 %v8309_v58, %v4690_v20  ;;  %v4692_v34 = vpop.f32.mrb[91].mxu0 }
 0x48b   : > { %v4916_v33 = vadd.f32 %v8360_v42, %v4691_v24  ;;  %v4418_v44 = vld [vmem:[#allocation3 + $0x2f0] sm:$0xff] }
 0x48c   : > { %v8487_v25 = vpop.f32.mrb[88].mxu1  ;;  %4778 = vmatprep.mubr.f32.mxu0 %v4418_v44 }
 0x48d   : > { %v8489_v47 = vpop.f32.mrb[89].mxu1  ;;  %4779 = vmatmul.mubr.f32.gmra.mrb[126].mxu0 %v4417_v62  ;;  %v5029_v0 = vmul.f32 %v8395_v28, %v4916_v33 }
 0x48f   : > { %5061 = vxpose.xlu0.b32.cont [14/16] (narrow) %v5029_v0, 8 }
 0x499   : > { %v4695_v21 = vpop.f32.mrb[92].mxu0 }
 0x49a   : > { %v4696_v51 = vadd.f32 %v8309_v58, %v4695_v21  ;;  %v4697_v17 = vpop.f32.mrb[93].mxu0 }
 0x49c   : > { %v4921_v35 = vadd.f32 %v8387_v61, %v4696_v51 }
 0x49e   : > { %v5030_v43 = vmul.f32 %v8395_v28, %v4921_v35 }
 0x4a0   : > { %5062 = vxpose.xlu0.b32.cont [15/16] (narrow) %v5030_v43, 8  ;;  %v8495_v42 = vpop.f32.mrb[90].mxu1 }
 0x4a1   : > { %v8497_v3 = vpop.f32.mrb[91].mxu1 }
 0x4a2   : > { %v4700_v11 = vpop.f32.mrb[94].mxu0 }
 0x4a3   : > { %v4701_v50 = vadd.f32 %v8309_v58, %v4700_v11  ;;  %v4702_v4 = vpop.f32.mrb[95].mxu0 }
 0x4a5   : > { %v4926_v29 = vadd.f32 %v8384_v13, %v4701_v50 }
 0x4a7   : > { %v5031_v5 = vmul.f32 %v8395_v28, %v4926_v29 }
 0x4a9   : > { %5063 = vxpose.xlu0.b32.end [16/16] (narrow) %v5031_v5, 8 }
 0x4b0   : > { %v4705_v16 = vpop.f32.mrb[96].mxu0 }
 0x4b1   : > { %v4706_v59 = vadd.f32 %v8309_v58, %v4705_v16  ;;  %v4707_v61 = vpop.f32.mrb[97].mxu0 }
 0x4b3   : > { %v4931_v23 = vadd.f32 %v8417_v9, %v4706_v59  ;;  %v8504_v32 = vpop.f32.mrb[92].mxu1 }
 0x4b4   : > { %v8506_v39 = vpop.f32.mrb[93].mxu1 }
 0x4b5   : > { %v5032_v63 = vmul.f32 %v8395_v28, %v4931_v23 }
 0x4b7   : > { %5080 = vxpose.xlu1.b32.start [1/16] (narrow) %v5032_v63, 8 }
 0x4b8   : > { %v4710_v38 = vpop.f32.mrb[98].mxu0 }
 0x4b9   : > { %v4711_v54 = vadd.f32 %v8309_v58, %v4710_v38  ;;  %v4712_v13 = vpop.f32.mrb[99].mxu0 }
 0x4bb   : > { %v4936_v48 = vadd.f32 %v8412_v49, %v4711_v54 }
 0x4bd   : > { %v5033_v27 = vmul.f32 %v8395_v28, %v4936_v48 }
 0x4bf   : > { %5081 = vxpose.xlu1.b32.cont [2/16] (narrow) %v5033_v27, 8 }
 0x4c8   : > { %v4715_v56 = vpop.f32.mrb[100].mxu0 }
 0x4c9   : > { %v4716_v41 = vadd.f32 %v8309_v58, %v4715_v56  ;;  %v4717_v9 = vpop.f32.mrb[101].mxu0 }
 0x4cb   : > { %v4941_v22 = vadd.f32 %v8438_v26, %v4716_v41 }
 0x4cd   : > { %v5034_v8 = vmul.f32 %v8395_v28, %v4941_v22 }
 0x4cf   : > { %5082 = vxpose.xlu1.b32.cont [3/16] (narrow) %v5034_v8, 8 }
 0x4d0   : > { %v4720_v1 = vpop.f32.mrb[102].mxu0 }
 0x4d1   : > { %v4721_v2 = vadd.f32 %v8309_v58, %v4720_v1  ;;  %v4722_v55 = vpop.f32.mrb[103].mxu0  ;;  %v8518_v40 = vpop.f32.mrb[94].mxu1 }
 0x4d2   : > { %v8520_v12 = vpop.f32.mrb[95].mxu1 }
 0x4d3   : > { %v4946_v6 = vadd.f32 %v8436_v10, %v4721_v2 }
 0x4d5   : > { %v5035_v49 = vmul.f32 %v8395_v28, %v4946_v6 }
 0x4d7   : > { %5083 = vxpose.xlu1.b32.cont [4/16] (narrow) %v5035_v49, 8 }
 0x4e0   : > { %v4725_v52 = vpop.f32.mrb[104].mxu0 }
 0x4e1   : > { %v4726_v31 = vadd.f32 %v8309_v58, %v4725_v52  ;;  %v4727_v26 = vpop.f32.mrb[105].mxu0 }
 0x4e3   : > { %v4951_v19 = vadd.f32 %v8459_v37, %v4726_v31 }
 0x4e5   : > { %v5036_v53 = vmul.f32 %v8395_v28, %v4951_v19 }
 0x4e7   : > { %5084 = vxpose.xlu1.b32.cont [5/16] (narrow) %v5036_v53, 8 }
 0x4e8   : > { %v4730_v15 = vpop.f32.mrb[106].mxu0 }
 0x4e9   : > { %v4731_v45 = vadd.f32 %v8309_v58, %v4730_v15  ;;  %v4732_v10 = vpop.f32.mrb[107].mxu0 }
 0x4eb   : > { %v4956_v46 = vadd.f32 %v8456_v14, %v4731_v45 }
 0x4ed   : > { %v5037_v57 = vmul.f32 %v8395_v28, %v4956_v46  ;;  %v5064_v52 = vpop.trf.xlu0 }
 0x4ef   : > { %5085 = vxpose.xlu1.b32.cont [6/16] (narrow) %v5037_v57, 8 }
 0x4f8   : > { %v4735_v18 = vpop.f32.mrb[108].mxu0 }
 0x4f9   : > { %v4736_v60 = vadd.f32 %v8309_v58, %v4735_v18  ;;  %v4737_v36 = vpop.f32.mrb[109].mxu0 }
 0x4fb   : > { %v4961_v20 = vadd.f32 %v8477_v30, %v4736_v60 }
 0x4fd   : > { %v5038_v37 = vmul.f32 %v8395_v28, %v4961_v20 }
 0x4ff   : > { %5086 = vxpose.xlu1.b32.cont [7/16] (narrow) %v5038_v37, 8 }
 0x500   : > { %v4740_v24 = vpop.f32.mrb[110].mxu0 }
 0x501   : > { %v4741_v34 = vadd.f32 %v8309_v58, %v4740_v24  ;;  %v4742_v33 = vpop.f32.mrb[111].mxu0 }
 0x503   : > { %v4966_v44 = vadd.f32 %v8474_v7, %v4741_v34 }
 0x505   : > { %v5039_v14 = vmul.f32 %v8395_v28, %v4966_v44 }
 0x507   : > { %5087 = vxpose.xlu1.b32.cont [8/16] (narrow) %v5039_v14, 8 }
 0x510   : > { %v4745_v62 = vpop.f32.mrb[112].mxu0 }
 0x511   : > { %v4746_v0 = vadd.f32 %v8309_v58, %v4745_v62  ;;  %v4747_v21 = vpop.f32.mrb[113].mxu0 }
 0x513   : > { %v4971_v51 = vadd.f32 %v8489_v47, %v4746_v0 }
 0x515   : > { %v5040_v30 = vmul.f32 %v8395_v28, %v4971_v51 }
 0x517   : > { %5088 = vxpose.xlu1.b32.cont [9/16] (narrow) %v5040_v30, 8 }
 0x518   : > { %v4750_v17 = vpop.f32.mrb[114].mxu0 }
 0x519   : > { %v4751_v35 = vadd.f32 %v8309_v58, %v4750_v17  ;;  %v4752_v43 = vpop.f32.mrb[115].mxu0 }
 0x51b   : > { %v4976_v11 = vadd.f32 %v8487_v25, %v4751_v35 }
 0x51d   : > { %v5041_v7 = vmul.f32 %v8395_v28, %v4976_v11 }
 0x51f   : > { %5089 = vxpose.xlu1.b32.cont [10/16] (narrow) %v5041_v7, 8 }
 0x528   : > { %v4755_v50 = vpop.f32.mrb[116].mxu0 }
 0x529   : > { %v4756_v4 = vadd.f32 %v8309_v58, %v4755_v50  ;;  %v4757_v29 = vpop.f32.mrb[117].mxu0 }
 0x52b   : > { %v4981_v5 = vadd.f32 %v8497_v3, %v4756_v4 }
 0x52d   : > { %v5042_v47 = vmul.f32 %v8395_v28, %v4981_v5 }
 0x52f   : > { %5090 = vxpose.xlu1.b32.cont [11/16] (narrow) %v5042_v47, 8 }
 0x530   : > { %v4760_v16 = vpop.f32.mrb[118].mxu0 }
 0x531   : > { %v4761_v59 = vadd.f32 %v8309_v58, %v4760_v16  ;;  %v4762_v61 = vpop.f32.mrb[119].mxu0 }
 0x533   : > { %v4986_v23 = vadd.f32 %v8495_v42, %v4761_v59 }
 0x535   : > { %v5043_v25 = vmul.f32 %v8395_v28, %v4986_v23 }
 0x537   : > { %5091 = vxpose.xlu1.b32.cont [12/16] (narrow) %v5043_v25, 8 }
 0x53c   : > { %v4765_v63 = vpop.f32.mrb[120].mxu0 }
 0x53d   : > { %v4766_v38 = vadd.f32 %v8309_v58, %v4765_v63  ;;  %v4767_v54 = vpop.f32.mrb[121].mxu0 }
 0x53f   : > { %v4991_v13 = vadd.f32 %v8506_v39, %v4766_v38 }
 0x541   : > { %v5044_v3 = vmul.f32 %v8395_v28, %v4991_v13 }
 0x543   : > { %5092 = vxpose.xlu1.b32.cont [13/16] (narrow) %v5044_v3, 8 }
 0x548   : > { %v4770_v48 = vpop.f32.mrb[122].mxu0 }
 0x549   : > { %v4771_v27 = vadd.f32 %v8309_v58, %v4770_v48  ;;  %v4772_v56 = vpop.f32.mrb[123].mxu0 }
 0x54b   : > { %v4996_v41 = vadd.f32 %v8504_v32, %v4771_v27 }
 0x54d   : > { %v5045_v42 = vmul.f32 %v8395_v28, %v4996_v41 }
 0x54f   : > { %5093 = vxpose.xlu1.b32.cont [14/16] (narrow) %v5045_v42, 8 }
 0x554   : > { %v4775_v9 = vpop.f32.mrb[124].mxu0 }
 0x555   : > { %v4776_v22 = vadd.f32 %v8309_v58, %v4775_v9  ;;  %v4777_v8 = vpop.f32.mrb[125].mxu0 }
 0x557   : > { %v5001_v39 = vadd.f32 %v8520_v12, %v4776_v22  ;;  %v5370_v12 = vmul.f32 -1.442695, %v5064_v52 }
 0x559   : > { %v5046_v1 = vmul.f32 %v8395_v28, %v5001_v39  ;;  %5831 = vpow2.f32 %v5370_v12 }
 0x55b   : > { %5094 = vxpose.xlu1.b32.cont [15/16] (narrow) %v5046_v1, 8 }
 0x560   : > { %v4780_v2 = vpop.f32.mrb[126].mxu0 }
 0x561   : > { %v4781_v55 = vadd.f32 %v8309_v58, %v4780_v2  ;;  %v4782_v6 = vpop.f32.mrb[127].mxu0 }
 0x563   : > { %v5006_v32 = vadd.f32 %v8518_v40, %v4781_v55 }
 0x565   : > { %v5047_v49 = vmul.f32 %v8395_v28, %v5006_v32 }
 0x567   : > { %5095 = vxpose.xlu1.b32.end [16/16] (narrow) %v5047_v49, 8 }
 0x5ab   : > { %v5096_v58 = vpop.trf.xlu1 }
 0x5ac   : > { %v5371_v31 = vmul.f32 -1.442695, %v5096_v58  ;;  %v5114_v40 = vcombine.low %v5064_v52, %v5096_v58 }
 0x5ae   : > { %5833 = vpow2.f32 %v5371_v31  ;;  %5116 = vst [vmem:[%s329_s26] sm:$0xff] %v5114_v40 }
 0x5af   : > { %5854 = shalt.err (!%p5851_p3)
}
 0x5b0   : > { %s5855_s26 = scalar_lea.hbm %s8570_s29, 128  ;;  %s5859_s24 = scalar_lea.hbm %s8654_s8, 256 }
 0x5b1   : > { %p5856_p4 = scmp.ne.s32.totalorder %s8570_s29, %s5855_s26  ;;  %p5860_p9 = scmp.lt.u32.totalorder %s8570_s29, %s8654_s8 }
 0x5b2   : > { %p5861_p10 = scmp.lt.u32.totalorder %s5859_s24, %s5855_s26  ;;  %p5863_p12 = scmp.lt.u32.totalorder %s5855_s26, %s8570_s29 }
 0x5b3   : > { %p5857_p7 = pnand %p5856_p4, %p6032_p5 }
 0x5b4   : > { %p5862_p11 = por %p5861_p10, %p5860_p9 }
 0x5b5   : > { %p5858_p8 = pneg %p5857_p7 }
 0x5b6   : > { %p5864_p13 = por %p5863_p12, %p5862_p11 }
 0x5b8   : > { %p5865_p0 = pnand %p5864_p13, %p5858_p8 }
 0x5ba   : > { %5868 = shalt.err (!%p5865_p0)
}
 0x5bb   : > { %5782 = dma.vmem_to_hbm [thread:$0]  (%p6032_p5), %s8572_s27, 128, %s8570_s29, %s5137_s14   ;;  %v5832_v28 = vpop.eup %5831 }
 0x5bc   : > { %v5123_v26 = vadd.f32 1.0, %v5832_v28  ;;  %v5834_v19 = vpop.eup %5833  ;;  %s8660_s17 = sshll.u32 %s8559_s23, 3  ;;  %s8661_s26 = sshll.u32 %s6015_s13, 7 }
 0x5bd   : > { %v5124_v53 = vadd.f32 1.0, %v5834_v19  ;;  %s336_s22 = scalar_lea.vmem [#allocation6], %s8660_s17  ;;  %s8603_s27 = scalar_lea.hbm %s8655_s9, %s8661_s26 }
 0x5be   : > { %5835 = vrcp.f32 %v5123_v26  ;;  %s5170_s16 = sshll.u32 %s336_s22, 4  ;;  %s5142_s29 = scalar_lea.sflag [#allocation7], %s8559_s23  ;;  %s8605_s16 = int_to_ptr.vmem [resolvable:$true] %s5170_s16 }
 0x5bf   : > { %5837 = vrcp.f32 %v5124_v53  ;;  %s5869_s14 = scalar_lea.vmem %s8605_s16, 128  ;;  %s5943_s24 = smov [#allocation6]  }
 0x5c0   : > { %p5870_p1 = scmp.ne.s32.totalorder %s8605_s16, %s5869_s14  ;;  %s5873_s25 = sshll.u32 %s5943_s24, 4  ;;  %s5874_s25 = int_to_ptr.vmem [resolvable:$false] %s5873_s25 }
 0x5c1   : > { %s5875_s13 = scalar_lea.vmem %s5874_s25, 256  ;;  %p5876_p4 = scmp.lt.s32.totalorder %s8605_s16, %s5874_s25 }
 0x5c2   : > { %p5871_p2 = pnand %p5870_p1, %p6032_p5  ;;  %p5877_p7 = scmp.lt.s32.totalorder %s5875_s13, %s5869_s14 }
 0x5c4   : > { %p5872_p3 = pneg %p5871_p2  ;;  %p5878_p8 = por %p5877_p7, %p5876_p4 }
 0x5c6   : > { %p5879_p9 = pnand %p5878_p8, %p5872_p3 }
 0x5c8   : > { %v5836_v15 = vpop.eup %5835 }
 0x5c9   : > { %v5129_v45 = vadd.f32 0.5, %v5836_v15  ;;  %v5838_v10 = vpop.eup %5837 }
 0x5ca   : > { %v5130_v46 = vadd.f32 0.5, %v5838_v10 }
 0x5cc   : > { %v5133_v57 = vcombine.high %v5129_v45, %v5130_v46 }
 0x5ce   : > { %5135 = vst [vmem:[%s336_s22] sm:$0xff] %v5133_v57 }
 0x5cf   : > { %5882 = shalt.err (!%p5879_p9)
}
 0x5d0   : > { %s5883_s23 = scalar_lea.hbm %s8603_s27, 128  ;;  %s5887_s26 = scalar_lea.hbm %s8655_s9, 256 }
 0x5d1   : > { %p5884_p10 = scmp.ne.s32.totalorder %s8603_s27, %s5883_s23  ;;  %p5888_p13 = scmp.lt.u32.totalorder %s8603_s27, %s8655_s9 }
 0x5d2   : > { %p5889_p0 = scmp.lt.u32.totalorder %s5887_s26, %s5883_s23  ;;  %p5891_p2 = scmp.lt.u32.totalorder %s5883_s23, %s8603_s27 }
 0x5d3   : > { %p5885_p11 = pnand %p5884_p10, %p6032_p5 }
 0x5d4   : > { %p5890_p1 = por %p5889_p0, %p5888_p13 }
 0x5d5   : > { %p5886_p12 = pneg %p5885_p11 }
 0x5d6   : > { %p5892_p3 = por %p5891_p2, %p5890_p1 }
 0x5d8   : > { %p5893_p4 = pnand %p5892_p3, %p5886_p12 }
 0x5da   : > { %5896 = shalt.err (!%p5893_p4)
}
 0x5db   : > { %5783 = dma.vmem_to_hbm [thread:$0]  (%p6032_p5), %s8605_s16, 128, %s8603_s27, %s5142_s29  }
 0x5dc PF: > { %p5793_p7 = scmp.ge.s32.totalorder %s5935_s12, 2  ;;  %s5182_s14 = sand.u32 1, %s5923_s30  }
 0x5dd   : > { %s5183_s24 = scalar_lea.sflag [#allocation5], %s5182_s14 }
 0x5de   : > { %p5787_p8 = pnand %p5793_p7, %p6036_p6 }
 0x5e0   : > { %5914 = dma.done.wait (!%p5787_p8), %s5183_s24, 128  }
 0x5e1   : > { %5916 = vsyncadd (!%p5787_p8), %s5183_s24, 4294967168  ;;  %s5192_s25 = scalar_lea.sflag [#allocation7], %s5182_s14 }
 0x5e2   : > { %5918 = dma.done.wait (!%p5787_p8), %s5192_s25, 128  }
 0x5e3   : > { %5920 = vsyncadd (!%p5787_p8), %s5192_s25, 4294967168  ;;  %p23_p5 = scmp.ge.s32.totalorder %s6019_s15, 4   ;;  %s8662_s30 = smov %s5927_s10 }
 0x5e4   : > { %s8663_s10 = smov %s5931_s11  ;;  %s8664_s11 = smov %s6030_s18 }
 0x5e5   : > { %s8665_s12 = smov %s6019_s15  ;;  %25 = sbr.rel (!%p23_p5) target bundleno = 5 (0x5), region = 107 }
 0x5ec   :  { %5197 = vsyncpa [#allocation5], 1 }
 0x5ed   :  { %5199 = vsyncpa [#allocation5 + $0x1], 1 }
 0x5ee   :  { %5200 = vsyncpa [#allocation7], 1 }
 0x5ef   :  { %5202 = vsyncpa [#allocation7 + $0x1], 1 }

</bundles_post_ra>
